<compile_context>
chip_gen: v6e
topology: v6e:2x2x1
jax: 0.10.0
libtpu: 0.0.40
codegen_flags: <defaults>
</compile_context>

<pallas_src>
import functools

import jax
import jax.numpy as jnp
from jax.experimental import pallas as pl
from jax.experimental.pallas import tpu as pltpu


# ----------------------------------------------------------------------------
# Fused hierarchy kernel: grid = (batch_chunk, layer); ctx carried in VMEM
# ----------------------------------------------------------------------------
def _protran_stack_kernel(*refs, Tm, D, dl, Bb, sample):
    if sample:
        (h_ref, bias_ref, noise_ref, pe_ref,
         w_qkv_ref, w_ckv_ref, w_dd_ref, w_mv_ref, w_zw_ref,
         vecs_d_ref, vecs_dl_ref,
         lat_ref, w_ref, what_ref, ctx_ref) = refs
    else:
        (h_ref, bias_ref, pe_ref,
         w_qkv_ref, w_ckv_ref, w_dd_ref, w_mv_ref, w_zw_ref,
         vecs_d_ref, vecs_dl_ref,
         lat_ref, w_ref, what_ref, ctx_ref) = refs
        noise_ref = None

    layer = pl.program_id(1)
    last = pl.num_programs(1) - 1
    N = 2 * Bb                       # path-major row stack: [prior ; encoder]
    bf16, f32 = jnp.bfloat16, jnp.float32

    # ---- small per-layer vectors --------------------------------------------
    vd = vecs_d_ref[...]                              # (7, D) f32
    g1, b1 = vd[0:1, :], vd[1:2, :]
    g2, b2 = vd[2:3, :], vd[3:4, :]
    g4, b4 = vd[4:5, :], vd[5:6, :]
    b_zw = vd[6:7, :]
    b_mv = vecs_dl_ref[...]                           # (1, 2*dl): [b_mu | b_var]

    H = h_ref[...]                                    # (2, Bb, Tm, D) f32: [h_p ; h_q]
    bias = bias_ref[...]                              # (Bb, 2, Tm) additive (-1e9 * mask)
    pe = pe_ref[...]                                  # (Tm, D)

    w_dd = w_dd_ref[...]                              # (D, 3D) bf16, column fused
    w_self_o = w_dd[:, 0:D]
    w_cross_q = w_dd[:, D:2 * D]                      # pre-scaled by 1/sqrt(D)
    w_cross_o = w_dd[:, 2 * D:3 * D]

    # Layer 0 conditions each path on the input projections.
    @pl.when(layer == 0)
    def _():
        ctx_ref[...] = H.reshape(N, Tm, D)

    ctx = ctx_ref[...]                                # rows [0:Bb]=ctx_p, [Bb:N]=ctx_q

    def mm(x_2d, w_bf):
        return jnp.dot(x_2d.astype(bf16), w_bf, preferred_element_type=f32)

    def layer_norm(x, g, b):
        mu = jnp.mean(x, axis=-1, keepdims=True)
        xc = x - mu
        var = jnp.mean(xc * xc, axis=-1, keepdims=True)
        return xc * jax.lax.rsqrt(var + 1e-5) * g + b

    def attend(q_bf, k_bf, v_bf, add_bias):
        # q/k/v: (n, Tm, D) bf16; add_bias: (n, 1, Tm) f32.  Q already scaled.
        logits = jnp.einsum('nqd,nkd->nqk', q_bf, k_bf,
                            preferred_element_type=f32) + add_bias
        logits = logits - jnp.max(logits, axis=-1, keepdims=True)
        p = jnp.exp(logits)
        p = p * pl.reciprocal(jnp.sum(p, axis=-1, keepdims=True), approx=True)
        return jnp.einsum('nqk,nkd->nqd', p.astype(bf16), v_bf,
                          preferred_element_type=f32)

    def softplus(x):
        return jnp.where(x > 0.0, x, 0.0) + jnp.log(1.0 + jnp.exp(-jnp.abs(x)))

    bias_hist = bias[:, 0, :]                         # (Bb, Tm)
    bias_seq = bias[:, 1, :]                          # (Bb, Tm)
    # NOTE: assumes no query row is fully masked (T0 >= 1 and T >= 1).
    self_bias = jnp.concatenate([bias_seq, bias_seq], axis=0)[:, None, :]    # (N,1,Tm)
    cross_bias = jnp.concatenate([bias_hist, bias_seq], axis=0)[:, None, :]  # (N,1,Tm)

    # ---- self-attention (prior & encoder; prior-loss is a duplicate) --------
    qkv = mm(ctx.reshape(N * Tm, D), w_qkv_ref[...]).reshape(N, Tm, 3 * D)
    q_s = qkv[..., 0:D].astype(bf16)
    k_s = qkv[..., D:2 * D].astype(bf16)
    v_s = qkv[..., 2 * D:3 * D].astype(bf16)
    a_s = attend(q_s, k_s, v_s, self_bias)                       # (N, Tm, D) f32
    a_o = mm(a_s.reshape(N * Tm, D), w_self_o).reshape(N, Tm, D)
    w_bar = layer_norm(ctx + a_o, g1, b1)                        # LN1

    # ---- cross-attention ------------------------------------------------------
    q_c = mm(w_bar.reshape(N * Tm, D), w_cross_q).reshape(N, Tm, D)
    kv = mm(H.reshape(N * Tm, D), w_ckv_ref[...]).reshape(N, Tm, 2 * D)
    k_c = kv[..., 0:D].astype(bf16)                   # rows [0:Bb]=K(h_p), [Bb:N]=K(h_q)
    v_c = kv[..., D:2 * D].astype(bf16)
    q_c_bf = q_c.astype(bf16)
    c_pq = attend(q_c_bf, k_c, v_c, cross_bias)                  # (N, Tm, D) f32
    c_pq_o = mm(c_pq.reshape(N * Tm, D), w_cross_o).reshape(N, Tm, D)
    w_hat = layer_norm(w_bar + c_pq_o, g2, b2)                   # LN2 (prior, encoder)

    # Prior-loss path: ctx_pl == ctx_p at layer 0 and ctx_q for layers >= 1, so
    # only its cross-attention (K/V of h_p + history mask) differs.
    is_l0 = layer == 0
    q_pl = jnp.where(is_l0, q_c_bf[0:Bb], q_c_bf[Bb:N])
    w_bar_pl = jnp.where(is_l0, w_bar[0:Bb], w_bar[Bb:N])
    c_pl = attend(q_pl, k_c[0:Bb], v_c[0:Bb], bias_hist[:, None, :])
    c_pl_o = mm(c_pl.reshape(Bb * Tm, D), w_cross_o).reshape(Bb, Tm, D)
    w_hat_pl = layer_norm(w_bar_pl + c_pl_o, g2, b2)

    # ---- latent heads ([mu | var] columns; softplus on the var half) ---------
    col_is_var = jax.lax.broadcasted_iota(jnp.int32, (1, 2 * dl), 1) >= dl

    def latent_head(x_2d):
        mv = mm(x_2d, w_mv_ref[...]) + b_mv
        return jnp.where(col_is_var, softplus(mv) + 1e-6, mv)

    mv_pq = latent_head(w_hat.reshape(N * Tm, D))                # (N*Tm, 2*dl)
    mv_pl = latent_head(w_hat_pl.reshape(Bb * Tm, D))            # (Bb*Tm, 2*dl)

    lat_ref[0] = mv_pq[0:Bb * Tm].reshape(Bb, Tm, 2 * dl)        # prior
    lat_ref[1] = mv_pl.reshape(Bb, Tm, 2 * dl)                   # prior-loss
    lat_ref[2] = mv_pq[Bb * Tm:N * Tm].reshape(Bb, Tm, 2 * dl)   # encoder

    # ---- sample z and map back to w (prior & encoder; loss-path w is dead) ---
    mu_pq = mv_pq[:, 0:dl]
    if sample:
        var_pq = mv_pq[:, dl:2 * dl]
        eps = noise_ref[...].reshape(N * Tm, dl)
        z = mu_pq + jnp.sqrt(var_pq) * eps
    else:
        z = mu_pq
    z2w = mm(z, w_zw_ref[...]) + b_zw                            # (N*Tm, D)
    w_new = layer_norm(w_hat + z2w.reshape(N, Tm, D) + pe[None], g4, b4)   # LN4

    # ---- last layer: emit w / w_hat; otherwise carry ctx to the next layer ---
    @pl.when(layer == last)
    def _():
        w_ref[...] = w_new.reshape(2, Bb, Tm, D)
        what_ref[...] = w_hat.reshape(2, Bb, Tm, D)

    @pl.when(layer != last)
    def _():
        ctx_ref[...] = w_new          # ctx_p <- w_p, ctx_q <- w_q (pl path reuses ctx_q)
    # TODO(synk): protran_layers[i].reset_k_encoder_layer() is a stateful torch cache
    #             reset; this implementation is stateless so it is a no-op.


# ----------------------------------------------------------------------------
# pallas_call wrapper (one launch for the whole hierarchy)
# ----------------------------------------------------------------------------
def protran_stack_call(h, bias, noise, pe, packed, use_sampling, batch_block=None):
    _, B, Tm, D = h.shape
    (w_qkv, w_ckv, w_dd, w_mv, w_zw, vecs_d, vecs_dl) = packed
    L = w_qkv.shape[0]
    dl = w_zw.shape[1]
    f32 = jnp.float32

    if batch_block is None:
        Bb = B // 2 if (B % 2 == 0 and B >= 4) else B   # keep >=2 parallel steps when possible
    else:
        Bb = batch_block
    assert B % Bb == 0, "batch must be divisible by the batch block"

    per_chunk_h = lambda bi, l: (0, bi, 0, 0)
    per_chunk_b = lambda bi, l: (bi, 0, 0)
    per_layer_w = lambda bi, l: (l, 0, 0)
    per_layer_bl = lambda bi, l: (l, bi, 0, 0)

    in_specs = [
        pl.BlockSpec((2, Bb, Tm, D), per_chunk_h),      # h = [h_p ; h_q]
        pl.BlockSpec((Bb, 2, Tm), per_chunk_b),         # additive mask bias [hist ; seq]
    ]
    inputs = [h, bias]
    if use_sampling:
        in_specs.append(pl.BlockSpec((2, Bb, Tm, dl), per_layer_bl))   # noise (2L, B, Tm, dl)
        inputs.append(noise)
    in_specs += [
        pl.BlockSpec((Tm, D), lambda bi, l: (0, 0)),    # positional encoding
        pl.BlockSpec((None, D, 3 * D), per_layer_w),    # fused self QKV (Q pre-scaled)
        pl.BlockSpec((None, D, 2 * D), per_layer_w),    # fused cross KV
        pl.BlockSpec((None, D, 3 * D), per_layer_w),    # [self_o | cross_q | cross_o]
        pl.BlockSpec((None, D, 2 * dl), per_layer_w),   # fused [w_mu | w_var]
        pl.BlockSpec((None, dl, D), per_layer_w),       # w_zw
        pl.BlockSpec((None, 7, D), per_layer_w),        # LN gammas/betas + b_zw
        pl.BlockSpec((None, 1, 2 * dl), per_layer_w),   # [b_mu | b_var]
    ]
    inputs += [pe, w_qkv, w_ckv, w_dd, w_mv, w_zw, vecs_d, vecs_dl]

    out_shape = (
        jax.ShapeDtypeStruct((3 * L, B, Tm, 2 * dl), f32),   # latents [p; p_loss; q] per layer
        jax.ShapeDtypeStruct((2, B, Tm, D), f32),            # last-layer [w_p ; w_q]
        jax.ShapeDtypeStruct((2, B, Tm, D), f32),            # last-layer [w_p_hat ; w_q_hat]
    )
    out_specs = (
        pl.BlockSpec((3, Bb, Tm, 2 * dl), per_layer_bl),
        pl.BlockSpec((2, Bb, Tm, D), per_chunk_h),           # resident across layer axis
        pl.BlockSpec((2, Bb, Tm, D), per_chunk_h),           # resident across layer axis
    )

    kernel = functools.partial(_protran_stack_kernel, Tm=Tm, D=D, dl=dl,
                               Bb=Bb, sample=use_sampling)

    return pl.pallas_call(
        kernel,
        out_shape=out_shape,
        grid=(B // Bb, L),
        in_specs=in_specs,
        out_specs=out_specs,
        scratch_shapes=[pltpu.VMEM((2 * Bb, Tm, D), f32)],   # [ctx_p ; ctx_q] layer carry
        compiler_params=pltpu.CompilerParams(
            dimension_semantics=("parallel", "arbitrary"),
            vmem_limit_bytes=32 * 1024 * 1024),
    )(*inputs)


# ----------------------------------------------------------------------------
# Host-side weight packing (20 per-layer tensors -> 7 stacked arrays)
# ----------------------------------------------------------------------------
def _pack_params(layer_params):
    bf16, f32 = jnp.bfloat16, jnp.float32
    D = layer_params[0][0].shape[0]
    scale = 1.0 / (float(D) ** 0.5)          # single head: head_dim == d_model

    def stack(fn, dt):
        return jnp.stack([fn(p) for p in layer_params], axis=0).astype(dt)

    w_qkv = stack(lambda p: jnp.concatenate([p[0] * scale, p[1], p[2]], axis=1), bf16)
    w_ckv = stack(lambda p: jnp.concatenate([p[5], p[6]], axis=1), bf16)
    w_dd = stack(lambda p: jnp.concatenate([p[3], p[4] * scale, p[7]], axis=1), bf16)
    w_mv = stack(lambda p: jnp.concatenate([p[14], p[16]], axis=1), bf16)
    w_zw = stack(lambda p: p[18], bf16)
    vecs_d = stack(lambda p: jnp.concatenate(
        [p[8], p[9], p[10], p[11], p[12], p[13], p[19]], axis=0), f32)
    vecs_dl = stack(lambda p: jnp.concatenate([p[15], p[17]], axis=1), f32)
    return w_qkv, w_ckv, w_dd, w_mv, w_zw, vecs_d, vecs_dl


def sinusoidal_pe(Tm, D):
    pos = jnp.arange(Tm, dtype=jnp.float32)[:, None]
    i = jnp.arange(D // 2, dtype=jnp.float32)[None, :]
    angle = pos / jnp.power(10000.0, 2.0 * i / D)
    pe = jnp.zeros((Tm, D), jnp.float32)
    pe = pe.at[:, 0::2].set(jnp.sin(angle))
    pe = pe.at[:, 1::2].set(jnp.cos(angle))
    return pe


# ----------------------------------------------------------------------------
# Hierarchy forward (= the torch module's forward)
# ----------------------------------------------------------------------------
def protran_hierarchy_forward(layer_params, input_projection_p, input_projection_q,
                              key_padding_mask_history, key_padding_mask_sequence,
                              rng_key, use_sampling=True, batch_block=None):
    L = len(layer_params)
    B, Tm, D = input_projection_p.shape
    dl = layer_params[0][14].shape[1]
    f32 = jnp.float32

    h = jnp.stack([input_projection_p, input_projection_q], axis=0).astype(f32)  # (2,B,Tm,D)
    bias = jnp.stack([key_padding_mask_history.astype(f32),
                      key_padding_mask_sequence.astype(f32)], axis=1) * (-1e9)   # (B,2,Tm)
    pe = sinusoidal_pe(Tm, D)
    packed = _pack_params(layer_params)

    noise = (jax.random.normal(rng_key, (L, 2, B, Tm, dl), f32).reshape(2 * L, B, Tm, dl)
             if use_sampling else None)

    lat, w_out, what_out = protran_stack_call(h, bias, noise, pe, packed,
                                              use_sampling, batch_block)

    lat = lat.reshape(L, 3, B, Tm, 2 * dl)
    mu_p, var_p = lat[:, 0, ..., 0:dl], lat[:, 0, ..., dl:2 * dl]
    mu_p_loss, var_p_loss = lat[:, 1, ..., 0:dl], lat[:, 1, ..., dl:2 * dl]
    mu_q, var_q = lat[:, 2, ..., 0:dl], lat[:, 2, ..., dl:2 * dl]
    w_p, w_q = w_out[0], w_out[1]
    w_p_hat, w_q_hat = what_out[0], what_out[1]
    return (mu_p, var_p, mu_p_loss, var_p_loss, mu_q, var_q,
            w_p_hat, w_p, w_q_hat, w_q)


# ----------------------------------------------------------------------------
# Parameter init (shapes implied by the module's __init__)
# ----------------------------------------------------------------------------
def init_layer_params(key, D, dl):
    ks = jax.random.split(key, 11)

    def w(k, shape, scale=0.1):
        return (scale * jax.random.normal(k, shape)).astype(jnp.float32)

    return (
        # single-head self-attention (q, k, v, out)
        w(ks[0], (D, D)), w(ks[1], (D, D)), w(ks[2], (D, D)), w(ks[3], (D, D)),
        # single-head cross-attention (q, k, v, out)
        w(ks[4], (D, D)), w(ks[5], (D, D)), w(ks[6], (D, D)), w(ks[7], (D, D)),
        # LayerNorms ln1, ln2, ln4 (gamma, beta)
        jnp.ones((1, D), jnp.float32), jnp.zeros((1, D), jnp.float32),
        jnp.ones((1, D), jnp.float32), jnp.zeros((1, D), jnp.float32),
        jnp.ones((1, D), jnp.float32), jnp.zeros((1, D), jnp.float32),
        # latent heads: mu, var (softplus) and mlp_latent_to_w
        w(ks[8], (D, dl)), jnp.zeros((1, dl), jnp.float32),
        w(ks[9], (D, dl)), jnp.zeros((1, dl), jnp.float32),
        w(ks[10], (dl, D)), jnp.zeros((1, D), jnp.float32),
    )


# ----------------------------------------------------------------------------
# Pure-JAX f32 reference (use_sampling=False) for a correctness cross-check
# ----------------------------------------------------------------------------
def _reference_forward(layer_params, ip_p, ip_q, m_hist, m_seq):
    B, Tm, D = ip_p.shape
    pe = sinusoidal_pe(Tm, D)
    scale = 1.0 / (float(D) ** 0.5)

    def ln(x, g, b):
        mu = jnp.mean(x, -1, keepdims=True)
        var = jnp.mean((x - mu) ** 2, -1, keepdims=True)
        return (x - mu) * jax.lax.rsqrt(var + 1e-5) * g + b

    def attn(x, kv, mask, wq, wk, wv, wo):
        q, k, v = x @ wq, kv @ wk, kv @ wv
        logits = jnp.einsum('btd,bsd->bts', q, k) * scale + mask[:, None, :] * (-1e9)
        p = jax.nn.softmax(logits, axis=-1)
        return jnp.einsum('bts,bsd->btd', p, v) @ wo

    def layer(params, ctx_p, ctx_pl, ctx_q):
        (wq_s, wk_s, wv_s, wo_s, wq_c, wk_c, wv_c, wo_c,
         g1, b1, g2, b2, g4, b4, w_mu, b_mu, w_var, b_var, w_zw, b_zw) = params

        def path(ctx, kv, cmask):
            w_bar = ln(ctx + attn(ctx, ctx, m_seq, wq_s, wk_s, wv_s, wo_s), g1, b1)
            w_hat = ln(w_bar + attn(w_bar, kv, cmask, wq_c, wk_c, wv_c, wo_c), g2, b2)
            mu = w_hat @ w_mu + b_mu
            var = jnp.logaddexp(w_hat @ w_var + b_var, 0.0) + 1e-6
            w = ln(w_hat + mu @ w_zw + b_zw + pe, g4, b4)   # z = mu (no sampling)
            return w, w_hat, mu, var

        wp, wph, mup, varp = path(ctx_p, ip_p, m_hist)
        _, _, mupl, varpl = path(ctx_pl, ip_p, m_hist)
        wq, wqh, muq, varq = path(ctx_q, ip_q, m_seq)
        return wp, wph, mup, varp, mupl, varpl, wq, wqh, muq, varq

    ctx_p, ctx_pl, ctx_q = ip_p, ip_p, ip_q
    mu_p, var_p, mu_pl, var_pl, mu_q, var_q = [], [], [], [], [], []
    wp = wph = wq = wqh = None
    for params in layer_params:
        (wp, wph, mp, vp, mpl, vpl, wq, wqh, mq, vq) = layer(params, ctx_p, ctx_pl, ctx_q)
        mu_p.append(mp); var_p.append(vp); mu_pl.append(mpl); var_pl.append(vpl)
        mu_q.append(mq); var_q.append(vq)
        ctx_p, ctx_pl, ctx_q = wp, wq, wq
    st = lambda xs: jnp.stack(xs, 0)
    return (st(mu_p), st(var_p), st(mu_pl), st(var_pl), st(mu_q), st(var_q),
            wph, wp, wqh, wq)


# ----------------------------------------------------------------------------
# Demo
# ----------------------------------------------------------------------------
if __name__ == "__main__":
    key = jax.random.PRNGKey(0)
    B, Tm, D, dl = 4, 8, 32, 16
    num_layers, T0, T = 2, 5, 7      # history length T0, true sequence length T

    k_hq, k_params, k_noise = jax.random.split(key, 3)

    # full input projection h_{1:T} and history-masked version h_{1:T0}
    input_projection_q = jax.random.normal(k_hq, (B, Tm, D), jnp.float32)
    time_idx = jnp.arange(Tm)
    input_projection_p = jnp.where((time_idx < T0)[None, :, None],
                                   input_projection_q, 0.0)

    # key padding masks (True = masked), as in torch MultiheadAttention
    key_padding_mask_history = jnp.broadcast_to((time_idx >= T0)[None, :], (B, Tm))
    key_padding_mask_sequence = jnp.broadcast_to((time_idx >= T)[None, :], (B, Tm))

    layer_keys = jax.random.split(k_params, num_layers)
    layer_params = tuple(init_layer_params(k, D, dl) for k in layer_keys)

    # ---- sampled forward (use_sampling=True) --------------------------------
    outs = protran_hierarchy_forward(
        layer_params, input_projection_p, input_projection_q,
        key_padding_mask_history, key_padding_mask_sequence,
        k_noise, use_sampling=True, batch_block=2)
    outs = jax.block_until_ready(outs)
    (mu_p, var_p, mu_p_loss, var_p_loss, mu_q, var_q,
     w_p_hat, w_p, w_q_hat, w_q) = outs

    assert mu_p.shape == (num_layers, B, Tm, dl)
    assert var_q.shape == (num_layers, B, Tm, dl)
    assert w_p.shape == (B, Tm, D) and w_q_hat.shape == (B, Tm, D)
    assert bool(jnp.all(jnp.isfinite(w_p))) and bool(jnp.all(var_p > 0.0))
    assert bool(jnp.all(jnp.isfinite(w_q))) and bool(jnp.all(var_q > 0.0))

    # ---- deterministic forward vs pure-JAX reference ------------------------
    outs_det = protran_hierarchy_forward(
        layer_params, input_projection_p, input_projection_q,
        key_padding_mask_history, key_padding_mask_sequence,
        k_noise, use_sampling=False, batch_block=2)
    outs_det = jax.block_until_ready(outs_det)
    refs_det = _reference_forward(
        layer_params, input_projection_p, input_projection_q,
        key_padding_mask_history.astype(jnp.float32),
        key_padding_mask_sequence.astype(jnp.float32))
    max_err = max(float(jnp.max(jnp.abs(a - b))) for a, b in zip(outs_det, refs_det))
    assert max_err < 0.2, f"kernel/reference mismatch: max abs err = {max_err}"

    # noise only affects the z -> w tail, so layer-0 latents must agree between
    # the sampled and deterministic runs.
    assert bool(jnp.allclose(mu_p[0], outs_det[0][0], atol=1e-4))

    print("KERNEL_OK")
</pallas_src>

<mosaic_0001>
module attributes {stable_mosaic.version = 11 : i64} {
  func.func @_protran_stack_kernel(%arg0: i32, %arg1: i32, %arg2: memref<2x2x8x32xf32, #tpu.memory_space<vmem>>, %arg3: memref<2x2x8xf32, #tpu.memory_space<vmem>>, %arg4: memref<2x2x8x16xf32, #tpu.memory_space<vmem>>, %arg5: memref<8x32xf32, #tpu.memory_space<vmem>>, %arg6: memref<1x32x96xbf16, #tpu.memory_space<vmem>>, %arg7: memref<1x32x64xbf16, #tpu.memory_space<vmem>>, %arg8: memref<1x32x96xbf16, #tpu.memory_space<vmem>>, %arg9: memref<1x32x32xbf16, #tpu.memory_space<vmem>>, %arg10: memref<1x16x32xbf16, #tpu.memory_space<vmem>>, %arg11: memref<1x7x32xf32, #tpu.memory_space<vmem>>, %arg12: memref<1x1x32xf32, #tpu.memory_space<vmem>>, %arg13: memref<3x2x8x32xf32, #tpu.memory_space<vmem>>, %arg14: memref<2x2x8x32xf32, #tpu.memory_space<vmem>>, %arg15: memref<2x2x8x32xf32, #tpu.memory_space<vmem>>, %arg16: memref<4x8x32xf32, #tpu.memory_space<vmem>>) attributes {dimension_semantics = [#tpu.dimension_semantics<parallel>, #tpu.dimension_semantics<arbitrary>], iteration_bounds = array<i64: 2, 2>, scalar_prefetch = 0 : i64, scratch_operands = 1 : i64, tpu.core_type = #tpu.core_type<tc>, window_params = [{transform_indices = @transform_0, window_bounds = array<i64: 2, 2, 8, 32>}, {transform_indices = @transform_1, window_bounds = array<i64: 2, 2, 8>}, {transform_indices = @transform_2, window_bounds = array<i64: 2, 2, 8, 16>}, {pipeline_mode = #tpu.pipeline_mode<synchronous>, transform_indices = @transform_3, window_bounds = array<i64: 8, 32>}, {transform_indices = @transform_4, window_bounds = array<i64: 1, 32, 96>}, {transform_indices = @transform_5, window_bounds = array<i64: 1, 32, 64>}, {transform_indices = @transform_6, window_bounds = array<i64: 1, 32, 96>}, {transform_indices = @transform_7, window_bounds = array<i64: 1, 32, 32>}, {transform_indices = @transform_8, window_bounds = array<i64: 1, 16, 32>}, {transform_indices = @transform_9, window_bounds = array<i64: 1, 7, 32>}, {transform_indices = @transform_10, window_bounds = array<i64: 1, 1, 32>}, {transform_indices = @transform_11, window_bounds = array<i64: 3, 2, 8, 32>}, {transform_indices = @transform_12, window_bounds = array<i64: 2, 2, 8, 32>}, {transform_indices = @transform_13, window_bounds = array<i64: 2, 2, 8, 32>}]} {
    %c0 = arith.constant 0 : index
    %c0_0 = arith.constant 0 : index
    %c0_1 = arith.constant 0 : index
    %0 = vector.load %arg11[%c0, %c0_0, %c0_1] : memref<1x7x32xf32, #tpu.memory_space<vmem>>, vector<1x7x32xf32>
    %1 = vector.shape_cast %0 : vector<1x7x32xf32> to vector<7x32xf32>
    %2 = vector.extract_strided_slice %1 {offsets = [0, 0], sizes = [1, 32], strides = [1, 1]} : vector<7x32xf32> to vector<1x32xf32>
    %3 = vector.extract_strided_slice %1 {offsets = [1, 0], sizes = [1, 32], strides = [1, 1]} : vector<7x32xf32> to vector<1x32xf32>
    %4 = vector.extract_strided_slice %1 {offsets = [2, 0], sizes = [1, 32], strides = [1, 1]} : vector<7x32xf32> to vector<1x32xf32>
    %5 = vector.extract_strided_slice %1 {offsets = [3, 0], sizes = [1, 32], strides = [1, 1]} : vector<7x32xf32> to vector<1x32xf32>
    %6 = vector.extract_strided_slice %1 {offsets = [4, 0], sizes = [1, 32], strides = [1, 1]} : vector<7x32xf32> to vector<1x32xf32>
    %7 = vector.extract_strided_slice %1 {offsets = [5, 0], sizes = [1, 32], strides = [1, 1]} : vector<7x32xf32> to vector<1x32xf32>
    %8 = vector.extract_strided_slice %1 {offsets = [6, 0], sizes = [1, 32], strides = [1, 1]} : vector<7x32xf32> to vector<1x32xf32>
    %c0_2 = arith.constant 0 : index
    %c0_3 = arith.constant 0 : index
    %c0_4 = arith.constant 0 : index
    %9 = vector.load %arg12[%c0_2, %c0_3, %c0_4] : memref<1x1x32xf32, #tpu.memory_space<vmem>>, vector<1x1x32xf32>
    %10 = vector.shape_cast %9 : vector<1x1x32xf32> to vector<1x32xf32>
    %c0_5 = arith.constant 0 : index
    %c0_6 = arith.constant 0 : index
    %c0_7 = arith.constant 0 : index
    %c0_8 = arith.constant 0 : index
    %11 = vector.load %arg2[%c0_5, %c0_6, %c0_7, %c0_8] : memref<2x2x8x32xf32, #tpu.memory_space<vmem>>, vector<2x2x8x32xf32>
    %c0_9 = arith.constant 0 : index
    %c0_10 = arith.constant 0 : index
    %c0_11 = arith.constant 0 : index
    %12 = vector.load %arg3[%c0_9, %c0_10, %c0_11] : memref<2x2x8xf32, #tpu.memory_space<vmem>>, vector<2x2x8xf32>
    %c0_12 = arith.constant 0 : index
    %c0_13 = arith.constant 0 : index
    %13 = vector.load %arg5[%c0_12, %c0_13] : memref<8x32xf32, #tpu.memory_space<vmem>>, vector<8x32xf32>
    %c0_14 = arith.constant 0 : index
    %c0_15 = arith.constant 0 : index
    %c0_16 = arith.constant 0 : index
    %14 = vector.load %arg8[%c0_14, %c0_15, %c0_16] : memref<1x32x96xbf16, #tpu.memory_space<vmem>>, vector<1x32x96xbf16>
    %15 = vector.shape_cast %14 : vector<1x32x96xbf16> to vector<32x96xbf16>
    %16 = vector.extract_strided_slice %15 {offsets = [0, 0], sizes = [32, 32], strides = [1, 1]} : vector<32x96xbf16> to vector<32x32xbf16>
    %17 = vector.extract_strided_slice %15 {offsets = [0, 32], sizes = [32, 32], strides = [1, 1]} : vector<32x96xbf16> to vector<32x32xbf16>
    %18 = vector.extract_strided_slice %15 {offsets = [0, 64], sizes = [32, 32], strides = [1, 1]} : vector<32x96xbf16> to vector<32x32xbf16>
    %c0_i32 = arith.constant 0 : i32
    %19 = arith.cmpi eq, %arg1, %c0_i32 : i32
    %20 = arith.extui %19 : i1 to i32
    %c0_i32_17 = arith.constant 0 : i32
    %21 = arith.cmpi ne, %20, %c0_i32_17 : i32
    scf.if %21 {
      %305 = vector.shape_cast %11 : vector<2x2x8x32xf32> to vector<4x8x32xf32>
      %c0_104 = arith.constant 0 : index
      %c0_105 = arith.constant 0 : index
      %c0_106 = arith.constant 0 : index
      %306 = vector.load %arg16[%c0_104, %c0_105, %c0_106] : memref<4x8x32xf32, #tpu.memory_space<vmem>>, vector<4x8x32xf32>
      tpu.vector_store %arg16[%c0_104, %c0_105, %c0_106], %305 {strides = array<i32>} : memref<4x8x32xf32, #tpu.memory_space<vmem>>, vector<4x8x32xf32>,
    } else {
    }
    %c0_18 = arith.constant 0 : index
    %c0_19 = arith.constant 0 : index
    %c0_20 = arith.constant 0 : index
    %22 = vector.load %arg16[%c0_18, %c0_19, %c0_20] : memref<4x8x32xf32, #tpu.memory_space<vmem>>, vector<4x8x32xf32>
    %23 = vector.extract_strided_slice %12 {offsets = [0, 0, 0], sizes = [2, 1, 8], strides = [1, 1, 1]} : vector<2x2x8xf32> to vector<2x1x8xf32>
    %24 = vector.shape_cast %23 : vector<2x1x8xf32> to vector<2x8xf32>
    %25 = vector.extract_strided_slice %12 {offsets = [0, 1, 0], sizes = [2, 1, 8], strides = [1, 1, 1]} : vector<2x2x8xf32> to vector<2x1x8xf32>
    %26 = vector.shape_cast %25 : vector<2x1x8xf32> to vector<2x8xf32>
    %27 = tpu.concatenate %26, %26 in 0 : vector<2x8xf32>, vector<2x8xf32> -> vector<4x8xf32>
    %28 = vector.shape_cast %27 : vector<4x8xf32> to vector<4x1x8xf32>
    %29 = tpu.concatenate %24, %26 in 0 : vector<2x8xf32>, vector<2x8xf32> -> vector<4x8xf32>
    %30 = vector.shape_cast %29 : vector<4x8xf32> to vector<4x1x8xf32>
    %31 = vector.shape_cast %22 : vector<4x8x32xf32> to vector<32x32xf32>
    %c0_21 = arith.constant 0 : index
    %c0_22 = arith.constant 0 : index
    %c0_23 = arith.constant 0 : index
    %32 = vector.load %arg6[%c0_21, %c0_22, %c0_23] : memref<1x32x96xbf16, #tpu.memory_space<vmem>>, vector<1x32x96xbf16>
    %33 = vector.shape_cast %32 : vector<1x32x96xbf16> to vector<32x96xbf16>
    %34 = arith.truncf %31 : vector<32x32xf32> to vector<32x32xbf16>
    %cst = arith.constant dense<0.000000e+00> : vector<32x96xf32>
    %35 = tpu.matmul %34, %33, %cst {dimension_numbers = #tpu.dot_dimension_numbers<[1], [0], [0], [1], [0, 0, 1, 1], [], []>} : vector<32x32xbf16>, vector<32x96xbf16>, vector<32x96xf32> -> vector<32x96xf32>
    %36 = vector.shape_cast %35 : vector<32x96xf32> to vector<4x8x96xf32>
    %37 = vector.extract_strided_slice %36 {offsets = [0, 0, 0], sizes = [4, 8, 32], strides = [1, 1, 1]} : vector<4x8x96xf32> to vector<4x8x32xf32>
    %38 = arith.truncf %37 : vector<4x8x32xf32> to vector<4x8x32xbf16>
    %39 = vector.extract_strided_slice %36 {offsets = [0, 0, 32], sizes = [4, 8, 32], strides = [1, 1, 1]} : vector<4x8x96xf32> to vector<4x8x32xf32>
    %40 = arith.truncf %39 : vector<4x8x32xf32> to vector<4x8x32xbf16>
    %41 = vector.extract_strided_slice %36 {offsets = [0, 0, 64], sizes = [4, 8, 32], strides = [1, 1, 1]} : vector<4x8x96xf32> to vector<4x8x32xf32>
    %42 = arith.truncf %41 : vector<4x8x32xf32> to vector<4x8x32xbf16>
    "tpu.trace_start"() <{level = 10 : i32, message = "nqd,nkd->nqk"}> : () -> ()
    %cst_24 = arith.constant dense<0.000000e+00> : vector<4x8x8xf32>
    %43 = tpu.matmul %38, %40, %cst_24 {dimension_numbers = #tpu.dot_dimension_numbers<[2], [2], [1], [1], [0, 0, 0, 1, 1, 1], [0], [0]>} : vector<4x8x32xbf16>, vector<4x8x32xbf16>, vector<4x8x8xf32> -> vector<4x8x8xf32>
    "tpu.trace_stop"() : () -> ()
    %44 = vector.broadcast %28 : vector<4x1x8xf32> to vector<4x8x8xf32>
    %45 = arith.addf %43, %44 : vector<4x8x8xf32>
    %cst_25 = arith.constant dense<0xFF800000> : vector<4x8xf32>
    %46 = vector.multi_reduction <maximumf>, %45, %cst_25 [2] : vector<4x8x8xf32> to vector<4x8xf32>
    %47 = vector.shape_cast %46 : vector<4x8xf32> to vector<4x8x1xf32>
    %48 = vector.broadcast %47 : vector<4x8x1xf32> to vector<4x8x8xf32>
    %49 = arith.subf %45, %48 : vector<4x8x8xf32>
    %50 = math.exp %49 : vector<4x8x8xf32>
    %cst_26 = arith.constant dense<0.000000e+00> : vector<4x8xf32>
    %51 = vector.multi_reduction <add>, %50, %cst_26 [2] : vector<4x8x8xf32> to vector<4x8xf32>
    %52 = vector.shape_cast %51 : vector<4x8xf32> to vector<4x8x1xf32>
    %53 = tpu.reciprocal %52 {approx = true} : vector<4x8x1xf32> -> vector<4x8x1xf32>
    %54 = vector.broadcast %53 : vector<4x8x1xf32> to vector<4x8x8xf32>
    %55 = arith.mulf %50, %54 : vector<4x8x8xf32>
    %56 = arith.truncf %55 : vector<4x8x8xf32> to vector<4x8x8xbf16>
    "tpu.trace_start"() <{level = 10 : i32, message = "nqk,nkd->nqd"}> : () -> ()
    %cst_27 = arith.constant dense<0.000000e+00> : vector<4x8x32xf32>
    %57 = tpu.matmul %56, %42, %cst_27 {dimension_numbers = #tpu.dot_dimension_numbers<[2], [1], [1], [2], [0, 0, 0, 1, 1, 2], [0], [0]>} : vector<4x8x8xbf16>, vector<4x8x32xbf16>, vector<4x8x32xf32> -> vector<4x8x32xf32>
    "tpu.trace_stop"() : () -> ()
    %58 = vector.shape_cast %57 : vector<4x8x32xf32> to vector<32x32xf32>
    %59 = arith.truncf %58 : vector<32x32xf32> to vector<32x32xbf16>
    %cst_28 = arith.constant dense<0.000000e+00> : vector<32x32xf32>
    %60 = tpu.matmul %59, %16, %cst_28 {dimension_numbers = #tpu.dot_dimension_numbers<[1], [0], [0], [1], [0, 0, 1, 1], [], []>} : vector<32x32xbf16>, vector<32x32xbf16>, vector<32x32xf32> -> vector<32x32xf32>
    %61 = vector.shape_cast %60 : vector<32x32xf32> to vector<4x8x32xf32>
    %62 = arith.addf %22, %61 : vector<4x8x32xf32>
    %cst_29 = arith.constant dense<0.000000e+00> : vector<4x8xf32>
    %63 = vector.multi_reduction <add>, %62, %cst_29 [2] : vector<4x8x32xf32> to vector<4x8xf32>
    %64 = vector.shape_cast %63 : vector<4x8xf32> to vector<4x8x1xf32>
    %cst_30 = arith.constant 3.200000e+01 : f32
    %65 = vector.broadcast %cst_30 : f32 to vector<4x8x1xf32>
    %66 = arith.divf %64, %65 : vector<4x8x1xf32>
    %67 = vector.broadcast %66 : vector<4x8x1xf32> to vector<4x8x32xf32>
    %68 = arith.subf %62, %67 : vector<4x8x32xf32>
    %69 = arith.mulf %68, %68 : vector<4x8x32xf32>
    %cst_31 = arith.constant dense<0.000000e+00> : vector<4x8xf32>
    %70 = vector.multi_reduction <add>, %69, %cst_31 [2] : vector<4x8x32xf32> to vector<4x8xf32>
    %71 = vector.shape_cast %70 : vector<4x8xf32> to vector<4x8x1xf32>
    %cst_32 = arith.constant 3.200000e+01 : f32
    %72 = vector.broadcast %cst_32 : f32 to vector<4x8x1xf32>
    %73 = arith.divf %71, %72 : vector<4x8x1xf32>
    %cst_33 = arith.constant 9.99999974E-6 : f32
    %74 = vector.broadcast %cst_33 : f32 to vector<4x8x1xf32>
    %75 = arith.addf %73, %74 : vector<4x8x1xf32>
    %76 = math.rsqrt %75 : vector<4x8x1xf32>
    %77 = vector.broadcast %76 : vector<4x8x1xf32> to vector<4x8x32xf32>
    %78 = arith.mulf %68, %77 : vector<4x8x32xf32>
    %79 = vector.shape_cast %2 : vector<1x32xf32> to vector<1x1x32xf32>
    %80 = vector.broadcast %79 : vector<1x1x32xf32> to vector<4x8x32xf32>
    %81 = arith.mulf %78, %80 : vector<4x8x32xf32>
    %82 = vector.shape_cast %3 : vector<1x32xf32> to vector<1x1x32xf32>
    %83 = vector.broadcast %82 : vector<1x1x32xf32> to vector<4x8x32xf32>
    %84 = arith.addf %81, %83 : vector<4x8x32xf32>
    %85 = vector.shape_cast %84 : vector<4x8x32xf32> to vector<32x32xf32>
    %86 = arith.truncf %85 : vector<32x32xf32> to vector<32x32xbf16>
    %cst_34 = arith.constant dense<0.000000e+00> : vector<32x32xf32>
    %87 = tpu.matmul %86, %17, %cst_34 {dimension_numbers = #tpu.dot_dimension_numbers<[1], [0], [0], [1], [0, 0, 1, 1], [], []>} : vector<32x32xbf16>, vector<32x32xbf16>, vector<32x32xf32> -> vector<32x32xf32>
    %88 = vector.shape_cast %87 : vector<32x32xf32> to vector<4x8x32xf32>
    %89 = vector.shape_cast %11 : vector<2x2x8x32xf32> to vector<32x32xf32>
    %c0_35 = arith.constant 0 : index
    %c0_36 = arith.constant 0 : index
    %c0_37 = arith.constant 0 : index
    %90 = vector.load %arg7[%c0_35, %c0_36, %c0_37] : memref<1x32x64xbf16, #tpu.memory_space<vmem>>, vector<1x32x64xbf16>
    %91 = vector.shape_cast %90 : vector<1x32x64xbf16> to vector<32x64xbf16>
    %92 = arith.truncf %89 : vector<32x32xf32> to vector<32x32xbf16>
    %cst_38 = arith.constant dense<0.000000e+00> : vector<32x64xf32>
    %93 = tpu.matmul %92, %91, %cst_38 {dimension_numbers = #tpu.dot_dimension_numbers<[1], [0], [0], [1], [0, 0, 1, 1], [], []>} : vector<32x32xbf16>, vector<32x64xbf16>, vector<32x64xf32> -> vector<32x64xf32>
    %94 = vector.shape_cast %93 : vector<32x64xf32> to vector<4x8x64xf32>
    %95 = vector.extract_strided_slice %94 {offsets = [0, 0, 0], sizes = [4, 8, 32], strides = [1, 1, 1]} : vector<4x8x64xf32> to vector<4x8x32xf32>
    %96 = arith.truncf %95 : vector<4x8x32xf32> to vector<4x8x32xbf16>
    %97 = vector.extract_strided_slice %94 {offsets = [0, 0, 32], sizes = [4, 8, 32], strides = [1, 1, 1]} : vector<4x8x64xf32> to vector<4x8x32xf32>
    %98 = arith.truncf %97 : vector<4x8x32xf32> to vector<4x8x32xbf16>
    %99 = arith.truncf %88 : vector<4x8x32xf32> to vector<4x8x32xbf16>
    "tpu.trace_start"() <{level = 10 : i32, message = "nqd,nkd->nqk"}> : () -> ()
    %cst_39 = arith.constant dense<0.000000e+00> : vector<4x8x8xf32>
    %100 = tpu.matmul %99, %96, %cst_39 {dimension_numbers = #tpu.dot_dimension_numbers<[2], [2], [1], [1], [0, 0, 0, 1, 1, 1], [0], [0]>} : vector<4x8x32xbf16>, vector<4x8x32xbf16>, vector<4x8x8xf32> -> vector<4x8x8xf32>
    "tpu.trace_stop"() : () -> ()
    %101 = vector.broadcast %30 : vector<4x1x8xf32> to vector<4x8x8xf32>
    %102 = arith.addf %100, %101 : vector<4x8x8xf32>
    %cst_40 = arith.constant dense<0xFF800000> : vector<4x8xf32>
    %103 = vector.multi_reduction <maximumf>, %102, %cst_40 [2] : vector<4x8x8xf32> to vector<4x8xf32>
    %104 = vector.shape_cast %103 : vector<4x8xf32> to vector<4x8x1xf32>
    %105 = vector.broadcast %104 : vector<4x8x1xf32> to vector<4x8x8xf32>
    %106 = arith.subf %102, %105 : vector<4x8x8xf32>
    %107 = math.exp %106 : vector<4x8x8xf32>
    %cst_41 = arith.constant dense<0.000000e+00> : vector<4x8xf32>
    %108 = vector.multi_reduction <add>, %107, %cst_41 [2] : vector<4x8x8xf32> to vector<4x8xf32>
    %109 = vector.shape_cast %108 : vector<4x8xf32> to vector<4x8x1xf32>
    %110 = tpu.reciprocal %109 {approx = true} : vector<4x8x1xf32> -> vector<4x8x1xf32>
    %111 = vector.broadcast %110 : vector<4x8x1xf32> to vector<4x8x8xf32>
    %112 = arith.mulf %107, %111 : vector<4x8x8xf32>
    %113 = arith.truncf %112 : vector<4x8x8xf32> to vector<4x8x8xbf16>
    "tpu.trace_start"() <{level = 10 : i32, message = "nqk,nkd->nqd"}> : () -> ()
    %cst_42 = arith.constant dense<0.000000e+00> : vector<4x8x32xf32>
    %114 = tpu.matmul %113, %98, %cst_42 {dimension_numbers = #tpu.dot_dimension_numbers<[2], [1], [1], [2], [0, 0, 0, 1, 1, 2], [0], [0]>} : vector<4x8x8xbf16>, vector<4x8x32xbf16>, vector<4x8x32xf32> -> vector<4x8x32xf32>
    "tpu.trace_stop"() : () -> ()
    %115 = vector.shape_cast %114 : vector<4x8x32xf32> to vector<32x32xf32>
    %116 = arith.truncf %115 : vector<32x32xf32> to vector<32x32xbf16>
    %cst_43 = arith.constant dense<0.000000e+00> : vector<32x32xf32>
    %117 = tpu.matmul %116, %18, %cst_43 {dimension_numbers = #tpu.dot_dimension_numbers<[1], [0], [0], [1], [0, 0, 1, 1], [], []>} : vector<32x32xbf16>, vector<32x32xbf16>, vector<32x32xf32> -> vector<32x32xf32>
    %118 = vector.shape_cast %117 : vector<32x32xf32> to vector<4x8x32xf32>
    %119 = arith.addf %84, %118 : vector<4x8x32xf32>
    %cst_44 = arith.constant dense<0.000000e+00> : vector<4x8xf32>
    %120 = vector.multi_reduction <add>, %119, %cst_44 [2] : vector<4x8x32xf32> to vector<4x8xf32>
    %121 = vector.shape_cast %120 : vector<4x8xf32> to vector<4x8x1xf32>
    %cst_45 = arith.constant 3.200000e+01 : f32
    %122 = vector.broadcast %cst_45 : f32 to vector<4x8x1xf32>
    %123 = arith.divf %121, %122 : vector<4x8x1xf32>
    %124 = vector.broadcast %123 : vector<4x8x1xf32> to vector<4x8x32xf32>
    %125 = arith.subf %119, %124 : vector<4x8x32xf32>
    %126 = arith.mulf %125, %125 : vector<4x8x32xf32>
    %cst_46 = arith.constant dense<0.000000e+00> : vector<4x8xf32>
    %127 = vector.multi_reduction <add>, %126, %cst_46 [2] : vector<4x8x32xf32> to vector<4x8xf32>
    %128 = vector.shape_cast %127 : vector<4x8xf32> to vector<4x8x1xf32>
    %cst_47 = arith.constant 3.200000e+01 : f32
    %129 = vector.broadcast %cst_47 : f32 to vector<4x8x1xf32>
    %130 = arith.divf %128, %129 : vector<4x8x1xf32>
    %cst_48 = arith.constant 9.99999974E-6 : f32
    %131 = vector.broadcast %cst_48 : f32 to vector<4x8x1xf32>
    %132 = arith.addf %130, %131 : vector<4x8x1xf32>
    %133 = math.rsqrt %132 : vector<4x8x1xf32>
    %134 = vector.broadcast %133 : vector<4x8x1xf32> to vector<4x8x32xf32>
    %135 = arith.mulf %125, %134 : vector<4x8x32xf32>
    %136 = vector.shape_cast %4 : vector<1x32xf32> to vector<1x1x32xf32>
    %137 = vector.broadcast %136 : vector<1x1x32xf32> to vector<4x8x32xf32>
    %138 = arith.mulf %135, %137 : vector<4x8x32xf32>
    %139 = vector.shape_cast %5 : vector<1x32xf32> to vector<1x1x32xf32>
    %140 = vector.broadcast %139 : vector<1x1x32xf32> to vector<4x8x32xf32>
    %141 = arith.addf %138, %140 : vector<4x8x32xf32>
    %c0_i32_49 = arith.constant 0 : i32
    %142 = arith.cmpi eq, %arg1, %c0_i32_49 : i32
    %143 = vector.extract_strided_slice %99 {offsets = [0, 0, 0], sizes = [2, 8, 32], strides = [1, 1, 1]} : vector<4x8x32xbf16> to vector<2x8x32xbf16>
    %144 = vector.extract_strided_slice %99 {offsets = [2, 0, 0], sizes = [2, 8, 32], strides = [1, 1, 1]} : vector<4x8x32xbf16> to vector<2x8x32xbf16>
    %145 = arith.select %142, %143, %144 : vector<2x8x32xbf16>
    %146 = vector.extract_strided_slice %84 {offsets = [0, 0, 0], sizes = [2, 8, 32], strides = [1, 1, 1]} : vector<4x8x32xf32> to vector<2x8x32xf32>
    %147 = vector.extract_strided_slice %84 {offsets = [2, 0, 0], sizes = [2, 8, 32], strides = [1, 1, 1]} : vector<4x8x32xf32> to vector<2x8x32xf32>
    %148 = arith.select %142, %146, %147 : vector<2x8x32xf32>
    %149 = vector.extract_strided_slice %96 {offsets = [0, 0, 0], sizes = [2, 8, 32], strides = [1, 1, 1]} : vector<4x8x32xbf16> to vector<2x8x32xbf16>
    %150 = vector.extract_strided_slice %98 {offsets = [0, 0, 0], sizes = [2, 8, 32], strides = [1, 1, 1]} : vector<4x8x32xbf16> to vector<2x8x32xbf16>
    %151 = vector.shape_cast %24 : vector<2x8xf32> to vector<2x1x8xf32>
    "tpu.trace_start"() <{level = 10 : i32, message = "nqd,nkd->nqk"}> : () -> ()
    %cst_50 = arith.constant dense<0.000000e+00> : vector<2x8x8xf32>
    %152 = tpu.matmul %145, %149, %cst_50 {dimension_numbers = #tpu.dot_dimension_numbers<[2], [2], [1], [1], [0, 0, 0, 1, 1, 1], [0], [0]>} : vector<2x8x32xbf16>, vector<2x8x32xbf16>, vector<2x8x8xf32> -> vector<2x8x8xf32>
    "tpu.trace_stop"() : () -> ()
    %153 = vector.broadcast %151 : vector<2x1x8xf32> to vector<2x8x8xf32>
    %154 = arith.addf %152, %153 : vector<2x8x8xf32>
    %cst_51 = arith.constant dense<0xFF800000> : vector<2x8xf32>
    %155 = vector.multi_reduction <maximumf>, %154, %cst_51 [2] : vector<2x8x8xf32> to vector<2x8xf32>
    %156 = vector.shape_cast %155 : vector<2x8xf32> to vector<2x8x1xf32>
    %157 = vector.broadcast %156 : vector<2x8x1xf32> to vector<2x8x8xf32>
    %158 = arith.subf %154, %157 : vector<2x8x8xf32>
    %159 = math.exp %158 : vector<2x8x8xf32>
    %cst_52 = arith.constant dense<0.000000e+00> : vector<2x8xf32>
    %160 = vector.multi_reduction <add>, %159, %cst_52 [2] : vector<2x8x8xf32> to vector<2x8xf32>
    %161 = vector.shape_cast %160 : vector<2x8xf32> to vector<2x8x1xf32>
    %162 = tpu.reciprocal %161 {approx = true} : vector<2x8x1xf32> -> vector<2x8x1xf32>
    %163 = vector.broadcast %162 : vector<2x8x1xf32> to vector<2x8x8xf32>
    %164 = arith.mulf %159, %163 : vector<2x8x8xf32>
    %165 = arith.truncf %164 : vector<2x8x8xf32> to vector<2x8x8xbf16>
    "tpu.trace_start"() <{level = 10 : i32, message = "nqk,nkd->nqd"}> : () -> ()
    %cst_53 = arith.constant dense<0.000000e+00> : vector<2x8x32xf32>
    %166 = tpu.matmul %165, %150, %cst_53 {dimension_numbers = #tpu.dot_dimension_numbers<[2], [1], [1], [2], [0, 0, 0, 1, 1, 2], [0], [0]>} : vector<2x8x8xbf16>, vector<2x8x32xbf16>, vector<2x8x32xf32> -> vector<2x8x32xf32>
    "tpu.trace_stop"() : () -> ()
    %167 = vector.shape_cast %166 : vector<2x8x32xf32> to vector<16x32xf32>
    %168 = arith.truncf %167 : vector<16x32xf32> to vector<16x32xbf16>
    %cst_54 = arith.constant dense<0.000000e+00> : vector<16x32xf32>
    %169 = tpu.matmul %168, %18, %cst_54 {dimension_numbers = #tpu.dot_dimension_numbers<[1], [0], [0], [1], [0, 0, 1, 1], [], []>} : vector<16x32xbf16>, vector<32x32xbf16>, vector<16x32xf32> -> vector<16x32xf32>
    %170 = vector.shape_cast %169 : vector<16x32xf32> to vector<2x8x32xf32>
    %171 = arith.addf %148, %170 : vector<2x8x32xf32>
    %cst_55 = arith.constant dense<0.000000e+00> : vector<2x8xf32>
    %172 = vector.multi_reduction <add>, %171, %cst_55 [2] : vector<2x8x32xf32> to vector<2x8xf32>
    %173 = vector.shape_cast %172 : vector<2x8xf32> to vector<2x8x1xf32>
    %cst_56 = arith.constant 3.200000e+01 : f32
    %174 = vector.broadcast %cst_56 : f32 to vector<2x8x1xf32>
    %175 = arith.divf %173, %174 : vector<2x8x1xf32>
    %176 = vector.broadcast %175 : vector<2x8x1xf32> to vector<2x8x32xf32>
    %177 = arith.subf %171, %176 : vector<2x8x32xf32>
    %178 = arith.mulf %177, %177 : vector<2x8x32xf32>
    %cst_57 = arith.constant dense<0.000000e+00> : vector<2x8xf32>
    %179 = vector.multi_reduction <add>, %178, %cst_57 [2] : vector<2x8x32xf32> to vector<2x8xf32>
    %180 = vector.shape_cast %179 : vector<2x8xf32> to vector<2x8x1xf32>
    %cst_58 = arith.constant 3.200000e+01 : f32
    %181 = vector.broadcast %cst_58 : f32 to vector<2x8x1xf32>
    %182 = arith.divf %180, %181 : vector<2x8x1xf32>
    %cst_59 = arith.constant 9.99999974E-6 : f32
    %183 = vector.broadcast %cst_59 : f32 to vector<2x8x1xf32>
    %184 = arith.addf %182, %183 : vector<2x8x1xf32>
    %185 = math.rsqrt %184 : vector<2x8x1xf32>
    %186 = vector.broadcast %185 : vector<2x8x1xf32> to vector<2x8x32xf32>
    %187 = arith.mulf %177, %186 : vector<2x8x32xf32>
    %188 = vector.shape_cast %4 : vector<1x32xf32> to vector<1x1x32xf32>
    %189 = vector.broadcast %188 : vector<1x1x32xf32> to vector<2x8x32xf32>
    %190 = arith.mulf %187, %189 : vector<2x8x32xf32>
    %191 = vector.shape_cast %5 : vector<1x32xf32> to vector<1x1x32xf32>
    %192 = vector.broadcast %191 : vector<1x1x32xf32> to vector<2x8x32xf32>
    %193 = arith.addf %190, %192 : vector<2x8x32xf32>
    %194 = tpu.iota {dimensions = array<i32: 1>} : vector<1x32xi32>
    %c16_i32 = arith.constant 16 : i32
    %195 = vector.broadcast %c16_i32 : i32 to vector<1x32xi32>
    %196 = arith.cmpi sge, %194, %195 : vector<1x32xi32>
    %197 = vector.shape_cast %141 : vector<4x8x32xf32> to vector<32x32xf32>
    %c0_60 = arith.constant 0 : index
    %c0_61 = arith.constant 0 : index
    %c0_62 = arith.constant 0 : index
    %198 = vector.load %arg9[%c0_60, %c0_61, %c0_62] : memref<1x32x32xbf16, #tpu.memory_space<vmem>>, vector<1x32x32xbf16>
    %199 = vector.shape_cast %198 : vector<1x32x32xbf16> to vector<32x32xbf16>
    %200 = arith.truncf %197 : vector<32x32xf32> to vector<32x32xbf16>
    %cst_63 = arith.constant dense<0.000000e+00> : vector<32x32xf32>
    %201 = tpu.matmul %200, %199, %cst_63 {dimension_numbers = #tpu.dot_dimension_numbers<[1], [0], [0], [1], [0, 0, 1, 1], [], []>} : vector<32x32xbf16>, vector<32x32xbf16>, vector<32x32xf32> -> vector<32x32xf32>
    %202 = vector.broadcast %10 : vector<1x32xf32> to vector<32x32xf32>
    %203 = arith.addf %201, %202 : vector<32x32xf32>
    %cst_64 = arith.constant 0.000000e+00 : f32
    %204 = vector.broadcast %cst_64 : f32 to vector<32x32xf32>
    %205 = arith.cmpf ogt, %203, %204 : vector<32x32xf32>
    %cst_65 = arith.constant 0.000000e+00 : f32
    %206 = vector.broadcast %cst_65 : f32 to vector<32x32xf32>
    %207 = arith.select %205, %203, %206 : vector<32x32xi1>, vector<32x32xf32>
    %208 = math.absf %203 : vector<32x32xf32>
    %cst_66 = arith.constant 0.000000e+00 : f32
    %209 = vector.broadcast %cst_66 : f32 to vector<32x32xf32>
    %210 = arith.subf %209, %208 : vector<32x32xf32>
    %211 = math.exp %210 : vector<32x32xf32>
    %cst_67 = arith.constant 1.000000e+00 : f32
    %212 = vector.broadcast %cst_67 : f32 to vector<32x32xf32>
    %213 = arith.addf %212, %211 : vector<32x32xf32>
    %214 = math.log %213 : vector<32x32xf32>
    %215 = arith.addf %207, %214 : vector<32x32xf32>
    %cst_68 = arith.constant 9.99999997E-7 : f32
    %216 = vector.broadcast %cst_68 : f32 to vector<32x32xf32>
    %217 = arith.addf %215, %216 : vector<32x32xf32>
    %218 = vector.shape_cast %196 : vector<1x32xi1> to vector<1x32xi1>
    %219 = vector.broadcast %218 : vector<1x32xi1> to vector<32x32xi1>
    %220 = arith.select %219, %217, %203 : vector<32x32xi1>, vector<32x32xf32>
    %221 = vector.shape_cast %193 : vector<2x8x32xf32> to vector<16x32xf32>
    %c0_69 = arith.constant 0 : index
    %c0_70 = arith.constant 0 : index
    %c0_71 = arith.constant 0 : index
    %222 = vector.load %arg9[%c0_69, %c0_70, %c0_71] : memref<1x32x32xbf16, #tpu.memory_space<vmem>>, vector<1x32x32xbf16>
    %223 = vector.shape_cast %222 : vector<1x32x32xbf16> to vector<32x32xbf16>
    %224 = arith.truncf %221 : vector<16x32xf32> to vector<16x32xbf16>
    %cst_72 = arith.constant dense<0.000000e+00> : vector<16x32xf32>
    %225 = tpu.matmul %224, %223, %cst_72 {dimension_numbers = #tpu.dot_dimension_numbers<[1], [0], [0], [1], [0, 0, 1, 1], [], []>} : vector<16x32xbf16>, vector<32x32xbf16>, vector<16x32xf32> -> vector<16x32xf32>
    %226 = vector.broadcast %10 : vector<1x32xf32> to vector<16x32xf32>
    %227 = arith.addf %225, %226 : vector<16x32xf32>
    %cst_73 = arith.constant 0.000000e+00 : f32
    %228 = vector.broadcast %cst_73 : f32 to vector<16x32xf32>
    %229 = arith.cmpf ogt, %227, %228 : vector<16x32xf32>
    %cst_74 = arith.constant 0.000000e+00 : f32
    %230 = vector.broadcast %cst_74 : f32 to vector<16x32xf32>
    %231 = arith.select %229, %227, %230 : vector<16x32xi1>, vector<16x32xf32>
    %232 = math.absf %227 : vector<16x32xf32>
    %cst_75 = arith.constant 0.000000e+00 : f32
    %233 = vector.broadcast %cst_75 : f32 to vector<16x32xf32>
    %234 = arith.subf %233, %232 : vector<16x32xf32>
    %235 = math.exp %234 : vector<16x32xf32>
    %cst_76 = arith.constant 1.000000e+00 : f32
    %236 = vector.broadcast %cst_76 : f32 to vector<16x32xf32>
    %237 = arith.addf %236, %235 : vector<16x32xf32>
    %238 = math.log %237 : vector<16x32xf32>
    %239 = arith.addf %231, %238 : vector<16x32xf32>
    %cst_77 = arith.constant 9.99999997E-7 : f32
    %240 = vector.broadcast %cst_77 : f32 to vector<16x32xf32>
    %241 = arith.addf %239, %240 : vector<16x32xf32>
    %242 = vector.shape_cast %196 : vector<1x32xi1> to vector<1x32xi1>
    %243 = vector.broadcast %242 : vector<1x32xi1> to vector<16x32xi1>
    %244 = arith.select %243, %241, %227 : vector<16x32xi1>, vector<16x32xf32>
    %245 = vector.extract_strided_slice %220 {offsets = [0, 0], sizes = [16, 32], strides = [1, 1]} : vector<32x32xf32> to vector<16x32xf32>
    %246 = vector.shape_cast %245 : vector<16x32xf32> to vector<2x8x32xf32>
    %c0_78 = arith.constant 0 : index
    %c0_79 = arith.constant 0 : index
    %c0_80 = arith.constant 0 : index
    %c0_81 = arith.constant 0 : index
    %247 = vector.load %arg13[%c0_78, %c0_79, %c0_80, %c0_81] : memref<3x2x8x32xf32, #tpu.memory_space<vmem>>, vector<1x2x8x32xf32>
    %248 = vector.shape_cast %247 : vector<1x2x8x32xf32> to vector<2x8x32xf32>
    %249 = vector.shape_cast %246 : vector<2x8x32xf32> to vector<1x2x8x32xf32>
    tpu.vector_store %arg13[%c0_78, %c0_79, %c0_80, %c0_81], %249 {strides = array<i32>} : memref<3x2x8x32xf32, #tpu.memory_space<vmem>>, vector<1x2x8x32xf32>,
    %250 = vector.shape_cast %244 : vector<16x32xf32> to vector<2x8x32xf32>
    %c1 = arith.constant 1 : index
    %c0_82 = arith.constant 0 : index
    %c0_83 = arith.constant 0 : index
    %c0_84 = arith.constant 0 : index
    %251 = vector.load %arg13[%c1, %c0_82, %c0_83, %c0_84] : memref<3x2x8x32xf32, #tpu.memory_space<vmem>>, vector<1x2x8x32xf32>
    %252 = vector.shape_cast %251 : vector<1x2x8x32xf32> to vector<2x8x32xf32>
    %253 = vector.shape_cast %250 : vector<2x8x32xf32> to vector<1x2x8x32xf32>
    tpu.vector_store %arg13[%c1, %c0_82, %c0_83, %c0_84], %253 {strides = array<i32>} : memref<3x2x8x32xf32, #tpu.memory_space<vmem>>, vector<1x2x8x32xf32>,
    %254 = vector.extract_strided_slice %220 {offsets = [16, 0], sizes = [16, 32], strides = [1, 1]} : vector<32x32xf32> to vector<16x32xf32>
    %255 = vector.shape_cast %254 : vector<16x32xf32> to vector<2x8x32xf32>
    %c2 = arith.constant 2 : index
    %c0_85 = arith.constant 0 : index
    %c0_86 = arith.constant 0 : index
    %c0_87 = arith.constant 0 : index
    %256 = vector.load %arg13[%c2, %c0_85, %c0_86, %c0_87] : memref<3x2x8x32xf32, #tpu.memory_space<vmem>>, vector<1x2x8x32xf32>
    %257 = vector.shape_cast %256 : vector<1x2x8x32xf32> to vector<2x8x32xf32>
    %258 = vector.shape_cast %255 : vector<2x8x32xf32> to vector<1x2x8x32xf32>
    tpu.vector_store %arg13[%c2, %c0_85, %c0_86, %c0_87], %258 {strides = array<i32>} : memref<3x2x8x32xf32, #tpu.memory_space<vmem>>, vector<1x2x8x32xf32>,
    %259 = vector.extract_strided_slice %220 {offsets = [0, 0], sizes = [32, 16], strides = [1, 1]} : vector<32x32xf32> to vector<32x16xf32>
    %260 = vector.extract_strided_slice %220 {offsets = [0, 16], sizes = [32, 16], strides = [1, 1]} : vector<32x32xf32> to vector<32x16xf32>
    %c0_88 = arith.constant 0 : index
    %c0_89 = arith.constant 0 : index
    %c0_90 = arith.constant 0 : index
    %c0_91 = arith.constant 0 : index
    %261 = vector.load %arg4[%c0_88, %c0_89, %c0_90, %c0_91] : memref<2x2x8x16xf32, #tpu.memory_space<vmem>>, vector<2x2x8x16xf32>
    %262 = vector.shape_cast %261 : vector<2x2x8x16xf32> to vector<32x16xf32>
    %263 = math.sqrt %260 : vector<32x16xf32>
    %264 = arith.mulf %263, %262 : vector<32x16xf32>
    %265 = arith.addf %259, %264 : vector<32x16xf32>
    %c0_92 = arith.constant 0 : index
    %c0_93 = arith.constant 0 : index
    %c0_94 = arith.constant 0 : index
    %266 = vector.load %arg10[%c0_92, %c0_93, %c0_94] : memref<1x16x32xbf16, #tpu.memory_space<vmem>>, vector<1x16x32xbf16>
    %267 = vector.shape_cast %266 : vector<1x16x32xbf16> to vector<16x32xbf16>
    %268 = arith.truncf %265 : vector<32x16xf32> to vector<32x16xbf16>
    %cst_95 = arith.constant dense<0.000000e+00> : vector<32x32xf32>
    %269 = tpu.matmul %268, %267, %cst_95 {dimension_numbers = #tpu.dot_dimension_numbers<[1], [0], [0], [1], [0, 0, 1, 1], [], []>} : vector<32x16xbf16>, vector<16x32xbf16>, vector<32x32xf32> -> vector<32x32xf32>
    %270 = vector.broadcast %8 : vector<1x32xf32> to vector<32x32xf32>
    %271 = arith.addf %269, %270 : vector<32x32xf32>
    %272 = vector.shape_cast %271 : vector<32x32xf32> to vector<4x8x32xf32>
    %273 = arith.addf %141, %272 : vector<4x8x32xf32>
    %274 = vector.shape_cast %13 : vector<8x32xf32> to vector<1x8x32xf32>
    %275 = vector.broadcast %274 : vector<1x8x32xf32> to vector<4x8x32xf32>
    %276 = arith.addf %273, %275 : vector<4x8x32xf32>
    %cst_96 = arith.constant dense<0.000000e+00> : vector<4x8xf32>
    %277 = vector.multi_reduction <add>, %276, %cst_96 [2] : vector<4x8x32xf32> to vector<4x8xf32>
    %278 = vector.shape_cast %277 : vector<4x8xf32> to vector<4x8x1xf32>
    %cst_97 = arith.constant 3.200000e+01 : f32
    %279 = vector.broadcast %cst_97 : f32 to vector<4x8x1xf32>
    %280 = arith.divf %278, %279 : vector<4x8x1xf32>
    %281 = vector.broadcast %280 : vector<4x8x1xf32> to vector<4x8x32xf32>
    %282 = arith.subf %276, %281 : vector<4x8x32xf32>
    %283 = arith.mulf %282, %282 : vector<4x8x32xf32>
    %cst_98 = arith.constant dense<0.000000e+00> : vector<4x8xf32>
    %284 = vector.multi_reduction <add>, %283, %cst_98 [2] : vector<4x8x32xf32> to vector<4x8xf32>
    %285 = vector.shape_cast %284 : vector<4x8xf32> to vector<4x8x1xf32>
    %cst_99 = arith.constant 3.200000e+01 : f32
    %286 = vector.broadcast %cst_99 : f32 to vector<4x8x1xf32>
    %287 = arith.divf %285, %286 : vector<4x8x1xf32>
    %cst_100 = arith.constant 9.99999974E-6 : f32
    %288 = vector.broadcast %cst_100 : f32 to vector<4x8x1xf32>
    %289 = arith.addf %287, %288 : vector<4x8x1xf32>
    %290 = math.rsqrt %289 : vector<4x8x1xf32>
    %291 = vector.broadcast %290 : vector<4x8x1xf32> to vector<4x8x32xf32>
    %292 = arith.mulf %282, %291 : vector<4x8x32xf32>
    %293 = vector.shape_cast %6 : vector<1x32xf32> to vector<1x1x32xf32>
    %294 = vector.broadcast %293 : vector<1x1x32xf32> to vector<4x8x32xf32>
    %295 = arith.mulf %292, %294 : vector<4x8x32xf32>
    %296 = vector.shape_cast %7 : vector<1x32xf32> to vector<1x1x32xf32>
    %297 = vector.broadcast %296 : vector<1x1x32xf32> to vector<4x8x32xf32>
    %298 = arith.addf %295, %297 : vector<4x8x32xf32>
    %c1_i32 = arith.constant 1 : i32
    %299 = arith.cmpi eq, %arg1, %c1_i32 : i32
    %300 = arith.extui %299 : i1 to i32
    %c0_i32_101 = arith.constant 0 : i32
    %301 = arith.cmpi ne, %300, %c0_i32_101 : i32
    scf.if %301 {
      %305 = vector.shape_cast %298 : vector<4x8x32xf32> to vector<2x2x8x32xf32>
      %c0_104 = arith.constant 0 : index
      %c0_105 = arith.constant 0 : index
      %c0_106 = arith.constant 0 : index
      %c0_107 = arith.constant 0 : index
      %306 = vector.load %arg14[%c0_104, %c0_105, %c0_106, %c0_107] : memref<2x2x8x32xf32, #tpu.memory_space<vmem>>, vector<2x2x8x32xf32>
      tpu.vector_store %arg14[%c0_104, %c0_105, %c0_106, %c0_107], %305 {strides = array<i32>} : memref<2x2x8x32xf32, #tpu.memory_space<vmem>>, vector<2x2x8x32xf32>,
      %307 = vector.shape_cast %141 : vector<4x8x32xf32> to vector<2x2x8x32xf32>
      %c0_108 = arith.constant 0 : index
      %c0_109 = arith.constant 0 : index
      %c0_110 = arith.constant 0 : index
      %c0_111 = arith.constant 0 : index
      %308 = vector.load %arg15[%c0_108, %c0_109, %c0_110, %c0_111] : memref<2x2x8x32xf32, #tpu.memory_space<vmem>>, vector<2x2x8x32xf32>
      tpu.vector_store %arg15[%c0_108, %c0_109, %c0_110, %c0_111], %307 {strides = array<i32>} : memref<2x2x8x32xf32, #tpu.memory_space<vmem>>, vector<2x2x8x32xf32>,
    } else {
    }
    %c1_i32_102 = arith.constant 1 : i32
    %302 = arith.cmpi ne, %arg1, %c1_i32_102 : i32
    %303 = arith.extui %302 : i1 to i32
    %c0_i32_103 = arith.constant 0 : i32
    %304 = arith.cmpi ne, %303, %c0_i32_103 : i32
    scf.if %304 {
      %c0_104 = arith.constant 0 : index
      %c0_105 = arith.constant 0 : index
      %c0_106 = arith.constant 0 : index
      %305 = vector.load %arg16[%c0_104, %c0_105, %c0_106] : memref<4x8x32xf32, #tpu.memory_space<vmem>>, vector<4x8x32xf32>
      tpu.vector_store %arg16[%c0_104, %c0_105, %c0_106], %298 {strides = array<i32>} : memref<4x8x32xf32, #tpu.memory_space<vmem>>, vector<4x8x32xf32>,
    } else {
    }
    return
  }
  func.func @transform_0(%arg0: i32, %arg1: i32) -> (i32, i32, i32, i32) {
    %c0_i32 = arith.constant 0 : i32
    %c0_i32_0 = arith.constant 0 : i32
    %c0_i32_1 = arith.constant 0 : i32
    %c0_i32_2 = arith.constant 0 : i32
    return %c0_i32, %arg0, %c0_i32_0, %c0_i32_1 : i32, i32, i32, i32
  }
  func.func @transform_1(%arg0: i32, %arg1: i32) -> (i32, i32, i32) {
    %c0_i32 = arith.constant 0 : i32
    %c0_i32_0 = arith.constant 0 : i32
    %c0_i32_1 = arith.constant 0 : i32
    return %arg0, %c0_i32, %c0_i32_0 : i32, i32, i32
  }
  func.func @transform_2(%arg0: i32, %arg1: i32) -> (i32, i32, i32, i32) {
    %c0_i32 = arith.constant 0 : i32
    %c0_i32_0 = arith.constant 0 : i32
    %c0_i32_1 = arith.constant 0 : i32
    return %arg1, %arg0, %c0_i32, %c0_i32_0 : i32, i32, i32, i32
  }
  func.func @transform_3(%arg0: i32, %arg1: i32) -> (i32, i32) {
    %c0_i32 = arith.constant 0 : i32
    %c0_i32_0 = arith.constant 0 : i32
    %c0_i32_1 = arith.constant 0 : i32
    return %c0_i32, %c0_i32_0 : i32, i32
  }
  func.func @transform_4(%arg0: i32, %arg1: i32) -> (i32, i32, i32) {
    %c0_i32 = arith.constant 0 : i32
    %c0_i32_0 = arith.constant 0 : i32
    %c0_i32_1 = arith.constant 0 : i32
    return %arg1, %c0_i32, %c0_i32_0 : i32, i32, i32
  }
  func.func @transform_5(%arg0: i32, %arg1: i32) -> (i32, i32, i32) {
    %c0_i32 = arith.constant 0 : i32
    %c0_i32_0 = arith.constant 0 : i32
    %c0_i32_1 = arith.constant 0 : i32
    return %arg1, %c0_i32, %c0_i32_0 : i32, i32, i32
  }
  func.func @transform_6(%arg0: i32, %arg1: i32) -> (i32, i32, i32) {
    %c0_i32 = arith.constant 0 : i32
    %c0_i32_0 = arith.constant 0 : i32
    %c0_i32_1 = arith.constant 0 : i32
    return %arg1, %c0_i32, %c0_i32_0 : i32, i32, i32
  }
  func.func @transform_7(%arg0: i32, %arg1: i32) -> (i32, i32, i32) {
    %c0_i32 = arith.constant 0 : i32
    %c0_i32_0 = arith.constant 0 : i32
    %c0_i32_1 = arith.constant 0 : i32
    return %arg1, %c0_i32, %c0_i32_0 : i32, i32, i32
  }
  func.func @transform_8(%arg0: i32, %arg1: i32) -> (i32, i32, i32) {
    %c0_i32 = arith.constant 0 : i32
    %c0_i32_0 = arith.constant 0 : i32
    %c0_i32_1 = arith.constant 0 : i32
    return %arg1, %c0_i32, %c0_i32_0 : i32, i32, i32
  }
  func.func @transform_9(%arg0: i32, %arg1: i32) -> (i32, i32, i32) {
    %c0_i32 = arith.constant 0 : i32
    %c0_i32_0 = arith.constant 0 : i32
    %c0_i32_1 = arith.constant 0 : i32
    return %arg1, %c0_i32, %c0_i32_0 : i32, i32, i32
  }
  func.func @transform_10(%arg0: i32, %arg1: i32) -> (i32, i32, i32) {
    %c0_i32 = arith.constant 0 : i32
    %c0_i32_0 = arith.constant 0 : i32
    %c0_i32_1 = arith.constant 0 : i32
    return %arg1, %c0_i32, %c0_i32_0 : i32, i32, i32
  }
  func.func @transform_11(%arg0: i32, %arg1: i32) -> (i32, i32, i32, i32) {
    %c0_i32 = arith.constant 0 : i32
    %c0_i32_0 = arith.constant 0 : i32
    %c0_i32_1 = arith.constant 0 : i32
    return %arg1, %arg0, %c0_i32, %c0_i32_0 : i32, i32, i32, i32
  }
  func.func @transform_12(%arg0: i32, %arg1: i32) -> (i32, i32, i32, i32) {
    %c0_i32 = arith.constant 0 : i32
    %c0_i32_0 = arith.constant 0 : i32
    %c0_i32_1 = arith.constant 0 : i32
    %c0_i32_2 = arith.constant 0 : i32
    return %c0_i32, %arg0, %c0_i32_0, %c0_i32_1 : i32, i32, i32, i32
  }
  func.func @transform_13(%arg0: i32, %arg1: i32) -> (i32, i32, i32, i32) {
    %c0_i32 = arith.constant 0 : i32
    %c0_i32_0 = arith.constant 0 : i32
    %c0_i32_1 = arith.constant 0 : i32
    %c0_i32_2 = arith.constant 0 : i32
    return %c0_i32, %arg0, %c0_i32_0, %c0_i32_1 : i32, i32, i32, i32
  }
}

</mosaic_0001>

<bundles_post_ra>
// kernel: tpu_custom_call.1
= control target key start
LH: loop header
LB: loop body
LE: loop exit
PB: predicated region body
PF: predicated region fallthrough
CT: control target
= control target key end

     0   :  { %s5843_s0 = inlined_call_operand.hbm [shape: f32[2,4,8,32], index: 0, kind: input, shape index: {}]   ;;  %s5844_s1 = inlined_call_operand.hbm [shape: f32[4,2,8], index: 1, kind: input, shape index: {}]   ;;  %s5845_s2 = inlined_call_operand.hbm [shape: f32[4,4,8,16], index: 2, kind: input, shape index: {}]   ;;  %s5846_s3 = inlined_call_operand.hbm [shape: f32[8,32], index: 3, kind: input, shape index: {}]   ;;  %s5847_s4 = inlined_call_operand.vmem [shape: bf16[2,32,96], index: 4, kind: input, shape index: {}]   ;;  %s5848_s5 = inlined_call_operand.hbm [shape: bf16[2,32,64], index: 5, kind: input, shape index: {}]   ;;  %s5849_s6 = inlined_call_operand.hbm [shape: bf16[2,32,96], index: 6, kind: input, shape index: {}]   ;;  %s5850_s7 = inlined_call_operand.hbm [shape: bf16[2,32,32], index: 7, kind: input, shape index: {}]   ;;  %s5851_s8 = inlined_call_operand.hbm [shape: bf16[2,16,32], index: 8, kind: input, shape index: {}]   ;;  %s5852_s9 = inlined_call_operand.vmem [shape: f32[2,7,32], index: 9, kind: input, shape index: {}]   ;;  %s5853_s10 = inlined_call_operand.vmem [shape: f32[2,1,32], index: 10, kind: input, shape index: {}]   ;;  %s5854_s11 = inlined_call_operand.hbm [shape: f32[6,4,8,32], index: 11, kind: output, shape index: {0}]   ;;  %s5855_s12 = inlined_call_operand.hbm [shape: f32[2,4,8,32], index: 12, kind: output, shape index: {1}]   ;;  %s5856_s13 = inlined_call_operand.hbm [shape: f32[2,4,8,32], index: 13, kind: output, shape index: {2}]  }
   0x1   :  { %5893 = sst [smem:[#allocation61_spill]] %s5843_s0 }
   0x2   :  { %5894 = sst [smem:[#allocation62_spill]] %s5844_s1 }
   0x3   :  { %5895 = sst [smem:[#allocation63_spill]] %s5845_s2 }
   0x4   :  { %5896 = sst [smem:[#allocation64_spill]] %s5846_s3 }
   0x5   :  { %5897 = sst [smem:[#allocation65_spill]] %s5847_s4 }
   0x6   :  { %5898 = sst [smem:[#allocation66_spill]] %s5848_s5 }
   0x7   :  { %5899 = sst [smem:[#allocation67_spill]] %s5849_s6 }
   0x8   :  { %5900 = sst [smem:[#allocation68_spill]] %s5850_s7 }
   0x9   :  { %5901 = sst [smem:[#allocation69_spill]] %s5851_s8 }
   0xa   :  { %5902 = sst [smem:[#allocation70_spill]] %s5852_s9 }
   0xb   :  { %5903 = sst [smem:[#allocation71_spill]] %s5853_s10 }
   0xc   :  { %5904 = sst [smem:[#allocation72_spill]] %s5854_s11 }
   0xd   :  { %5905 = sst [smem:[#allocation73_spill]] %s5855_s12 }
   0xe   :  { %5906 = sst [smem:[#allocation74_spill]] %s5856_s13 }
   0xf   :  { %19 = vsyncpa [#allocation4], 0 }
  0x10   :  { %21 = vsyncpa [#allocation4 + $0x1], 0 }
  0x11   :  { %22 = vsyncpa [#allocation7], 0 }
  0x12   :  { %24 = vsyncpa [#allocation7 + $0x1], 0 }
  0x13   :  { %25 = vsyncpa [#allocation10], 0 }
  0x14   :  { %26 = vsyncpa [#allocation5], 0 }
  0x15   :  { %28 = vsyncpa [#allocation5 + $0x1], 0 }
  0x16   :  { %29 = vsyncpa [#allocation17], 0 }
  0x17   :  { %31 = vsyncpa [#allocation17 + $0x1], 0  ;;  %s4672_s25 = smov 0   ;;  %s4674_s26 = smov 0  }
  0x18   :  { %s4676_s27 = smov 0   ;;  %s4678_s28 = smov 0  }
  0x19   :  { %s4680_s29 = smov 0   ;;  %s4682_s30 = smov 0  }
  0x1a   :  { %s4684_s14 = smov 0   ;;  %s4686_s15 = smov 0  }
  0x1b   :  { %s4688_s16 = smov 0   ;;  %s4690_s17 = smov 0  }
  0x1c   :  { %s4692_s18 = smov 0   ;;  %s4694_s19 = smov 0  }
  0x1d   :  { %s4696_s20 = smov 0   ;;  %s4698_s21 = smov 0  }
  0x1e LB: > { %5907 = sst [smem:[#allocation41_spill]] %s4502_s26  ;;  %s4743_s22 = sadd.s32 4294967295, %s4550_s21   ;;  %s4550_s21 = sphi %s4698_s21, %s37_s21   ;;  %s4546_s20 = sphi %s4696_s20, %s6018_s20   ;;  %s4542_s19 = sphi %s4694_s19, %s6017_s19   ;;  %s4538_s18 = sphi %s4692_s18, %s6016_s18   ;;  %s4534_s17 = sphi %s4690_s17, %s6015_s17   ;;  %s4530_s16 = sphi %s4688_s16, %s6006_s16   ;;  %s4526_s15 = sphi %s4686_s15, %s6005_s15   ;;  %s4522_s14 = sphi %s4684_s14, %s6004_s14   ;;  %s4518_s30 = sphi %s4682_s30, %s6014_s30   ;;  %s4514_s29 = sphi %s4680_s29, %s6013_s29   ;;  %s4510_s28 = sphi %s4678_s28, %s6012_s28   ;;  %s4506_s27 = sphi %s4676_s27, %s6011_s27   ;;  %s4502_s26 = sphi %s4674_s26, %s6010_s26   ;;  %s4498_s25 = sphi %s4672_s25, %s6000_s25  }
  0x1f   : > { %5908 = sst [smem:[#allocation42_spill]] %s4510_s28  ;;  %s46_s24 = sadd.s32 1, %s4542_s19 }
  0x20   : > { %5909 = sst [smem:[#allocation43_spill]] %s4514_s29  ;;  %s49_s13 = sadd.s32 1, %s4546_s20 }
  0x21   : > { %5910 = sst [smem:[#allocation44_spill]] %s4526_s15  ;;  %p47_p0 = scmp.ge.s32.totalorder %s46_s24, 2 }
  0x22   : > { %5911 = sst [smem:[#allocation45_spill]] %s4530_s16  ;;  %s56_s12 = sadd.s32 1, %s4530_s16 }
  0x23   : > { %5912 = sst [smem:[#allocation46_spill]] %s4534_s17  ;;  %p5865_p1 = scmp.ne.s32.totalorder %s4530_s16, %s4526_s15 }
  0x24   : > { %5913 = sst [smem:[#allocation47_spill]] %s4538_s18  ;;  %p64_p2 = scmp.eq.s32.totalorder %s4550_s21, 0 }
  0x25   : > { %5914 = sst [smem:[#allocation48_spill]] %s4743_s22  ;;  %s6020_s24 = smov (%p47_p0, %s46_s24), 0 }
  0x26   : > { %5915 = sst [smem:[#allocation49_spill]] %s6020_s24  ;;  %s6022_s13 = smov (!%p47_p0, %s49_s13), %s4546_s20 }
  0x27   : > { %p4760_p3 = por %p64_p2, %p5865_p1  ;;  %p5864_p4 = scmp.ne.s32.totalorder %s4526_s15, %s4522_s14 }
  0x28   : > { %p51_p5 = scmp.ge.s32.totalorder %s6022_s13, 2  ;;  %p5871_p6 = scmp.eq.s32.totalorder %s4743_s22, 0 }
  0x29   : > { %s105_s11 = ssub.s32 %s4542_s19, %s6020_s24  ;;  %s110_s18 = sadd.s32 1, %s4518_s30 }
  0x2a   : > { %s6024_s13 = smov (%p51_p5, %s6022_s13), 0  ;;  %p4777_p7 = por %p5871_p6, %p5864_p4 }
  0x2b   : > { %5917 = sst [smem:[#allocation50_spill]] %s6024_s13  ;;  %p5867_p8 = scmp.ne.s32.totalorder %s4518_s30, %s4514_s29 }
  0x2c   : > { %s5918_s10 = scalar_select %p4777_p7, 1, 0 }
  0x2d   : > { %s53_s9 = ssub.s32 %s4546_s20, %s6024_s13  ;;  %p5866_p9 = scmp.ne.s32.totalorder %s4514_s29, %s4510_s28 }
  0x2e   : > { %5919 = sst [smem:[#allocation51_spill]] %s5918_s10  ;;  %p54_p10 = scmp.eq.s32.totalorder %s53_s9, 0 }
  0x2f   : > { %s107_s24 = sor.u32 %s105_s11, %s53_s9  ;;  %p4792_p12 = por %p5867_p8, %p64_p2 }
  0x30   : > { %p108_p11 = scmp.eq.s32.totalorder %s107_s24, 0  ;;  %p4807_p13 = por %p5866_p9, %p5871_p6 }
  0x31   : > { %s5920_s4 = scalar_select %p4792_p12, 1, 0 }
  0x32   : > { %s4797_s13 = scalar_select %p54_p10, %s4530_s16, %s56_s12  }
  0x33   : > { %s4800_s17 = scalar_select %p108_p11, %s4518_s30, %s110_s18  }
  0x34   : > { %5921 = sst [smem:[#allocation52_spill]] %s4797_s13  ;;  %p181_p0 = scmp.eq.s32.totalorder %s105_s11, 0 }
  0x35   : > { %5922 = sst [smem:[#allocation53_spill]] %s4800_s17  ;;  %s183_s24 = sadd.s32 1, %s4506_s27 }
  0x36   : > { %s5923_s9 = scalar_select %p4807_p13, 1, 0 }
  0x37   : > { %p190_p5 = scmp.ne.s32.totalorder %s4506_s27, %s4502_s26  ;;  %p196_p10 = scmp.ne.s32.totalorder %s4502_s26, %s4498_s25 }
  0x38   : > { %5924 = sst [smem:[#allocation54_spill]] %s5923_s9  ;;  %p352_p11 = scmp.eq.s32.totalorder %s4743_s22, 3 }
  0x39   : > { %s4815_s10 = scalar_select %p181_p0, %s4506_s27, %s183_s24  }
  0x3a   : > { %p4819_p4 = por %p190_p5, %p64_p2  ;;  %s5927_s18 = sadd.s32 4294967294, %s4550_s21  }
  0x3b   : > { %5925 = sst [smem:[#allocation55_spill]] %s4815_s10  ;;  %p358_p1 = scmp.eq.s32.totalorder %s5927_s18, 3 }
  0x3c   : > { %s5926_s12 = scalar_select %p4819_p4, 1, 0 }
  0x3d   : > { %p4830_p9 = por %p196_p10, %p5871_p6  ;;  %p3524_p8 = scmp.ge.s32.totalorder %s4550_s21, 1 }
  0x3e   : > { %p5930_p13 = scmp.ne.s32.totalorder %s4518_s30, %s4514_s29  ;;  %p5933_p2 = scmp.ne.s32.totalorder %s4514_s29, %s4510_s28 }
  0x3f   : > { %s5928_s13 = scalar_select %p4830_p9, 1, 0 }
  0x40   : > { %p4838_p7 = por %p352_p11, %p5930_p13  ;;  %p4845_p0 = por %p358_p1, %p5933_p2 }
  0x41   : > { %5929 = sst [smem:[#allocation56_spill]] %s5928_s13  ;;  %p5936_p5 = scmp.ne.s32.totalorder %s4530_s16, %s4526_s15 }
  0x42   : > { %s5931_s11 = scalar_select %p4838_p7, 1, 0 }
  0x43   : > { %s5934_s24 = scalar_select %p4845_p0, 1, 0 }
  0x44   : > { %5932 = sst [smem:[#allocation57_spill]] %s5931_s11  ;;  %p4852_p4 = por %p352_p11, %p5936_p5 }
  0x45   : > { %5935 = sst [smem:[#allocation58_spill]] %s5934_s24  ;;  %p5939_p10 = scmp.ne.s32.totalorder %s4526_s15, %s4522_s14 }
  0x46   : > { %s5937_s25 = scalar_select %p4852_p4, 1, 0 }
  0x47   : > { %p4859_p6 = por %p358_p1, %p5939_p10  ;;  %p417_p9 = scmp.lt.s32.totalorder %s4550_s21, 5 }
  0x48   : > { %5938 = sst [smem:[#allocation59_spill]] %s5937_s25  ;;  %s4552_s10 = smov [#allocation9]  }
  0x49   : > { %s5940_s18 = scalar_select %p4859_p6, 1, 0 }
  0x4a   : > { %p4864_p13 = pnand %p3524_p8, %p417_p9  ;;  %s430_s28 = sshll.u32 %s4552_s10, 4  ;;  %s431_s28 = int_to_ptr.vmem [resolvable:$true] %s430_s28 }
  0x4b   : > { %5941 = sst [smem:[#allocation60_spill]] %s5940_s18  ;;  %p5943_p11 = scmp.eq.s32.totalorder %s4743_s22, 0 }
  0x4c   : > { %p3963_p2 = pneg %p4864_p13  ;;  %s4255_s24 = scalar_lea.vmem %s431_s28, 128 }
  0x4d   : > { %p4256_p4 = scmp.ne.s32.totalorder %s431_s28, %s4255_s24  ;;  %p4263_p7 = scmp.lt.s32.totalorder %s431_s28, %s431_s28 }
  0x4e   : > { %p3964_p5 = pnand %p3963_p2, %p5943_p11  ;;  %p4264_p6 = scmp.lt.s32.totalorder %s4255_s24, %s4255_s24 }
  0x50   : > { %p4246_p0 = pneg %p3964_p5  ;;  %p4265_p12 = por %p4264_p6, %p4263_p7 }
  0x52   : > { %p4258_p1 = pnand %p4256_p4, %p4246_p0 }
  0x54   : > { %p4259_p10 = pneg %p4258_p1 }
  0x56   : > { %p4266_p8 = pnand %p4265_p12, %p4259_p10 }
  0x58   : > { %4269 = shalt.err (!%p4266_p8)
}
  0x59   : > { %s5944_s3 = sld [smem:[#allocation64_spill]]  ;;  %p3526_p9 = scmp.ge.s32.totalorder %s4550_s21, 4 }
  0x5b   : > { %437 = sbr.rel (%p3526_p9) target bundleno = 198 (0xc6), region = 20 }
  0x5f   : > { %3966 = dma.hbm_to_vmem [thread:$0]  (!%p3964_p5), %s5944_s3, 128, %s431_s28, [#allocation10]  }
  0x60   : > { %s443_s25 = sand.u32 1, %s4530_s16   ;;  %s3632_s11 = sshll.u32 %s4546_s20, 8 }
  0x61   : > { %s3527_s24 = sshll.u32 %s443_s25, 5  ;;  %s5945_s0 = sld [smem:[#allocation61_spill]] }
  0x62   : > { %s3909_s18 = scalar_select %p4760_p3, [#allocation0], [#allocation29] }
  0x63   : > { %s445_s14 = scalar_lea.vmem [#allocation3], %s3527_s24  ;;  %s4553_s29 = smov 512  }
  0x64   : > { %s464_s3 = sshll.u32 %s445_s14, 4  ;;  %s456_s9 = sld [smem:[%s3909_s18]]   ;;  %s465_s3 = int_to_ptr.vmem [resolvable:$true] %s464_s3 }
  0x65   : > { %3910 = sst [smem:[#allocation20]] (%p4760_p3), %s4553_s29  ;;  %s4554_s10 = smov 256  }
  0x66   : > { %3911 = sst [smem:[#allocation20 + $0x1]] (%p4760_p3), %s4554_s10  ;;  %s4555_s16 = smov 2  }
  0x67   : > { %s451_s28 = scalar_lea.hbm %s5945_s0, %s3632_s11  ;;  %3912 = sst [smem:[#allocation20 + $0x2]] (%p4760_p3), %s4555_s16 }
  0x68   : > { %s4556_s13 = smov 128   ;;  %s4557_s11 = smov 8  }
  0x69   : > { %3913 = sst [smem:[#allocation20 + $0x3]] (%p4760_p3), %s4556_s13  ;;  %s5946_s18 = sand.u32 1, %s4550_s21  }
  0x6a   : > { %3914 = sst [smem:[#allocation20 + $0x4]] (%p4760_p3), %s4556_s13  ;;  %s3530_s26 = sshll.u32 %s456_s9, 26 }
  0x6b   : > { %3915 = sst [smem:[#allocation20 + $0x5]] (%p4760_p3), %s4557_s11  ;;  %s3531_s24 = sadd.s32 134217728, %s3530_s26 }
  0x6c   : > { %s4898_s14 = scalar_lea.sflag [#allocation4], %s5946_s18  ;;  %s4558_s29 = smov 131072  }
  0x6d   : > { %3916 = dma.general (%p4760_p3), %s451_s28, 512, %s465_s3, %s4898_s14, %s4558_s29, [#allocation20], %s3531_s24, 0  }
  0x6e   : > { %s3532_s10 = sshll.u32 %s443_s25, 2  ;;  %s3633_s16 = sshll.u32 %s4546_s20, 6 }
  0x6f   : > { %s5947_s1 = sld [smem:[#allocation62_spill]]  ;;  %s491_s13 = scalar_lea.vmem [#allocation6], %s3532_s10 }
  0x70   : > { %s498_s22 = sshll.u32 %s491_s13, 4  ;;  %s5948_s26 = smov %s5946_s18  ;;  %s499_s22 = int_to_ptr.vmem [resolvable:$true] %s498_s22 }
  0x71   : > { %s4909_s11 = scalar_lea.sflag [#allocation7], %s5948_s26  ;;  %s4282_s18 = scalar_lea.vmem %s499_s22, 64 }
  0x72   : > { %p4283_p4 = scmp.ne.s32.totalorder %s499_s22, %s4282_s18  ;;  %s4559_s3 = smov [#allocation6]  }
  0x73   : > { %s4286_s25 = sshll.u32 %s4559_s3, 4  ;;  %s4287_s25 = int_to_ptr.vmem [resolvable:$false] %s4286_s25 }
  0x74   : > { %p4284_p6 = pnand %p4283_p4, %p4760_p3  ;;  %s4288_s28 = scalar_lea.vmem %s4287_s25, 128 }
  0x75   : > { %s497_s9 = scalar_lea.hbm %s5947_s1, %s3633_s16  ;;  %p4289_p12 = scmp.lt.s32.totalorder %s499_s22, %s4287_s25 }
  0x76   : > { %p4285_p7 = pneg %p4284_p6  ;;  %p4290_p0 = scmp.lt.s32.totalorder %s4288_s28, %s4282_s18 }
  0x78   : > { %p4291_p2 = por %p4290_p0, %p4289_p12 }
  0x7a   : > { %p4292_p11 = pnand %p4291_p2, %p4285_p7 }
  0x7c   : > { %4295 = shalt.err (!%p4292_p11)
}
  0x7d   : > { %s4560_s0 = smov 32   ;;  %s4561_s15 = smov 2  }
  0x7e   : > { %3917 = dma.hbm_to_vmem [thread:$0]  (%p4760_p3), %s497_s9, 64, %s499_s22, %s4909_s11, %s4560_s0, %s4560_s0, %s4561_s15  }
  0x7f   : > { %s510_s24 = sand.u32 1, %s4518_s30   ;;  %s3537_s29 = sshll.u32 %s4546_s20, 1 }
  0x80   : > { %s3535_s10 = sshll.u32 %s510_s24, 5  ;;  %s3634_s16 = sshll.u32 %s4542_s19, 3 }
  0x81   : > { %s519_s13 = sadd.s32 %s3634_s16, %s3537_s29  ;;  %s512_s18 = scalar_lea.vmem [#allocation8], %s3535_s10 }
  0x82   : > { %s3539_s26 = sshll.u32 %s519_s13, 7  ;;  %s534_s3 = sshll.u32 %s512_s18, 4  ;;  %s535_s3 = int_to_ptr.vmem [resolvable:$true] %s534_s3 }
  0x83   : > { %p5949_p5 = scmp.ne.s32.totalorder %s5920_s4, 0  ;;  %s4562_s9 = smov 512  }
  0x84   : > { %s5950_s2 = sld [smem:[#allocation63_spill]]  ;;  %s4563_s15 = smov 256  }
  0x85   : > { %s3918_s22 = scalar_select %p5949_p5, [#allocation0], [#allocation30] }
  0x86   : > { %3919 = sst [smem:[#allocation22]] (%p5949_p5), %s4562_s9  ;;  %s4564_s24 = smov 2  }
  0x87   : > { %s526_s23 = sld [smem:[%s3918_s22]]   ;;  %s4565_s29 = smov 128  }
  0x88   : > { %3920 = sst [smem:[#allocation22 + $0x1]] (%p5949_p5), %s4563_s15  ;;  %s4566_s16 = smov 8  }
  0x89   : > { %3921 = sst [smem:[#allocation22 + $0x2]] (%p5949_p5), %s4564_s24  ;;  %s4567_s18 = smov 131072  }
  0x8a   : > { %s521_s0 = scalar_lea.hbm %s5950_s2, %s3539_s26  ;;  %3922 = sst [smem:[#allocation22 + $0x3]] (%p5949_p5), %s4565_s29 }
  0x8b   : > { %3923 = sst [smem:[#allocation22 + $0x4]] (%p5949_p5), %s4565_s29  ;;  %s567_s26 = sand.u32 1, %s4506_s27  }
  0x8c   : > { %3924 = sst [smem:[#allocation22 + $0x5]] (%p5949_p5), %s4566_s16  ;;  %s4941_s22 = sshll.u32 %s4542_s19, 8 }
  0x8d   : > { %s3540_s10 = sshll.u32 %s526_s23, 26  ;;  %s4945_s9 = sshll.u32 %s567_s26, 4 }
  0x8e   : > { %s3541_s13 = sadd.s32 134217728, %s3540_s10  ;;  %s569_s15 = scalar_lea.vmem [#allocation11], %s4945_s9 }
  0x8f   : > { %3925 = dma.general (%p5949_p5), %s521_s0, 512, %s535_s3, %s4909_s11, %s4567_s18, [#allocation22], %s3541_s13, 0  }
  0x90   : > { %s5951_s5 = sld [smem:[#allocation66_spill]]  ;;  %s576_s24 = sshll.u32 %s569_s15, 4  ;;  %s577_s24 = int_to_ptr.vmem [resolvable:$true] %s576_s24 }
  0x91   : > { %s4308_s4 = scalar_lea.vmem %s577_s24, 256  ;;  %p5952_p1 = scmp.ne.s32.totalorder %s5926_s12, 0 }
  0x92   : > { %p4309_p3 = scmp.ne.s32.totalorder %s577_s24, %s4308_s4  ;;  %s4568_s3 = smov [#allocation11]  }
  0x93   : > { %s4312_s0 = sshll.u32 %s4568_s3, 4  ;;  %s4313_s0 = int_to_ptr.vmem [resolvable:$false] %s4312_s0 }
  0x94   : > { %p4310_p10 = pnand %p4309_p3, %p5952_p1  ;;  %s4314_s29 = scalar_lea.vmem %s4313_s0, 512 }
  0x95   : > { %p4315_p9 = scmp.lt.s32.totalorder %s577_s24, %s4313_s0  ;;  %p4316_p4 = scmp.lt.s32.totalorder %s4314_s29, %s4308_s4 }
  0x96   : > { %s575_s28 = scalar_lea.hbm %s5951_s5, %s4941_s22  ;;  %p4311_p8 = pneg %p4310_p10 }
  0x97   : > { %p4317_p6 = por %p4316_p4, %p4315_p9 }
  0x99   : > { %p4318_p7 = pnand %p4317_p6, %p4311_p8 }
  0x9b   : > { %4321 = shalt.err (!%p4318_p7)
}
  0x9c   : > { %s4569_s10 = smov 64   ;;  %s4570_s16 = smov 4  }
  0x9d   : > { %3926 = dma.hbm_to_vmem [thread:$0]  (%p5952_p1), %s575_s28, 256, %s577_s24, %s4898_s14, %s4569_s10, %s4569_s10, %s4570_s16  }
  0x9e   : > { %s5953_s6 = sld [smem:[#allocation67_spill]]  ;;  %s590_s23 = scalar_lea.vmem [#allocation12], %s4945_s9 }
  0x9f   : > { %s597_s15 = sshll.u32 %s590_s23, 4  ;;  %s4571_s3 = smov [#allocation12]   ;;  %s598_s15 = int_to_ptr.vmem [resolvable:$true] %s597_s15 }
  0xa0   : > { %s4334_s4 = scalar_lea.vmem %s598_s15, 256  ;;  %s4338_s0 = sshll.u32 %s4571_s3, 4  ;;  %s4339_s0 = int_to_ptr.vmem [resolvable:$false] %s4338_s0 }
  0xa1   : > { %p4335_p12 = scmp.ne.s32.totalorder %s598_s15, %s4334_s4  ;;  %s4340_s29 = scalar_lea.vmem %s4339_s0, 512 }
  0xa2   : > { %p4341_p11 = scmp.lt.s32.totalorder %s598_s15, %s4339_s0  ;;  %p4342_p5 = scmp.lt.s32.totalorder %s4340_s29, %s4334_s4 }
  0xa3   : > { %p4336_p0 = pnand %p4335_p12, %p5952_p1 }
  0xa4   : > { %s596_s25 = scalar_lea.hbm %s5953_s6, %s4941_s22  ;;  %p4343_p3 = por %p4342_p5, %p4341_p11 }
  0xa5   : > { %p4337_p2 = pneg %p4336_p0 }
  0xa7   : > { %p4344_p10 = pnand %p4343_p3, %p4337_p2 }
  0xa9   : > { %4347 = shalt.err (!%p4344_p10)
}
  0xaa   : > { %3927 = dma.hbm_to_vmem [thread:$0]  (%p5952_p1), %s596_s25, 256, %s598_s15, %s4909_s11, %s4569_s10, %s4569_s10, %s4570_s16  }
  0xab   : > { %s5954_s7 = sld [smem:[#allocation68_spill]]  ;;  %s611_s18 = scalar_lea.vmem [#allocation13], %s4945_s9 }
  0xac   : > { %s618_s23 = sshll.u32 %s611_s18, 4  ;;  %s3551_s4 = sshll.u32 %s567_s26, 3  ;;  %s619_s23 = int_to_ptr.vmem [resolvable:$true] %s618_s23 }
  0xad   : > { %s4360_s3 = scalar_lea.vmem %s619_s23, 256  ;;  %s4572_s0 = smov [#allocation13]  }
  0xae   : > { %p4361_p8 = scmp.ne.s32.totalorder %s619_s23, %s4360_s3  ;;  %s4364_s29 = sshll.u32 %s4572_s0, 4  ;;  %s4365_s29 = int_to_ptr.vmem [resolvable:$false] %s4364_s29 }
  0xaf   : > { %s4366_s1 = scalar_lea.vmem %s4365_s29, 512  ;;  %p4367_p6 = scmp.lt.s32.totalorder %s619_s23, %s4365_s29 }
  0xb0   : > { %p4362_p9 = pnand %p4361_p8, %p5952_p1  ;;  %p4368_p7 = scmp.lt.s32.totalorder %s4366_s1, %s4360_s3 }
  0xb1   : > { %s617_s13 = scalar_lea.hbm %s5954_s7, %s4941_s22 }
  0xb2   : > { %p4363_p4 = pneg %p4362_p9  ;;  %p4369_p12 = por %p4368_p7, %p4367_p6 }
  0xb4   : > { %p4370_p0 = pnand %p4369_p12, %p4363_p4 }
  0xb6   : > { %4373 = shalt.err (!%p4370_p0)
}
  0xb7   : > { %3928 = dma.hbm_to_vmem [thread:$0]  (%p5952_p1), %s617_s13, 256, %s619_s23, %s4898_s14, %s4569_s10, %s4569_s10, %s4570_s16  }
  0xb8   : > { %s3638_s26 = sshll.u32 %s4542_s19, 7  ;;  %s5955_s8 = sld [smem:[#allocation69_spill]] }
  0xb9   : > { %s632_s15 = scalar_lea.vmem [#allocation14], %s3551_s4  ;;  %s4573_s24 = smov [#allocation14]  }
  0xba   : > { %s639_s28 = sshll.u32 %s632_s15, 4  ;;  %s4390_s18 = sshll.u32 %s4573_s24, 4  ;;  %s640_s28 = int_to_ptr.vmem [resolvable:$true] %s639_s28  ;;  %s4391_s18 = int_to_ptr.vmem [resolvable:$false] %s4390_s18 }
  0xbb   : > { %s4386_s1 = scalar_lea.vmem %s640_s28, 128  ;;  %s4392_s3 = scalar_lea.vmem %s4391_s18, 256 }
  0xbc   : > { %p4387_p2 = scmp.ne.s32.totalorder %s640_s28, %s4386_s1  ;;  %p4393_p3 = scmp.lt.s32.totalorder %s640_s28, %s4391_s18 }
  0xbd   : > { %p4394_p10 = scmp.lt.s32.totalorder %s4392_s3, %s4386_s1 }
  0xbe   : > { %s638_s25 = scalar_lea.hbm %s5955_s8, %s3638_s26  ;;  %p4388_p11 = pnand %p4387_p2, %p5952_p1 }
  0xbf   : > { %p4395_p8 = por %p4394_p10, %p4393_p3 }
  0xc0   : > { %p4389_p5 = pneg %p4388_p11 }
  0xc2   : > { %p4396_p9 = pnand %p4395_p8, %p4389_p5 }
  0xc4   : > { %4399 = shalt.err (!%p4396_p9)
}
  0xc5   : > { %3929 = dma.hbm_to_vmem [thread:$0]  (%p5952_p1), %s638_s25, 128, %s640_s28, %s4909_s11, %s4569_s10, %s4569_s10, %s4570_s16  }
  0xc6 PF: > { %664 = sbr.rel (%p4864_p13) target bundleno = 4379 (0x111b), region = 64  ;;  %s5956_s14 = sld [smem:[#allocation48_spill]] (!%p4864_p13) }
  0xc7   : > { %s5957_s13 = sld [smem:[#allocation44_spill]] (!%p4864_p13) }
  0xc8   : > { %s5958_s23 = sld [smem:[#allocation51_spill]] (!%p4864_p13) }
  0xcc   : > { %s5003_s4 = sand.u32 1, %s5956_s14  }
  0xcd   : > { %s668_s0 = sand.u32 1, %s5957_s13   ;;  %s667_s12 = scalar_lea.sflag [#allocation4], %s5003_s4 }
  0xce   : > { %s5006_s29 = sshll.u32 %s668_s0, 5  ;;  %p5959_p4 = scmp.ne.s32.totalorder %s5958_s23, 0 }
  0xcf   : > { %s5010_s26 = scalar_lea.vmem [#allocation3], %s5006_s29 }
  0xd0   : > { %4457 = dma.done.wait (%p5959_p4), %s667_s12, 512  }
  0xd1   : > { %4459 = vsyncadd (%p5959_p4), %s667_s12, 4294966784  ;;  %s5016_s17 = sshll.u32 %s668_s0, 2  ;;  %s676_s11 = scalar_lea.sflag [#allocation7], %s5003_s4 }
  0xd2   : > { %4461 = dma.done.wait (%p5959_p4), %s676_s11, 64  }
  0xd3   : > { %4463 = vsyncadd (%p5959_p4), %s676_s11, 4294967232  ;;  %s5960_s16 = sld [smem:[#allocation43_spill]] }
  0xd4   : > { %s5961_s22 = sld [smem:[#allocation54_spill]] }
  0xd9   : > { %s5025_s9 = sand.u32 1, %s5960_s16  }
  0xda   : > { %s3557_s25 = sshll.u32 %s5025_s9, 5  ;;  %p5962_p13 = scmp.ne.s32.totalorder %s5961_s22, 0 }
  0xdb   : > { %s5028_s15 = scalar_lea.vmem [#allocation8], %s3557_s25 }
  0xdc   : > { %4465 = dma.done.wait (%p5962_p13), %s676_s11, 512  }
  0xdd   : > { %4467 = vsyncadd (%p5962_p13), %s676_s11, 4294966784  ;;  %p5963_p1 = scmp.eq.s32.totalorder %s5956_s14, 0 }
  0xdf   : > { %4469 = dma.done.wait (%p5963_p1), [#allocation10], 128   ;;  %p5964_p6 = pmov %p5963_p1 }
  0xe0   : > { %s5965_s28 = sld [smem:[#allocation41_spill]] }
  0xe1   : > { %4471 = vsyncadd (%p5964_p6), [#allocation10], 4294967168  ;;  %s5966_s1 = sld [smem:[#allocation56_spill]] }
  0xe6   : > { %s699_s24 = sand.u32 1, %s5965_s28  }
  0xe7   : > { %s5039_s18 = sshll.u32 %s699_s24, 4  ;;  %p5967_p7 = scmp.ne.s32.totalorder %s5966_s1, 0 }
  0xe9   : > { %4473 = dma.done.wait (%p5967_p7), %s667_s12, 256  }
  0xea   : > { %4475 = vsyncadd (%p5967_p7), %s667_s12, 4294967040  ;;  %s710_s13 = scalar_lea.vmem [#allocation12], %s5039_s18 }
  0xeb   : > { %4477 = dma.done.wait (%p5967_p7), %s676_s11, 256  }
  0xec   : > { %4479 = vsyncadd (%p5967_p7), %s676_s11, 4294967040 }
  0xed   : > { %4481 = dma.done.wait (%p5967_p7), %s667_s12, 256  }
  0xee   : > { %4483 = vsyncadd (%p5967_p7), %s667_s12, 4294967040  ;;  %s5056_s23 = sshll.u32 %s699_s24, 3 }
  0xef   : > { %4485 = dma.done.wait (%p5967_p7), %s676_s11, 128  }
  0xf0   : > { %4487 = vsyncadd (%p5967_p7), %s676_s11, 4294967168  ;;  %s5968_s16 = sld [smem:[#allocation46_spill]]  ;;  %s3906_s12 = smul.u32 48, %s5025_s9  ;;  %v5084_v1 = vld [vmem:[%s5010_s26] sm:$0xff]  ;;  %v5087_v2 = vld [vmem:[%s5010_s26 + $0x8] sm:$0xff] }
  0xf1   : > { %s5969_s24 = sld [smem:[#allocation65_spill]]  ;;  %v5090_v3 = vld [vmem:[%s5010_s26 + $0x10] sm:$0xff]  ;;  %v5093_v4 = vld [vmem:[%s5010_s26 + $0x18] sm:$0xff]  ;;  %v5103_v7 = vld [vmem:[#allocation9] sm:$0xff]  ;;  %s5116_s5 = scalar_lea.vmem [#allocation16], %s5006_s29 }
  0xf2   : > { %s5970_s10 = sld [smem:[#allocation70_spill]]  ;;  %v5105_v8 = vld [vmem:[%s710_s13] sm:$0xf]  ;;  %v5107_v9 = vld [vmem:[%s710_s13 + $0x4] sm:$0xf]  ;;  %s5119_s6 = scalar_lea.vmem [#allocation18], %s5006_s29 }
  0xf3   : > { %s5971_s7 = sld [smem:[#allocation71_spill]]  ;;  %v5109_v10 = vld [vmem:[%s710_s13 + $0x8] sm:$0xf]  ;;  %v5111_v11 = vld [vmem:[%s710_s13 + $0xc] sm:$0xf] }
  0xf6   : > { %p827_p12 = scmp.lt.s32.totalorder %s5968_s16, 1  ;;  %p857_p0 = scmp.eq.s32.totalorder %s5968_s16, 0 }
  0xf7   : > { %p3568_p2 = scmp.ne.s32.totalorder %s5968_s16, 0 }
  0xf8   : > { %s5066_s22 = scalar_select %p827_p12, %s5968_s16, 1 }
  0xfa   : > { %s3639_s25 = sshll.u32 %s5066_s22, 4  ;;  %s3567_s11 = sshll.u32 %s5066_s22, 3 }
  0xfb   : > { %s831_s0 = scalar_lea.vmem %s5969_s24, %s3639_s25  ;;  %s835_s2 = scalar_lea.vmem %s5970_s10, %s3567_s11 }
  0xfc   : > { %s838_s8 = scalar_lea.vmem %s5971_s7, %s5066_s22  ;;  %v5081_v0 = vld [vmem:[%s835_s2] sm:$0x7f]  ;;  %s5972_s25 = scalar_lea.vmem [#allocation6], %s5016_s17 }
  0xfd   : > { %v5097_v5 = vld [vmem:[%s5972_s25] sm:$0x3]  ;;  %s5973_s3 = smov %s5972_s25  ;;  %s5113_s2 = scalar_lea.vmem [#allocation15], %s3906_s12 }
  0xfe   : > { %v5101_v6 = vld [vmem:[%s5973_s3 + $0x2] sm:$0x3]  ;;  %860 = sbr.rel (%p3568_p2) target bundleno = 262 (0x106), region = 100 }
 0x103   : > { %vm861_vm0 = vcmask 261120  }
 0x104   : > { %862 = vst.msk [vmem:[#allocation2] sm:$0xff] %vm861_vm0, %v5084_v1  ;;  %863 = vst.msk [vmem:[#allocation2 + $0x8] sm:$0xff] %vm861_vm0, %v5087_v2 }
 0x105   : > { %864 = vst.msk [vmem:[#allocation2 + $0x10] sm:$0xff] %vm861_vm0, %v5090_v3  ;;  %865 = vst.msk [vmem:[#allocation2 + $0x18] sm:$0xff] %vm861_vm0, %v5093_v4 }
 0x106 PF: > { %v4137_v12 = vld [vmem:[%s831_s0 + $0x8] sm:$0xff]   ;;  %v4138_v13 = vld [vmem:[%s831_s0] sm:$0xff]   ;;  %vm955_vm1 = vcmask 261120   ;;  %v4574_v20 = vmov 0.0   ;;  %vm4575_vm2 = vmmov 0   ;;  %s4576_s7 = smov 96   ;;  %v887_v39 = vlaneseq }
 0x107   : > { %3716 = vmatprep.subr.bf16.mxu0 %v4137_v12  ;;  %3724 = vmatprep.subr.bf16.mxu1 %v4574_v20  ;;  %v4577_v37 = vmov 1966171168   ;;  %v872_v40 = vrot.slane %v5097_v5, 1  ;;  %v876_v41 = vrot.slane %v5097_v5, 7  ;;  %v877_v42 = vrot.slane %v5101_v6, 6  ;;  %s4578_s29 = smov 64  }
 0x108   : > { %3717 = vmatpush3.bf16.msra.mxu0 %v4137_v12  ;;  %3726 = vmatprep.mubr.msk.bf16.mxu1 %vm4575_vm2, %v4574_v20  ;;  %v885_v38 = vunpack.c.l.s4 %v4577_v37  ;;  %vm873_vm3 = vcmask 1041409   ;;  %vm878_vm4 = vcmask 1043459   ;;  %v5190_v44 = vshrl.u32 %v887_v39, 7  ;;  %s5974_s26 = scalar_lea.vmem [#allocation11], %s5039_s18  ;;  %s5976_s10 = sld [smem:[#allocation46_spill]] }
 0x109   : > { %3718 = vmatprep.subr.bf16.mxu0 %v4138_v13  ;;  %v874_v45 = vsel %vm873_vm3, %v5101_v6, %v872_v40  ;;  %v5194_v46 = vsel %vm878_vm4, %v877_v42, %v876_v41  ;;  %vm881_vm5 = vcmask 1041408   ;;  %vm1231_vm6 = vcmask 64512   ;;  %s5975_s17 = smov %s5974_s26  ;;  %s5979_s14 = scalar_lea.vmem [#allocation13], %s5039_s18 }
 0x10a   : > { %v886_v43 = vunpack.c.0.s8 %v885_v38  ;;  %v882_v48 = vsel %vm881_vm5, %v874_v45, %v5194_v46  ;;  %v5204_v51 = vsub.s32 0, %v5190_v44  ;;  %vm1285_vm7 = vcmask 1043456   ;;  %s2342_s13 = scalar_select %p857_p0, 1, 0 }
 0x10b   : > { %v5126_v14 = vld [vmem:[#allocation2] sm:$0xff]  ;;  %v5128_v15 = vld [vmem:[#allocation2 + $0x8] sm:$0xff]  ;;  %s5980_s0 = smov %s5979_s14  ;;  %s4579_s16 = smov 16  }
 0x10c   : > { %v5130_v16 = vld [vmem:[#allocation2 + $0x10] sm:$0xff]  ;;  %v941_v17 = vpack.c.bf16 %v5128_v15, %v5126_v14  ;;  %v5134_v18 = vld [vmem:[#allocation2 + $0x18] sm:$0xff]  ;;  %3719 = vmatpush3.bf16.msra.mxu0 %v4138_v13  ;;  %v5197_v47 = vsub.s32 %v886_v43, %v5190_v44 }
 0x10d   : > { %v942_v19 = vpack.c.bf16 %v5134_v18, %v5130_v16  ;;  %3730 = vmatprep.subr.bf16.mxu0 %v4574_v20 }
 0x10e   : > { %3720 = vmatprep.mubr.msk.bf16.mxu0 %vm955_vm1, %v941_v17  ;;  %v890_v49 = vrot.slane %v882_v48, %v5197_v47  ;;  %p3619_p11 = scmp.ne.s32.totalorder %s5976_s10, 1 }
 0x10f   : > { %3721 = vmatmul.mubr.msk.bf16.vlgmr.msra.gmra.mxu0 %vm955_vm1, %v942_v19 }
 0x110   : > { %3732 = vmatprep.mubr.msk.bf16.mxu0 %vm4575_vm2, %v4574_v20  ;;  %v898_v50 = vrot.slane %v890_v49, %v5197_v47  ;;  %v891_v52 = vcombine.high %v890_v49, %v890_v49 }
 0x112   : > { %v1018_v53 = vrot.slane %v898_v50, %v5204_v51  ;;  %v905_v54 = vrot.slane %v891_v52, %v5197_v47  ;;  %v906_v58 = vcombine.high %v898_v50, %v898_v50 }
 0x114   : > { %v1022_v57 = vrot.slane %v905_v54, %v5204_v51  ;;  %v1026_v12 = vrot.slane %v906_v58, %v5204_v51  ;;  %v907_v13 = vcombine.high %v905_v54, %v905_v54 }
 0x1cf   : > { %v3722_v21 = vpop.f32.mrf.mxu0 }
 0x1d0   : > { %v5146_v22 = vpack.c.bf16 %v3722_v21, %v3722_v21 }
 0x1d1   : > { %v996_v23 = vpop.f32.mrf.mxu0 }
 0x1d2   : > { %v5148_v24 = vpack.c.bf16 %v996_v23, %v996_v23  ;;  %1134 = vrot.lane.b32.xlu1 %v5146_v22, %s4576_s7 }
 0x1d3   : > { %v3723_v25 = vpop.f32.mrf.mxu0 }
 0x1d4   : > { %v5152_v26 = vpack.c.bf16 %v3723_v25, %v3723_v25  ;;  %1036 = vrot.lane.b32.xlu0 %v5148_v24, %s4576_s7 }
 0x1d5   : > { %v999_v27 = vpop.f32.mrf.mxu0 }
 0x1d6   : > { %v5156_v28 = vpack.c.bf16 %v999_v27, %v999_v27  ;;  %1183 = vrot.lane.b32.xlu1 %v5152_v26, %s4576_s7 }
 0x1d8   : > { %1085 = vrot.lane.b32.xlu0 %v5156_v28, %s4576_s7 }
 0x244   : > { %v1135_v31 = vpop.permute.xlu1 %1134 }
 0x245   : > { %v1140_v34 = vsel %vm955_vm1, %v1135_v31, 0 }
 0x246   : > { %v1037_v29 = vpop.permute.xlu0 %1036 }
 0x247   : > { %v1042_v30 = vsel %vm955_vm1, %v1037_v29, 0  ;;  %v1030_v29 = vrot.slane %v907_v13, %v5204_v51 }
 0x248   : > { %3725 = vmatpush3.bf16.xpose.msra.mxu1 %v1042_v30  ;;  %v1184_v35 = vpop.permute.xlu1 %1183 }
 0x249   : > { %3736 = vmatprep.subr.bf16.mxu1 %v4574_v20  ;;  %v1189_v36 = vsel %vm955_vm1, %v1184_v35, 0 }
 0x24a   : > { %v1086_v32 = vpop.permute.xlu0 %1085 }
 0x24b   : > { %v1091_v33 = vsel %vm955_vm1, %v1086_v32, 0 }
 0x24c   : > { %3731 = vmatpush3.bf16.xpose.msra.mxu0 %v1091_v33 }
 0x24d   : > { %3742 = vmatprep.subr.bf16.mxu0 %v4574_v20 }
 0x24f   : > { %3727 = vmatmul.mubr.msk.bf16.vlgmr.msra.gmra.mxu1 %vm955_vm1, %v5148_v24 }
 0x250   : > { %3737 = vmatpush3.bf16.xpose.msra.mxu1 %v1140_v34  ;;  %3738 = vmatprep.mubr.msk.bf16.mxu1 %vm4575_vm2, %v4574_v20 }
 0x251   : > { %3748 = vmatprep.subr.bf16.mxu1 %v4574_v20 }
 0x253   : > { %3733 = vmatmul.mubr.msk.bf16.vlgmr.msra.gmra.mxu0 %vm955_vm1, %v5156_v28 }
 0x254   : > { %3743 = vmatpush3.bf16.xpose.msra.mxu0 %v1189_v36  ;;  %3744 = vmatprep.mubr.msk.bf16.mxu0 %vm4575_vm2, %v4574_v20 }
 0x255   : > { %3754 = vmatprep.subr.bf16.mxu0 %v4574_v20 }
 0x257   : > { %3739 = vmatmul.mubr.msk.bf16.vlgmr.msra.gmra.mxu1 %vm955_vm1, %v5146_v22 }
 0x258   : > { %3750 = vmatprep.mubr.msk.bf16.mxu1 %vm4575_vm2, %v4574_v20 }
 0x25b   : > { %3745 = vmatmul.mubr.msk.bf16.vlgmr.msra.gmra.mxu0 %vm955_vm1, %v5152_v26 }
 0x25c   : > { %3756 = vmatprep.mubr.msk.bf16.mxu0 %vm4575_vm2, %v4574_v20 }
 0x30f   : > { %v1078_v55 = vpop.f32.mrf.mxu1 }
 0x310   : > { %v1079_v56 = vadd.f32 %v1078_v55, %v1018_v53 }
 0x311   : > { %v3728_v59 = vpop.f32.mrf.mxu1 }
 0x312   : > { %v1232_v60 = vsel %vm1231_vm6, %v1079_v56, -inf }
 0x313   : > { %v1081_v61 = vpop.f32.mrf.mxu1  ;;  %1233 = vmax.xlane.f32.xlu0 %v1232_v60  ;;  %v1127_v62 = vpop.f32.mrf.mxu0 }
 0x314   : > { %v1128_v63 = vadd.f32 %v1127_v62, %v1022_v57 }
 0x315   : > { %v3729_v17 = vpop.f32.mrf.mxu1  ;;  %v3734_v19 = vpop.f32.mrf.mxu0 }
 0x316   : > { %v1235_v21 = vsel %vm1231_vm6, %v1128_v63, -inf }
 0x317   : > { %v1176_v23 = vpop.f32.mrf.mxu1  ;;  %1236 = vmax.xlane.f32.xlu1 %v1235_v21  ;;  %v1130_v25 = vpop.f32.mrf.mxu0 }
 0x318   : > { %v1177_v27 = vadd.f32 %v1176_v23, %v1026_v12 }
 0x319   : > { %v3735_v30 = vpop.f32.mrf.mxu0  ;;  %v3740_v31 = vpop.f32.mrf.mxu1 }
 0x31a   : > { %v1238_v32 = vsel %vm1231_vm6, %v1177_v27, -inf }
 0x31b   : > { %v1179_v33 = vpop.f32.mrf.mxu1  ;;  %1239 = vmax.xlane.f32.xlu0 %v1238_v32  ;;  %v1225_v34 = vpop.f32.mrf.mxu0 }
 0x31c   : > { %v1226_v35 = vadd.f32 %v1225_v34, %v1030_v29 }
 0x31d   : > { %v3741_v36 = vpop.f32.mrf.mxu1  ;;  %v3746_v37 = vpop.f32.mrf.mxu0 }
 0x31e   : > { %v1241_v38 = vsel %vm1231_vm6, %v1226_v35, -inf }
 0x31f   : > { %1242 = vmax.xlane.f32.xlu0 %v1241_v38  ;;  %v1228_v40 = vpop.f32.mrf.mxu0 }
 0x321   : > { %v3747_v41 = vpop.f32.mrf.mxu0 }
 0x328   : > { %1280 = vrot.lane.b32.xlu1 %v5148_v24, %s4578_s29 }
 0x39c   : > { %v1234_v42 = vpop.xlane.xlu0 %1233 }
 0x39d   : > { %v1244_v43 = vsub.f32 %v1079_v56, %v1234_v42 }
 0x39f   : > { %v1248_v45 = vmul.f32 1.442695, %v1244_v43 }
 0x3a0   : > { %v1237_v48 = vpop.xlane.xlu1 %1236 }
 0x3a1   : > { %4144 = vpow2.f32 %v1248_v45  ;;  %v1245_v49 = vsub.f32 %v1128_v63, %v1237_v48  ;;  %v5243_v45 = vcombine.low %v5109_v10, %v5111_v11  ;;  %v5249_v48 = vcombine.low %v5105_v8, %v5107_v9 }
 0x3a3   : > { %v1250_v50 = vmul.f32 1.442695, %v1245_v49 }
 0x3a4   : > { %v1281_v52 = vpop.permute.xlu1 %1280  ;;  %v1240_v53 = vpop.xlane.xlu0 %1239 }
 0x3a5   : > { %4146 = vpow2.f32 %v1250_v50  ;;  %v1287_v54 = vsel %vm1285_vm7, %v1281_v52, 0  ;;  %v1246_v55 = vsub.f32 %v1177_v27, %v1240_v53 }
 0x3a6   : > { %3749 = vmatpush3.bf16.msra.mxu1 %v1287_v54 }
 0x3a7   : > { %v1252_v57 = vmul.f32 1.442695, %v1246_v55  ;;  %3760 = vmatprep.subr.bf16.mxu1 %v4574_v20 }
 0x3a8   : > { %v1243_v58 = vpop.xlane.xlu0 %1242 }
 0x3a9   : > { %4148 = vpow2.f32 %v1252_v57  ;;  %v1247_v24 = vsub.f32 %v1226_v35, %v1243_v58 }
 0x3ab   : > { %v1254_v56 = vmul.f32 1.442695, %v1247_v24 }
 0x3ad   : > { %4150 = vpow2.f32 %v1254_v56 }
 0x3ae   : > { %v4145_v59 = vpop.eup %4144 }
 0x3af   : > { %v1256_v60 = vsel %vm1231_vm6, %v4145_v59, 0.0 }
 0x3b0   : > { %1257 = vadd.xlane.f32.xlu1 %v1256_v60 }
 0x3b2   : > { %v4147_v61 = vpop.eup %4146 }
 0x3b3   : > { %v1259_v62 = vsel %vm1231_vm6, %v4147_v61, 0.0 }
 0x3b4   : > { %1260 = vadd.xlane.f32.xlu0 %v1259_v62 }
 0x3b6   : > { %v4149_v63 = vpop.eup %4148 }
 0x3b7   : > { %v1262_v12 = vsel %vm1231_vm6, %v4149_v63, 0.0 }
 0x3b8   : > { %1263 = vadd.xlane.f32.xlu1 %v1262_v12 }
 0x3ba   : > { %v4151_v13 = vpop.eup %4150 }
 0x3bb   : > { %v1265_v17 = vsel %vm1231_vm6, %v4151_v13, 0.0 }
 0x3bc   : > { %1266 = vadd.xlane.f32.xlu0 %v1265_v17 }
 0x3c9   : > { %1377 = vrot.lane.b32.xlu1 %v5146_v22, %s4578_s29 }
 0x3cd   : > { %1425 = vrot.lane.b32.xlu1 %v5152_v26, %s4578_s29 }
 0x3d2   : > { %1329 = vrot.lane.b32.xlu0 %v5156_v28, %s4578_s29 }
 0x439   : > { %v1258_v19 = vpop.xlane.xlu1 %1257 }
 0x43a   : > { %4152 = vrcp.f32 %v1258_v19 }
 0x43d   : > { %v1261_v21 = vpop.xlane.xlu0 %1260 }
 0x43e   : > { %4154 = vrcp.f32 %v1261_v21 }
 0x441   : > { %v1264_v23 = vpop.xlane.xlu1 %1263 }
 0x442   : > { %4156 = vrcp.f32 %v1264_v23 }
 0x445   : > { %v1267_v25 = vpop.xlane.xlu0 %1266  ;;  %v1378_v29 = vpop.permute.xlu1 %1377 }
 0x446   : > { %4158 = vrcp.f32 %v1267_v25  ;;  %v1383_v26 = vsel %vm1285_vm7, %v1378_v29, 0 }
 0x447   : > { %v4153_v27 = vpop.eup %4152 }
 0x448   : > { %v1272_v30 = vmul.f32 %v4153_v27, %v4145_v59 }
 0x449   : > { %v1330_v31 = vpop.permute.xlu0 %1329  ;;  %v1426_v34 = vpop.permute.xlu1 %1425 }
 0x44a   : > { %v1335_v22 = vsel %vm1285_vm7, %v1330_v31, 0  ;;  %v1276_v32 = vpack.c.bf16 %v1272_v30, %v1272_v30  ;;  %v1431_v37 = vsel %vm1285_vm7, %v1426_v34, 0 }
 0x44b   : > { %v4155_v33 = vpop.eup %4154  ;;  %3755 = vmatpush3.bf16.msra.mxu0 %v1335_v22 }
 0x44c   : > { %3751 = vmatmul.mubr.msk.bf16.vlgmr.msra.gmra.mxu1 %vm1231_vm6, %v1276_v32  ;;  %3766 = vmatprep.subr.bf16.mxu0 %v4574_v20  ;;  %v1273_v28 = vmul.f32 %v4155_v33, %v4147_v61 }
 0x44d   : > { %3761 = vmatpush3.bf16.msra.mxu1 %v1383_v26  ;;  %3762 = vmatprep.mubr.msk.bf16.mxu1 %vm4575_vm2, %v4574_v20 }
 0x44e   : > { %v1277_v35 = vpack.c.bf16 %v1273_v28, %v1273_v28  ;;  %3772 = vmatprep.subr.bf16.mxu1 %v5243_v45 }
 0x44f   : > { %v4157_v36 = vpop.eup %4156 }
 0x450   : > { %3757 = vmatmul.mubr.msk.bf16.vlgmr.msra.gmra.mxu0 %vm1231_vm6, %v1277_v35  ;;  %v1274_v38 = vmul.f32 %v4157_v36, %v4149_v63 }
 0x451   : > { %3767 = vmatpush3.bf16.msra.mxu0 %v1431_v37  ;;  %3768 = vmatprep.mubr.msk.bf16.mxu0 %vm4575_vm2, %v4574_v20 }
 0x452   : > { %v1278_v40 = vpack.c.bf16 %v1274_v38, %v1274_v38 }
 0x453   : > { %v4159_v41 = vpop.eup %4158 }
 0x454   : > { %3763 = vmatmul.mubr.msk.bf16.vlgmr.msra.gmra.mxu1 %vm1231_vm6, %v1278_v40  ;;  %v1275_v42 = vmul.f32 %v4159_v41, %v4151_v13 }
 0x455   : > { %3773 = vmatpush3.bf16.msra.mxu1 %v5243_v45 }
 0x456   : > { %v1279_v43 = vpack.c.bf16 %v1275_v42, %v1275_v42  ;;  %3774 = vmatprep.subr.bf16.mxu1 %v5249_v48 }
 0x458   : > { %3769 = vmatmul.mubr.msk.bf16.vlgmr.msra.gmra.mxu0 %vm1231_vm6, %v1279_v43 }
 0x459   : > { %3775 = vmatpush3.bf16.msra.mxu1 %v5249_v48 }
 0x50c   : > { %v1323_v49 = vpop.f32.mrf.mxu1 }
 0x50e   : > { %v3752_v50 = vpop.f32.mrf.mxu1 }
 0x510   : > { %v1326_v52 = vpop.f32.mrf.mxu1  ;;  %v1371_v53 = vpop.f32.mrf.mxu0 }
 0x511   : > { %v1473_v54 = vpack.c.bf16 %v1371_v53, %v1323_v49  ;;  %v4139_v52 = vld [vmem:[%s5974_s26 + $0x8] sm:$0xff]   ;;  %v4140_v53 = vld [vmem:[%s5975_s17] sm:$0xff]  }
 0x512   : > { %v3753_v55 = vpop.f32.mrf.mxu1  ;;  %v3758_v10 = vpop.f32.mrf.mxu0  ;;  %3788 = vmatprep.subr.bf16.mxu1 %v4139_v52 }
 0x513   : > { %3776 = vmatprep.mubr.msk.bf16.mxu1 %vm955_vm1, %v1473_v54  ;;  %v1682_v54 = vpack.c.bf16 %v5087_v2, %v5084_v1  ;;  %v1683_v55 = vpack.c.bf16 %v5093_v4, %v5090_v3 }
 0x514   : > { %v1374_v11 = vpop.f32.mrf.mxu0  ;;  %v1419_v57 = vpop.f32.mrf.mxu1 }
 0x516   : > { %v3759_v58 = vpop.f32.mrf.mxu0  ;;  %v3764_v24 = vpop.f32.mrf.mxu1 }
 0x518   : > { %v1422_v56 = vpop.f32.mrf.mxu1  ;;  %v1467_v8 = vpop.f32.mrf.mxu0 }
 0x519   : > { %v1474_v9 = vpack.c.bf16 %v1467_v8, %v1419_v57 }
 0x51a   : > { %v3765_v59 = vpop.f32.mrf.mxu1  ;;  %v3770_v60 = vpop.f32.mrf.mxu0 }
 0x51b   : > { %3777 = vmatmul.mubr.msk.bf16.vlgmr.msra.gmra.mxu1 %vm955_vm1, %v1474_v9 }
 0x51c   : > { %v1470_v61 = vpop.f32.mrf.mxu0  ;;  %3789 = vmatpush3.bf16.msra.mxu1 %v4139_v52  ;;  %3792 = vmatprep.mubr.msk.bf16.mxu1 %vm955_vm1, %v1682_v54 }
 0x51d   : > { %3790 = vmatprep.subr.bf16.mxu1 %v4140_v53 }
 0x51e   : > { %v3771_v62 = vpop.f32.mrf.mxu0 }
 0x520   : > { %3791 = vmatpush3.bf16.msra.mxu1 %v4140_v53 }
 0x521   : > { %3802 = vmatprep.subr.bf16.mxu1 %v4574_v20 }
 0x523   : > { %3793 = vmatmul.mubr.msk.bf16.vlgmr.msra.gmra.mxu1 %vm955_vm1, %v1683_v55 }
 0x524   : > { %3804 = vmatprep.mubr.msk.bf16.mxu1 %vm4575_vm2, %v4574_v20 }
 0x5db   : > { %v3778_v63 = vpop.f32.mrf.mxu1 }
 0x5dc   : > { %v1544_v19 = vadd.f32 %v3778_v63, %v5130_v16  ;;  %v1602_v63 = vrot.slane %v5081_v0, %v5204_v51 }
 0x5dd   : > { %v1527_v12 = vpop.f32.mrf.mxu1 }
 0x5de   : > { %v1542_v13 = vadd.f32 %v1527_v12, %v5126_v14  ;;  %v1552_v29 = vsel %vm955_vm1, %v1544_v19, 0.0  ;;  %v1609_v12 = vsub.s32 1, %v5190_v44 }
 0x5df   : > { %v3779_v17 = vpop.f32.mrf.mxu1 }
 0x5e0   : > { %v1546_v21 = vsel %vm955_vm1, %v1542_v13, 0.0  ;;  %v1545_v27 = vadd.f32 %v3779_v17, %v5134_v18 }
 0x5e1   : > { %1547 = vadd.xlane.f32.xlu0 %v1546_v21  ;;  %v1530_v23 = vpop.f32.mrf.mxu1 }
 0x5e2   : > { %v1543_v25 = vadd.f32 %v1530_v23, %v5128_v15  ;;  %v1555_v31 = vsel %vm955_vm1, %v1545_v27, 0.0 }
 0x5e4   : > { %v1549_v30 = vsel %vm955_vm1, %v1543_v25, 0.0 }
 0x5e5   : > { %1553 = vadd.xlane.f32.xlu0 %v1552_v29  ;;  %1550 = vadd.xlane.f32.xlu1 %v1549_v30 }
 0x5e9   : > { %1556 = vadd.xlane.f32.xlu0 %v1555_v31 }
 0x66a   : > { %v1548_v14 = vpop.xlane.xlu0 %1547 }
 0x66b   : > { %v1559_v22 = vmul.f32 0.03125, %v1548_v14 }
 0x66d   : > { %v5263_v28 = vsub.f32 %v1542_v13, %v1559_v22 }
 0x66e   : > { %v1554_v16 = vpop.xlane.xlu0 %1553  ;;  %v1551_v32 = vpop.xlane.xlu1 %1550 }
 0x66f   : > { %v1561_v33 = vmul.f32 0.03125, %v1554_v16  ;;  %v1560_v26 = vmul.f32 0.03125, %v1551_v32  ;;  %v1567_v42 = vmul.f32 %v5263_v28, %v5263_v28 }
 0x671   : > { %v1565_v15 = vsub.f32 %v1544_v19, %v1561_v33  ;;  %v1564_v34 = vsub.f32 %v1543_v25, %v1560_v26  ;;  %v1571_v49 = vsel %vm955_vm1, %v1567_v42, 0.0 }
 0x672   : > { %v1557_v18 = vpop.xlane.xlu0 %1556 }
 0x673   : > { %v1562_v35 = vmul.f32 0.03125, %v1557_v18  ;;  %v1569_v36 = vmul.f32 %v1565_v15, %v1565_v15  ;;  %v1568_v37 = vmul.f32 %v1564_v34, %v1564_v34 }
 0x675   : > { %v1566_v38 = vsub.f32 %v1545_v27, %v1562_v35  ;;  %v1577_v40 = vsel %vm955_vm1, %v1569_v36, 0.0  ;;  %v1574_v41 = vsel %vm955_vm1, %v1568_v37, 0.0  ;;  %v1610_v27 = vrot.slane %v5081_v0, %v1609_v12 }
 0x676   : > { %1578 = vadd.xlane.f32.xlu1 %v1577_v40  ;;  %1575 = vadd.xlane.f32.xlu0 %v1574_v41 }
 0x677   : > { %v1570_v43 = vmul.f32 %v1566_v38, %v1566_v38 }
 0x679   : > { %v1580_v50 = vsel %vm955_vm1, %v1570_v43, 0.0  ;;  %v2343_v43 = vstv %s2342_s13 }
 0x67a   : > { %1572 = vadd.xlane.f32.xlu1 %v1571_v49  ;;  %1581 = vadd.xlane.f32.xlu0 %v1580_v50  ;;  %vm5334_vm8 = vcmp.eq.s32.totalorder %v2343_v43, 1 }
 0x68b   : > { %1619 = vrot.lane.b32.xlu1 %v5243_v45, %s4576_s7 }
 0x690   : > { %1617 = vrot.lane.b32.xlu0 %v5249_v48, %s4576_s7 }
 0x6ff   : > { %v1576_v10 = vpop.xlane.xlu0 %1575  ;;  %v1579_v11 = vpop.xlane.xlu1 %1578 }
 0x700   : > { %v1584_v57 = vmul.f32 0.03125, %v1576_v10  ;;  %v1585_v58 = vmul.f32 0.03125, %v1579_v11 }
 0x702   : > { %v1588_v1 = vadd.f32 1e-05, %v1584_v57  ;;  %v1589_v2 = vadd.f32 1e-05, %v1585_v58 }
 0x703   : > { %v1582_v24 = vpop.xlane.xlu0 %1581  ;;  %v1573_v56 = vpop.xlane.xlu1 %1572 }
 0x704   : > { %4160 = vrsqrt.f32 %v1588_v1  ;;  %v1586_v8 = vmul.f32 0.03125, %v1582_v24  ;;  %v1583_v3 = vmul.f32 0.03125, %v1573_v56  ;;  %v908_v56 = vrot.slane %v5101_v6, 7 }
 0x705   : > { %4162 = vrsqrt.f32 %v1589_v2 }
 0x706   : > { %v1590_v4 = vadd.f32 1e-05, %v1586_v8  ;;  %v1587_v9 = vadd.f32 1e-05, %v1583_v3  ;;  %v909_v8 = vsel %vm873_vm3, %v908_v56, %v5097_v5 }
 0x707   : > { %v1620_v59 = vpop.permute.xlu1 %1619  ;;  %v1618_v60 = vpop.permute.xlu0 %1617  ;;  %v911_v3 = vsel %vm881_vm5, %v909_v8, %v5194_v46 }
 0x708   : > { %4164 = vrsqrt.f32 %v1590_v4  ;;  %3780 = vmatprep.subr.bf16.mxu0 %v1620_v59  ;;  %v919_v4 = vrot.slane %v911_v3, %v5197_v47 }
 0x709   : > { %4166 = vrsqrt.f32 %v1587_v9  ;;  %3781 = vmatpush3.bf16.msra.mxu0 %v1620_v59 }
 0x70a   : > { %3782 = vmatprep.subr.bf16.mxu0 %v1618_v60  ;;  %v927_v9 = vrot.slane %v919_v4, %v5197_v47  ;;  %v920_v59 = vcombine.high %v919_v4, %v919_v4 }
 0x70d   : > { %3783 = vmatpush3.bf16.msra.mxu0 %v1618_v60  ;;  %v1762_v60 = vrot.slane %v927_v9, %v5204_v51 }
 0x70e   : > { %3796 = vmatprep.subr.bf16.mxu0 %v4574_v20 }
 0x711   : > { %v4161_v61 = vpop.eup %4160 }
 0x712   : > { %v4163_v62 = vpop.eup %4162  ;;  %v1596_v13 = vmul.f32 %v4161_v61, %v1564_v34  ;;  %v934_v61 = vrot.slane %v920_v59, %v5197_v47 }
 0x713   : > { %v1597_v17 = vmul.f32 %v4163_v62, %v1565_v15 }
 0x714   : > { %v1604_v30 = vmul.f32 %v1602_v63, %v1596_v13  ;;  %v1766_v12 = vrot.slane %v934_v61, %v5204_v51  ;;  %v935_v13 = vcombine.high %v927_v9, %v927_v9 }
 0x715   : > { %v4165_v19 = vpop.eup %4164  ;;  %v1605_v23 = vmul.f32 %v1602_v63, %v1597_v17 }
 0x716   : > { %v4167_v21 = vpop.eup %4166  ;;  %v1598_v25 = vmul.f32 %v4165_v19, %v1566_v38  ;;  %v5300_v33 = vadd.f32 %v1610_v27, %v1604_v30 }
 0x717   : > { %v1595_v29 = vmul.f32 %v4167_v21, %v5263_v28  ;;  %v5294_v22 = vadd.f32 %v1610_v27, %v1605_v23  ;;  %v3794_v28 = vpop.f32.mrf.mxu1 }
 0x718   : > { %v1606_v31 = vmul.f32 %v1602_v63, %v1598_v25  ;;  %v5328_v42 = vpack.c.bf16 %v3794_v28, %v3794_v28  ;;  %v1770_v25 = vrot.slane %v935_v13, %v5204_v51 }
 0x719   : > { %v1603_v14 = vmul.f32 %v1602_v63, %v1595_v29  ;;  %v1736_v34 = vpop.f32.mrf.mxu1 }
 0x71a   : > { %v5296_v16 = vadd.f32 %v1610_v27, %v1606_v31  ;;  %v5310_v18 = vpack.c.bf16 %v1736_v34, %v1736_v34  ;;  %v1875_v55 = vsel %vm955_vm1, %v5328_v42, 0 }
 0x71b   : > { %v5298_v32 = vadd.f32 %v1610_v27, %v1603_v14  ;;  %v3795_v35 = vpop.f32.mrf.mxu1  ;;  %v936_v27 = vcombine.high %v934_v61, %v934_v61 }
 0x71c   : > { %v1616_v26 = vpack.c.bf16 %v5296_v16, %v5294_v22  ;;  %v5314_v36 = vsel %vm955_vm1, %v5310_v18, 0  ;;  %v5340_v10 = vpack.c.bf16 %v3795_v35, %v3795_v35 }
 0x71d   : > { %v1615_v15 = vpack.c.bf16 %v5300_v33, %v5298_v32  ;;  %v1739_v37 = vpop.f32.mrf.mxu1 }
 0x71e   : > { %v5317_v38 = vpack.c.bf16 %v1739_v37, %v1739_v37  ;;  %v1921_v2 = vsel %vm955_vm1, %v5340_v10, 0 }
 0x71f   : > { %3784 = vmatprep.mubr.msk.bf16.mxu0 %vm955_vm1, %v1615_v15  ;;  %v1774_v15 = vrot.slane %v936_v27, %v5204_v51 }
 0x720   : > { %3785 = vmatmul.mubr.msk.bf16.vlgmr.msra.gmra.mxu0 %vm955_vm1, %v1616_v26  ;;  %v5322_v40 = vsel %vm955_vm1, %v5317_v38, 0 }
 0x721   : > { %3798 = vmatprep.mubr.msk.bf16.mxu0 %vm4575_vm2, %v4574_v20  ;;  %3797 = vmatpush3.bf16.xpose.msra.mxu0 %v5314_v36 }
 0x722   : > { %3808 = vmatprep.subr.bf16.mxu0 %v4574_v20  ;;  %3803 = vmatpush3.bf16.xpose.msra.mxu1 %v5322_v40 }
 0x723   : > { %3814 = vmatprep.subr.bf16.mxu1 %v4574_v20 }
 0x7e0   : > { %v3786_v41 = vpop.f32.mrf.mxu0 }
 0x7e1   : > { %v5330_v50 = vpack.c.bf16 %v3786_v41, %v3786_v41 }
 0x7e2   : > { %v1663_v49 = vpop.f32.mrf.mxu0 }
 0x7e3   : > { %v5332_v52 = vpack.c.bf16 %v1663_v49, %v1663_v49 }
 0x7e4   : > { %v3787_v54 = vpop.f32.mrf.mxu0 }
 0x7e5   : > { %v2345_v11 = vsel %vm5334_vm8, %v5332_v52, %v5330_v50  ;;  %3799 = vmatmul.mubr.msk.bf16.vlgmr.msra.gmra.mxu0 %vm955_vm1, %v5332_v52  ;;  %v5350_v58 = vpack.c.bf16 %v3787_v54, %v3787_v54 }
 0x7e6   : > { %3809 = vmatpush3.bf16.xpose.msra.mxu0 %v1875_v55  ;;  %v1666_v57 = vpop.f32.mrf.mxu0  ;;  %3810 = vmatprep.mubr.msk.bf16.mxu0 %vm4575_vm2, %v4574_v20 }
 0x7e7   : > { %v5352_v1 = vpack.c.bf16 %v1666_v57, %v1666_v57  ;;  %3820 = vmatprep.subr.bf16.mxu0 %v4574_v20 }
 0x7e9   : > { %v2346_v24 = vsel %vm5334_vm8, %v5352_v1, %v5350_v58  ;;  %3805 = vmatmul.mubr.msk.bf16.vlgmr.msra.gmra.mxu1 %vm955_vm1, %v5352_v1 }
 0x7ea   : > { %3815 = vmatpush3.bf16.xpose.msra.mxu1 %v1921_v2  ;;  %3816 = vmatprep.mubr.msk.bf16.mxu1 %vm4575_vm2, %v4574_v20 }
 0x7eb   : > { %3826 = vmatprep.subr.bf16.mxu1 %v4574_v20 }
 0x7ed   : > { %3811 = vmatmul.mubr.msk.bf16.vlgmr.msra.gmra.mxu0 %vm955_vm1, %v5330_v50 }
 0x7ee   : > { %3822 = vmatprep.mubr.msk.bf16.mxu0 %vm4575_vm2, %v4574_v20 }
 0x7f1   : > { %3817 = vmatmul.mubr.msk.bf16.vlgmr.msra.gmra.mxu1 %vm955_vm1, %v5350_v58 }
 0x7f2   : > { %3828 = vmatprep.mubr.msk.bf16.mxu1 %vm4575_vm2, %v4574_v20 }
 0x8a5   : > { %v1819_v62 = vpop.f32.mrf.mxu0 }
 0x8a6   : > { %v1820_v63 = vadd.f32 %v1819_v62, %v1762_v60 }
 0x8a7   : > { %v3800_v17 = vpop.f32.mrf.mxu0 }
 0x8a8   : > { %v1963_v19 = vsel %vm1231_vm6, %v1820_v63, -inf }
 0x8a9   : > { %1964 = vmax.xlane.f32.xlu1 %v1963_v19  ;;  %v1822_v21 = vpop.f32.mrf.mxu0  ;;  %v1865_v46 = vpop.f32.mrf.mxu1 }
 0x8aa   : > { %v1866_v23 = vadd.f32 %v1865_v46, %v1766_v12 }
 0x8ab   : > { %v3801_v29 = vpop.f32.mrf.mxu0  ;;  %v3806_v30 = vpop.f32.mrf.mxu1 }
 0x8ac   : > { %v1966_v31 = vsel %vm1231_vm6, %v1866_v23, -inf }
 0x8ad   : > { %v1911_v47 = vpop.f32.mrf.mxu0  ;;  %1967 = vmax.xlane.f32.xlu0 %v1966_v31  ;;  %v1868_v14 = vpop.f32.mrf.mxu1 }
 0x8ae   : > { %v1912_v26 = vadd.f32 %v1911_v47, %v1770_v25 }
 0x8af   : > { %v3807_v28 = vpop.f32.mrf.mxu1  ;;  %v3812_v34 = vpop.f32.mrf.mxu0 }
 0x8b0   : > { %v1969_v35 = vsel %vm1231_vm6, %v1912_v26, -inf }
 0x8b1   : > { %1970 = vmax.xlane.f32.xlu1 %v1969_v35  ;;  %v1914_v37 = vpop.f32.mrf.mxu0  ;;  %v1957_v41 = vpop.f32.mrf.mxu1 }
 0x8b2   : > { %v1958_v43 = vadd.f32 %v1957_v41, %v1774_v15 }
 0x8b3   : > { %v3813_v49 = vpop.f32.mrf.mxu0  ;;  %v3818_v54 = vpop.f32.mrf.mxu1 }
 0x8b4   : > { %v1972_v55 = vsel %vm1231_vm6, %v1958_v43, -inf }
 0x8b5   : > { %1973 = vmax.xlane.f32.xlu0 %v1972_v55  ;;  %v1960_v57 = vpop.f32.mrf.mxu1 }
 0x8b7   : > { %v3819_v2 = vpop.f32.mrf.mxu1 }
 0x8c2   : > { %2012 = vrot.lane.b32.xlu1 %v5310_v18, %s4576_s7 }
 0x932   : > { %v1965_v56 = vpop.xlane.xlu1 %1964 }
 0x933   : > { %v1975_v8 = vsub.f32 %v1820_v63, %v1965_v56 }
 0x935   : > { %v1979_v3 = vmul.f32 1.442695, %v1975_v8 }
 0x936   : > { %v1968_v4 = vpop.xlane.xlu0 %1967 }
 0x937   : > { %4168 = vpow2.f32 %v1979_v3  ;;  %v1976_v9 = vsub.f32 %v1866_v23, %v1968_v4 }
 0x939   : > { %v1981_v59 = vmul.f32 1.442695, %v1976_v9 }
 0x93a   : > { %v1971_v60 = vpop.xlane.xlu1 %1970 }
 0x93b   : > { %4170 = vpow2.f32 %v1981_v59  ;;  %v1977_v61 = vsub.f32 %v1912_v26, %v1971_v60 }
 0x93d   : > { %v1983_v62 = vmul.f32 1.442695, %v1977_v61 }
 0x93e   : > { %v2013_v12 = vpop.permute.xlu1 %2012  ;;  %v1974_v13 = vpop.xlane.xlu0 %1973 }
 0x93f   : > { %4172 = vpow2.f32 %v1983_v62  ;;  %v5393_v17 = vsel %vm1285_vm7, %v2013_v12, 0  ;;  %v1978_v19 = vsub.f32 %v1958_v43, %v1974_v13 }
 0x940   : > { %3821 = vmatpush3.bf16.msra.mxu0 %v5393_v17 }
 0x941   : > { %v1985_v18 = vmul.f32 1.442695, %v1978_v19  ;;  %3832 = vmatprep.subr.bf16.mxu0 %v4574_v20 }
 0x943   : > { %4174 = vpow2.f32 %v1985_v18 }
 0x944   : > { %v4169_v63 = vpop.eup %4168 }
 0x945   : > { %v1987_v21 = vsel %vm1231_vm6, %v4169_v63, 0.0 }
 0x946   : > { %1988 = vadd.xlane.f32.xlu1 %v1987_v21 }
 0x948   : > { %v4171_v46 = vpop.eup %4170 }
 0x949   : > { %v1990_v23 = vsel %vm1231_vm6, %v4171_v46, 0.0 }
 0x94a   : > { %1991 = vadd.xlane.f32.xlu0 %v1990_v23 }
 0x94c   : > { %v4173_v25 = vpop.eup %4172 }
 0x94d   : > { %v1993_v27 = vsel %vm1231_vm6, %v4173_v25, 0.0 }
 0x94e   : > { %1994 = vadd.xlane.f32.xlu1 %v1993_v27 }
 0x950   : > { %v4175_v29 = vpop.eup %4174 }
 0x951   : > { %v1996_v30 = vsel %vm1231_vm6, %v4175_v29, 0.0 }
 0x952   : > { %1997 = vadd.xlane.f32.xlu0 %v1996_v30 }
 0x95f   : > { %2110 = vrot.lane.b32.xlu1 %v5328_v42, %s4576_s7 }
 0x963   : > { %2159 = vrot.lane.b32.xlu1 %v5340_v10, %s4576_s7 }
 0x967   : > { %2209 = vrot.lane.b32.xlu1 %v5249_v48, %s4578_s29 }
 0x968   : > { %2061 = vrot.lane.b32.xlu0 %v5317_v38, %s4576_s7 }
 0x96c   : > { %2211 = vrot.lane.b32.xlu0 %v5243_v45, %s4578_s29 }
 0x9cf   : > { %v1989_v31 = vpop.xlane.xlu1 %1988 }
 0x9d0   : > { %4176 = vrcp.f32 %v1989_v31 }
 0x9d3   : > { %v1992_v47 = vpop.xlane.xlu0 %1991 }
 0x9d4   : > { %4178 = vrcp.f32 %v1992_v47 }
 0x9d7   : > { %v1995_v14 = vpop.xlane.xlu1 %1994 }
 0x9d8   : > { %4180 = vrcp.f32 %v1995_v14 }
 0x9db   : > { %v1998_v26 = vpop.xlane.xlu0 %1997  ;;  %v2111_v15 = vpop.permute.xlu1 %2110 }
 0x9dc   : > { %4182 = vrcp.f32 %v1998_v26  ;;  %v2116_v45 = vsel %vm1285_vm7, %v2111_v15, 0  ;;  %v2356_v15 = vrot.slane %v5101_v6, %v5204_v51 }
 0x9dd   : > { %v4177_v42 = vpop.eup %4176 }
 0x9de   : > { %v2003_v10 = vmul.f32 %v4177_v42, %v4169_v63 }
 0x9df   : > { %v2062_v28 = vpop.permute.xlu0 %2061  ;;  %v2160_v37 = vpop.permute.xlu1 %2159 }
 0x9e0   : > { %v5412_v48 = vsel %vm1285_vm7, %v2062_v28, 0  ;;  %v2007_v34 = vpack.c.bf16 %v2003_v10, %v2003_v10  ;;  %v2165_v49 = vsel %vm1285_vm7, %v2160_v37, 0  ;;  %vm2925_vm7 = vcmask 130048  }
 0x9e1   : > { %v4179_v38 = vpop.eup %4178  ;;  %3827 = vmatpush3.bf16.msra.mxu1 %v5412_v48 }
 0x9e2   : > { %3823 = vmatmul.mubr.msk.bf16.vlgmr.msra.gmra.mxu0 %vm1231_vm6, %v2007_v34  ;;  %3838 = vmatprep.subr.bf16.mxu1 %v4574_v20  ;;  %v2004_v35 = vmul.f32 %v4179_v38, %v4171_v46  ;;  %v2352_v46 = vrot.slane %v5097_v5, %v5204_v51 }
 0x9e3   : > { %3833 = vmatpush3.bf16.msra.mxu0 %v2116_v45  ;;  %3834 = vmatprep.mubr.msk.bf16.mxu0 %vm4575_vm2, %v4574_v20  ;;  %v5445_v8 = vpop.permute.xlu1 %2209 }
 0x9e4   : > { %v2008_v41 = vpack.c.bf16 %v2004_v35, %v2004_v35 }
 0x9e5   : > { %v4181_v43 = vpop.eup %4180 }
 0x9e6   : > { %3829 = vmatmul.mubr.msk.bf16.vlgmr.msra.gmra.mxu1 %vm1231_vm6, %v2008_v41  ;;  %v2005_v54 = vmul.f32 %v4181_v43, %v4173_v25 }
 0x9e7   : > { %3839 = vmatpush3.bf16.msra.mxu1 %v2165_v49  ;;  %3840 = vmatprep.mubr.msk.bf16.mxu1 %vm4575_vm2, %v4574_v20 }
 0x9e8   : > { %v2009_v55 = vpack.c.bf16 %v2005_v54, %v2005_v54  ;;  %3852 = vmatprep.subr.bf16.mxu1 %v4574_v20 }
 0x9e9   : > { %v4183_v57 = vpop.eup %4182 }
 0x9ea   : > { %3835 = vmatmul.mubr.msk.bf16.vlgmr.msra.gmra.mxu0 %vm1231_vm6, %v2009_v55  ;;  %v2006_v2 = vmul.f32 %v4183_v57, %v4175_v29 }
 0x9ec   : > { %v2010_v56 = vpack.c.bf16 %v2006_v2, %v2006_v2 }
 0x9ee   : > { %3841 = vmatmul.mubr.msk.bf16.vlgmr.msra.gmra.mxu1 %vm1231_vm6, %v2010_v56 }
 0x9ef   : > { %3853 = vmatpush3.bf16.xpose.msra.mxu1 %v5314_v36  ;;  %3854 = vmatprep.mubr.msk.bf16.mxu1 %vm4575_vm2, %v4574_v20  ;;  %v5441_v36 = vpop.permute.xlu0 %2211 }
 0x9f0   : > { %3864 = vmatprep.subr.bf16.mxu1 %v4574_v20  ;;  %3844 = vmatprep.subr.bf16.mxu0 %v5441_v36 }
 0x9f1   : > { %3845 = vmatpush3.bf16.msra.mxu0 %v5441_v36 }
 0x9f2   : > { %3846 = vmatprep.subr.bf16.mxu0 %v5445_v8 }
 0x9f5   : > { %3847 = vmatpush3.bf16.msra.mxu0 %v5445_v8 }
 0x9f6   : > { %3855 = vmatmul.mubr.msk.bf16.vlgmr.msra.gmra.mxu1 %vm955_vm1, %v2345_v11  ;;  %3858 = vmatprep.subr.bf16.mxu0 %v4574_v20 }
 0x9f7   : > { %3865 = vmatpush3.bf16.msra.mxu1 %v5393_v17  ;;  %3866 = vmatprep.mubr.msk.bf16.mxu1 %vm4575_vm2, %v4574_v20 }
 0x9f8   : > { %3876 = vmatprep.subr.bf16.mxu1 %v4574_v20 }
 0xaa2   : > { %v2054_v50 = vpop.f32.mrf.mxu0 }
 0xaa4   : > { %v3824_v52 = vpop.f32.mrf.mxu0 }
 0xaa6   : > { %v2057_v11 = vpop.f32.mrf.mxu0  ;;  %v2103_v3 = vpop.f32.mrf.mxu1 }
 0xaa7   : > { %v2207_v4 = vpack.c.bf16 %v2103_v3, %v2054_v50 }
 0xaa8   : > { %v3825_v9 = vpop.f32.mrf.mxu0  ;;  %v3830_v59 = vpop.f32.mrf.mxu1 }
 0xaa9   : > { %3848 = vmatprep.mubr.msk.bf16.mxu0 %vm955_vm1, %v2207_v4 }
 0xaaa   : > { %v2106_v60 = vpop.f32.mrf.mxu1  ;;  %v2152_v61 = vpop.f32.mrf.mxu0 }
 0xaac   : > { %v3831_v62 = vpop.f32.mrf.mxu1  ;;  %v3836_v12 = vpop.f32.mrf.mxu0 }
 0xaae   : > { %v2155_v13 = vpop.f32.mrf.mxu0  ;;  %v2201_v17 = vpop.f32.mrf.mxu1 }
 0xaaf   : > { %v2208_v19 = vpack.c.bf16 %v2201_v17, %v2152_v61 }
 0xab0   : > { %v3837_v18 = vpop.f32.mrf.mxu0  ;;  %v3842_v63 = vpop.f32.mrf.mxu1 }
 0xab1   : > { %3849 = vmatmul.mubr.msk.bf16.vlgmr.msra.gmra.mxu0 %vm955_vm1, %v2208_v19 }
 0xab2   : > { %3859 = vmatpush3.bf16.xpose.msra.mxu0 %v5322_v40  ;;  %v2204_v21 = vpop.f32.mrf.mxu1  ;;  %3860 = vmatprep.mubr.msk.bf16.mxu0 %vm4575_vm2, %v4574_v20 }
 0xab3   : > { %3870 = vmatprep.subr.bf16.mxu0 %v4574_v20 }
 0xab4   : > { %v3843_v23 = vpop.f32.mrf.mxu1 }
 0xab6   : > { %v2394_v25 = vpop.f32.mrf.mxu1 }
 0xab7   : > { %v2395_v27 = vadd.f32 %v2394_v25, %v2352_v46 }
 0xab8   : > { %v3856_v29 = vpop.f32.mrf.mxu1 }
 0xab9   : > { %3861 = vmatmul.mubr.msk.bf16.vlgmr.msra.gmra.mxu0 %vm955_vm1, %v2346_v24  ;;  %v2443_v40 = vsel %vm1231_vm6, %v2395_v27, -inf }
 0xaba   : > { %3871 = vmatpush3.bf16.msra.mxu0 %v5412_v48  ;;  %2444 = vmax.xlane.f32.xlu0 %v2443_v40  ;;  %v2397_v30 = vpop.f32.mrf.mxu1 }
 0xabb   : > { %3872 = vmatprep.mubr.msk.bf16.mxu0 %vm4575_vm2, %v4574_v20 }
 0xabc   : > { %v3857_v5 = vpop.f32.mrf.mxu1 }
 0xb43   : > { %v2445_v31 = vpop.xlane.xlu0 %2444 }
 0xb44   : > { %v2449_v47 = vsub.f32 %v2395_v27, %v2445_v31 }
 0xb46   : > { %v2451_v14 = vmul.f32 1.442695, %v2449_v47 }
 0xb48   : > { %4184 = vpow2.f32 %v2451_v14 }
 0xb55   : > { %v4185_v26 = vpop.eup %4184 }
 0xb56   : > { %v2455_v42 = vsel %vm1231_vm6, %v4185_v26, 0.0 }
 0xb57   : > { %2456 = vadd.xlane.f32.xlu0 %v2455_v42 }
 0xb71   : > { %v3850_v58 = vpop.f32.mrf.mxu0 }
 0xb72   : > { %v2272_v41 = vadd.f32 %v3850_v58, %v5294_v22 }
 0xb73   : > { %v2255_v1 = vpop.f32.mrf.mxu0 }
 0xb74   : > { %v2270_v38 = vadd.f32 %v2255_v1, %v5298_v32  ;;  %v2280_v49 = vsel %vm955_vm1, %v2272_v41, 0.0 }
 0xb75   : > { %v3851_v24 = vpop.f32.mrf.mxu0 }
 0xb76   : > { %v2274_v43 = vsel %vm955_vm1, %v2270_v38, 0.0  ;;  %v2273_v13 = vadd.f32 %v3851_v24, %v5296_v16  ;;  %v4141_v24 = vld [vmem:[%s5979_s14 + $0x8] sm:$0xff]  }
 0xb77   : > { %v2258_v10 = vpop.f32.mrf.mxu0  ;;  %3884 = vmatprep.subr.bf16.mxu0 %v4141_v24 }
 0xb78   : > { %v2271_v62 = vadd.f32 %v2258_v10, %v5300_v33  ;;  %v2283_v19 = vsel %vm955_vm1, %v2273_v13, 0.0  ;;  %v2839_v10 = vld [vmem:[%s5028_s15] sm:$0xff] }
 0xb79   : > { %v2437_v28 = vpop.f32.mrf.mxu0 }
 0xb7a   : > { %v2438_v48 = vadd.f32 %v2437_v28, %v2356_v15  ;;  %v2277_v17 = vsel %vm955_vm1, %v2271_v62, 0.0  ;;  %v4142_v15 = vld [vmem:[%s5980_s0] sm:$0xff]   ;;  %v2840_v28 = vld [vmem:[%s5028_s15 + $0x8] sm:$0xff] }
 0xb7b   : > { %v3862_v34 = vpop.f32.mrf.mxu0 }
 0xb7c   : > { %v2446_v45 = vsel %vm1231_vm6, %v2438_v48, -inf  ;;  %v2842_v34 = vld [vmem:[%s5028_s15 + $0x18] sm:$0xff] }
 0xb7d   : > { %2447 = vmax.xlane.f32.xlu1 %v2446_v45  ;;  %v2440_v35 = vpop.f32.mrf.mxu0 }
 0xb7f   : > { %v3863_v37 = vpop.f32.mrf.mxu0 }
 0xb81   : > { %2275 = vadd.xlane.f32.xlu1 %v2274_v43 }
 0xb85   : > { %2281 = vadd.xlane.f32.xlu1 %v2280_v49 }
 0xbe0   : > { %v2457_v6 = vpop.xlane.xlu0 %2456 }
 0xbe1   : > { %4186 = vrcp.f32 %v2457_v6 }
 0xbee   : > { %v4187_v51 = vpop.eup %4186 }
 0xbef   : > { %v2463_v54 = vmul.f32 %v4187_v51, %v4185_v26 }
 0xbf1   : > { %v2465_v55 = vpack.c.bf16 %v2463_v54, %v2463_v54 }
 0xbf3   : > { %3867 = vmatmul.mubr.msk.bf16.vlgmr.msra.gmra.mxu1 %vm1231_vm6, %v2465_v55 }
 0xbf4   : > { %3877 = vmatpush3.bf16.msra.mxu1 %v5441_v36  ;;  %3880 = vmatprep.mubr.msk.bf16.mxu1 %vm4575_vm2, %v4574_v20 }
 0xbf5   : > { %3878 = vmatprep.subr.bf16.mxu1 %v4574_v20 }
 0xbf8   : > { %3879 = vmatpush3.bf16.msra.mxu1 %v5445_v8 }
 0xbf9   : > { %3892 = vmatprep.subr.bf16.mxu1 %v4574_v20 }
 0xc06   : > { %v2448_v57 = vpop.xlane.xlu1 %2447 }
 0xc07   : > { %v2450_v2 = vsub.f32 %v2438_v48, %v2448_v57  ;;  %v2841_v48 = vld [vmem:[%s5028_s15 + $0x10] sm:$0xff] }
 0xc09   : > { %v2453_v56 = vmul.f32 1.442695, %v2450_v2  ;;  %v2328_v2 = vsub.s32 2, %v5190_v44 }
 0xc0a   : > { %v2276_v50 = vpop.xlane.xlu1 %2275 }
 0xc0b   : > { %4188 = vpow2.f32 %v2453_v56  ;;  %v2286_v52 = vmul.f32 0.03125, %v2276_v50 }
 0xc0d   : > { %v5483_v11 = vsub.f32 %v2270_v38, %v2286_v52  ;;  %v5514_v52 = vrot.slane %v5081_v0, %v2328_v2 }
 0xc0e   : > { %v2282_v3 = vpop.xlane.xlu1 %2281 }
 0xc0f   : > { %v2288_v4 = vmul.f32 0.03125, %v2282_v3  ;;  %v2294_v36 = vmul.f32 %v5483_v11, %v5483_v11  ;;  %v2336_v3 = vsub.s32 3, %v5190_v44 }
 0xc11   : > { %v5487_v9 = vsub.f32 %v2272_v41, %v2288_v4  ;;  %v2298_v59 = vsel %vm955_vm1, %v2294_v36, 0.0 }
 0xc12   : > { %2299 = vadd.xlane.f32.xlu1 %v2298_v59 }
 0xc13   : > { %v2296_v8 = vmul.f32 %v5487_v9, %v5487_v9 }
 0xc15   : > { %v2304_v60 = vsel %vm955_vm1, %v2296_v8, 0.0 }
 0xc16   : > { %2305 = vadd.xlane.f32.xlu1 %v2304_v60 }
 0xc18   : > { %v4189_v61 = vpop.eup %4188 }
 0xc19   : > { %v2458_v12 = vsel %vm1231_vm6, %v4189_v61, 0.0 }
 0xc1a   : > { %2459 = vadd.xlane.f32.xlu0 %v2458_v12 }
 0xc1e   : > { %2278 = vadd.xlane.f32.xlu0 %v2277_v17 }
 0xc22   : > { %2284 = vadd.xlane.f32.xlu0 %v2283_v19 }
 0xc27   : > { %2875 = vrot.lane.b32.xlu1 %v2839_v10, %s4579_s16 }
 0xc2b   : > { %2879 = vrot.lane.b32.xlu1 %v2841_v48, %s4579_s16 }
 0xc2f   : > { %2881 = vrot.lane.b32.xlu1 %v2842_v34, %s4579_s16 }
 0xc9b   : > { %v2300_v38 = vpop.xlane.xlu1 %2299 }
 0xc9c   : > { %v2310_v45 = vmul.f32 0.03125, %v2300_v38 }
 0xc9e   : > { %v2314_v37 = vadd.f32 1e-05, %v2310_v45 }
 0xc9f   : > { %v2306_v35 = vpop.xlane.xlu1 %2305 }
 0xca0   : > { %v2312_v41 = vmul.f32 0.03125, %v2306_v35 }
 0xca2   : > { %v2316_v43 = vadd.f32 1e-05, %v2312_v41 }
 0xca3   : > { %v2460_v18 = vpop.xlane.xlu0 %2459 }
 0xca4   : > { %4190 = vrcp.f32 %v2460_v18 }
 0xca5   : > { %4192 = vrsqrt.f32 %v2314_v37 }
 0xca6   : > { %4194 = vrsqrt.f32 %v2316_v43 }
 0xca7   : > { %v2279_v63 = vpop.xlane.xlu0 %2278 }
 0xca8   : > { %v2287_v21 = vmul.f32 0.03125, %v2279_v63 }
 0xcaa   : > { %v2291_v46 = vsub.f32 %v2271_v62, %v2287_v21 }
 0xcab   : > { %v2285_v23 = vpop.xlane.xlu0 %2284 }
 0xcac   : > { %v2289_v25 = vmul.f32 0.03125, %v2285_v23  ;;  %v2295_v27 = vmul.f32 %v2291_v46, %v2291_v46 }
 0xcae   : > { %v2293_v29 = vsub.f32 %v2273_v13, %v2289_v25  ;;  %v2301_v40 = vsel %vm955_vm1, %v2295_v27, 0.0 }
 0xcaf   : > { %2302 = vadd.xlane.f32.xlu0 %v2301_v40 }
 0xcb0   : > { %v2297_v30 = vmul.f32 %v2293_v29, %v2293_v29 }
 0xcb1   : > { %v4191_v5 = vpop.eup %4190 }
 0xcb2   : > { %v2307_v31 = vsel %vm955_vm1, %v2297_v30, 0.0  ;;  %v2464_v14 = vmul.f32 %v4191_v5, %v4189_v61  ;;  %v4193_v56 = vpop.eup %4192  ;;  %v5520_v61 = vrot.slane %v5081_v0, %v2336_v3  ;;  %v5553_v30 = vld [vmem:[%s838_s8] ss:$0 sm:$0xff]  ;;  %s5982_s8 = scalar_lea.vmem [#allocation14], %s5056_s23  ;;  %s4580_s23 = smov 112  }
 0xcb3   : > { %2308 = vadd.xlane.f32.xlu0 %v2307_v31  ;;  %v5500_v47 = vpop.f32.mrf.mxu1  ;;  %v2322_v50 = vmul.f32 %v4193_v56, %v5483_v11  ;;  %v4195_v4 = vpop.eup %4194 }
 0xcb4   : > { %v2466_v42 = vpack.c.bf16 %v2464_v14, %v2464_v14  ;;  %v2324_v59 = vmul.f32 %v4195_v4, %v5487_v9  ;;  %v5568_v4 = vand.u32 127, %v887_v39 }
 0xcb5   : > { %v3868_v26 = vpop.f32.mrf.mxu1  ;;  %v2330_v60 = vmul.f32 %v5514_v52, %v2322_v50 }
 0xcb6   : > { %3873 = vmatmul.mubr.msk.bf16.vlgmr.msra.gmra.mxu0 %vm1231_vm6, %v2466_v42  ;;  %v2332_v19 = vmul.f32 %v5514_v52, %v2324_v59  ;;  %vm2632_vm12 = vcmp.ge.s32.totalorder %v5568_v4, 16  ;;  %v3043_v4 = vsub.s32 4, %v5190_v44 }
 0xcb7   : > { %v2507_v58 = vpop.f32.mrf.mxu1  ;;  %3885 = vmatpush3.bf16.msra.mxu0 %v4141_v24  ;;  %v5524_v11 = vadd.f32 %v5520_v61, %v2330_v60 }
 0xcb8   : > { %3886 = vmatprep.subr.bf16.mxu0 %v4142_v15  ;;  %v5535_v63 = vadd.f32 %v5520_v61, %v2332_v19 }
 0xcb9   : > { %v3869_v1 = vpop.f32.mrf.mxu1 }
 0xcbb   : > { %3887 = vmatpush3.bf16.msra.mxu0 %v4142_v15 }
 0xcc9   : > { %2877 = vrot.lane.b32.xlu0 %v2840_v28, %s4579_s16 }
 0xd38   : > { %v2303_v49 = vpop.xlane.xlu0 %2302 }
 0xd39   : > { %v2311_v6 = vmul.f32 0.03125, %v2303_v49 }
 0xd3b   : > { %v2315_v51 = vadd.f32 1e-05, %v2311_v6 }
 0xd3c   : > { %v2309_v54 = vpop.xlane.xlu0 %2308 }
 0xd3d   : > { %4196 = vrsqrt.f32 %v2315_v51  ;;  %v2313_v55 = vmul.f32 0.03125, %v2309_v54 }
 0xd3f   : > { %v2317_v57 = vadd.f32 1e-05, %v2313_v55 }
 0xd41   : > { %4198 = vrsqrt.f32 %v2317_v57 }
 0xd4a   : > { %v4197_v36 = vpop.eup %4196 }
 0xd4b   : > { %v2323_v8 = vmul.f32 %v4197_v36, %v2291_v46 }
 0xd4d   : > { %v2331_v62 = vmul.f32 %v5514_v52, %v2323_v8 }
 0xd4e   : > { %v4199_v12 = vpop.eup %4198 }
 0xd4f   : > { %v2325_v13 = vmul.f32 %v4199_v12, %v2293_v29  ;;  %v5527_v17 = vadd.f32 %v5520_v61, %v2331_v62 }
 0xd51   : > { %v2637_v9 = vpack.c.bf16 %v5527_v17, %v5524_v11  ;;  %v2333_v18 = vmul.f32 %v5514_v52, %v2325_v13 }
 0xd53   : > { %3888 = vmatprep.mubr.msk.bf16.mxu0 %vm955_vm1, %v2637_v9  ;;  %v5538_v21 = vadd.f32 %v5520_v61, %v2333_v18 }
 0xd55   : > { %v2638_v46 = vpack.c.bf16 %v5538_v21, %v5535_v63 }
 0xd57   : > { %3889 = vmatmul.mubr.msk.bf16.vlgmr.msra.gmra.mxu0 %vm955_vm1, %v2638_v46 }
 0xd76   : > { %v2547_v23 = vpop.f32.mrf.mxu0 }
 0xd77   : > { %v2553_v25 = vpack.c.bf16 %v2547_v23, %v5500_v47 }
 0xd78   : > { %v3874_v27 = vpop.f32.mrf.mxu0 }
 0xd79   : > { %3881 = vmatmul.mubr.msk.bf16.vlgmr.msra.gmra.mxu1 %vm955_vm1, %v2553_v25 }
 0xd7a   : > { %v2550_v29 = vpop.f32.mrf.mxu0  ;;  %3893 = vmatpush3.bf16.msra.mxu1 %v4141_v24  ;;  %3896 = vmatprep.mubr.msk.bf16.mxu1 %vm4575_vm2, %v4574_v20 }
 0xd7b   : > { %3894 = vmatprep.subr.bf16.mxu1 %v4574_v20 }
 0xd7c   : > { %v3875_v40 = vpop.f32.mrf.mxu0 }
 0xd7e   : > { %3895 = vmatpush3.bf16.msra.mxu1 %v4142_v15 }
 0xe17   : > { %v3890_v5 = vpop.f32.mrf.mxu0 }
 0xe18   : > { %v2706_v31 = vadd.f32 %v3890_v5, %v5553_v30 }
 0xe19   : > { %v2697_v47 = vpop.f32.mrf.mxu0 }
 0xe1a   : > { %v2722_v14 = vand.u32 2147483647, %v2706_v31  ;;  %v2698_v26 = vadd.f32 %v5553_v30, %v2697_v47  ;;  %vm2714_vm9 = vcmp.gt.f32.partialorder %v2706_v31, 0.0 }
 0xe1b   : > { %v3891_v42 = vpop.f32.mrf.mxu0  ;;  %v2718_v60 = vsel %vm2714_vm9, %v2706_v31, 0.0 }
 0xe1c   : > { %v2726_v58 = vsub.f32 0.0, %v2722_v14  ;;  %v2720_v1 = vand.u32 2147483647, %v2698_v26  ;;  %v5558_v20 = vadd.f32 %v3891_v42, %v5553_v30  ;;  %vm2712_vm10 = vcmp.gt.f32.partialorder %v2698_v26, 0.0 }
 0xe1d   : > { %v2700_v24 = vpop.f32.mrf.mxu0  ;;  %v2716_v9 = vsel %vm2712_vm10, %v2698_v26, 0.0 }
 0xe1e   : > { %v2732_v15 = vmul.f32 1.442695, %v2726_v58  ;;  %v2724_v10 = vsub.f32 0.0, %v2720_v1  ;;  %v2723_v28 = vand.u32 2147483647, %v5558_v20  ;;  %v5562_v48 = vadd.f32 %v5553_v30, %v2700_v24 }
 0xe1f   : > { %vm2715_vm11 = vcmp.gt.f32.partialorder %v5558_v20, 0.0 }
 0xe20   : > { %4200 = vpow2.f32 %v2732_v15  ;;  %v2728_v34 = vmul.f32 1.442695, %v2724_v10  ;;  %v2727_v38 = vsub.f32 0.0, %v2723_v28  ;;  %v2721_v45 = vand.u32 2147483647, %v5562_v48  ;;  %v2876_v15 = vpop.permute.xlu1 %2875 }
 0xe21   : > { %v2719_v23 = vsel %vm2715_vm11, %v5558_v20, 0.0  ;;  %vm2713_vm13 = vcmp.gt.f32.partialorder %v5562_v48, 0.0 }
 0xe22   : > { %4202 = vpow2.f32 %v2728_v34  ;;  %v2734_v35 = vmul.f32 1.442695, %v2727_v38  ;;  %v2725_v37 = vsub.f32 0.0, %v2721_v45  ;;  %v2717_v42 = vsel %vm2713_vm13, %v5562_v48, 0.0  ;;  %v4143_v34 = vld [vmem:[%s5982_s8] sm:$0xff]  }
 0xe23   : > { %3900 = vmatprep.subr.bf16.mxu0 %v4143_v34 }
 0xe24   : > { %4204 = vpow2.f32 %v2734_v35  ;;  %v2730_v41 = vmul.f32 1.442695, %v2725_v37  ;;  %3901 = vmatpush3.bf16.msra.mxu0 %v4143_v34 }
 0xe26   : > { %4206 = vpow2.f32 %v2730_v41 }
 0xe2d   : > { %v4201_v43 = vpop.eup %4200 }
 0xe2e   : > { %v2738_v49 = vadd.f32 1.0, %v4201_v43 }
 0xe2f   : > { %v4203_v6 = vpop.eup %4202 }
 0xe30   : > { %4208 = vlog2.f32 %v2738_v49  ;;  %v2736_v51 = vadd.f32 1.0, %v4203_v6 }
 0xe31   : > { %v4205_v54 = vpop.eup %4204 }
 0xe32   : > { %4210 = vlog2.f32 %v2736_v51  ;;  %v2739_v55 = vadd.f32 1.0, %v4205_v54  ;;  %v2880_v51 = vpop.permute.xlu1 %2879 }
 0xe33   : > { %v4207_v57 = vpop.eup %4206 }
 0xe34   : > { %4212 = vlog2.f32 %v2739_v55  ;;  %v2737_v2 = vadd.f32 1.0, %v4207_v57 }
 0xe36   : > { %4214 = vlog2.f32 %v2737_v2  ;;  %v2878_v2 = vpop.permute.xlu0 %2877 }
 0xe39   : > { %v5565_v56 = vpop.f32.mrf.mxu1 }
 0xe3b   : > { %v3882_v50 = vpop.f32.mrf.mxu1 }
 0xe3d   : > { %v4209_v3 = vpop.eup %4208  ;;  %v5570_v59 = vpop.f32.mrf.mxu1 }
 0xe3e   : > { %v2745_v36 = vmul.f32 0.6931472, %v4209_v3 }
 0xe3f   : > { %v4211_v8 = vpop.eup %4210  ;;  %v3883_v13 = vpop.f32.mrf.mxu1 }
 0xe40   : > { %v2750_v62 = vadd.f32 %v2745_v36, %v2718_v60  ;;  %v2741_v12 = vmul.f32 0.6931472, %v4211_v8 }
 0xe41   : > { %v4213_v19 = vpop.eup %4212 }
 0xe42   : > { %v2754_v18 = vadd.f32 1e-06, %v2750_v62  ;;  %v2748_v39 = vadd.f32 %v2741_v12, %v2716_v9  ;;  %v2747_v46 = vmul.f32 0.6931472, %v4213_v19  ;;  %v2882_v12 = vpop.permute.xlu1 %2881  ;;  %v2347_v9 = vsel %vm5334_vm8, %v5298_v32, %v5294_v22 }
 0xe43   : > { %v4215_v25 = vpop.eup %4214 }
 0xe44   : > { %v5578_v27 = vsel %vm2632_vm12, %v2754_v18, %v2706_v31  ;;  %v2752_v29 = vadd.f32 1e-06, %v2748_v39  ;;  %v2751_v40 = vadd.f32 %v2747_v46, %v2719_v23  ;;  %v2743_v5 = vmul.f32 0.6931472, %v4215_v25 }
 0xe45   : > { %3614 = vst.msk [vmem:[%s5113_s2 + $0x20] sm:$0xff] %vm955_vm1, %v5578_v27  ;;  %4216 = vrsqrt.f32 %v5578_v27  ;;  %vm2859_vm15 = vcmp.eq.f32.partialorder %v5578_v27, inf  ;;  %v2862_v41 = vand.u32 2147483648, %v5578_v27  ;;  %vm2861_vm2 = vcmp.eq.f32.partialorder %v5578_v27, 0.0 }
 0xe46   : > { %v5586_v47 = vsel %vm2632_vm12, %v2752_v29, %v2698_v26  ;;  %v2755_v14 = vadd.f32 1e-06, %v2751_v40  ;;  %v2749_v31 = vadd.f32 %v2743_v5, %v2717_v42  ;;  %v2598_v18 = vadd.f32 %v5565_v56, %v2347_v9 }
 0xe47   : > { %2831 = vst.msk [vmem:[%s5113_s2] sm:$0xff] %vm955_vm1, %v5586_v47  ;;  %4218 = vrsqrt.f32 %v5586_v47  ;;  %vm2845_vm14 = vcmp.eq.f32.partialorder %v5586_v47, inf  ;;  %v2848_v45 = vand.u32 2147483648, %v5586_v47  ;;  %vm2847_vm0 = vcmp.eq.f32.partialorder %v5586_v47, 0.0 }
 0xe48   : > { %v5596_v58 = vsel %vm2632_vm12, %v2755_v14, %v5558_v20  ;;  %v2753_v26 = vadd.f32 1e-06, %v2749_v31  ;;  %v2600_v39 = vsel %vm955_vm1, %v2598_v18, 0.0  ;;  %v2348_v46 = vsel %vm5334_vm8, %v5300_v33, %v5296_v16 }
 0xe49   : > { %3615 = vst.msk [vmem:[%s5113_s2 + $0x28] sm:$0xff] %vm955_vm1, %v5596_v58  ;;  %4220 = vrsqrt.f32 %v5596_v58  ;;  %vm2866_vm3 = vcmp.eq.f32.partialorder %v5596_v58, inf  ;;  %v2869_v8 = vand.u32 2147483648, %v5596_v58  ;;  %vm2868_vm6 = vcmp.eq.f32.partialorder %v5596_v58, 0.0 }
 0xe4a   : > { %v2759_v1 = vsel %vm2632_vm12, %v2753_v26, %v5562_v48  ;;  %v2599_v23 = vadd.f32 %v5570_v59, %v2348_v46 }
 0xe4b   : > { %2832 = vst.msk [vmem:[%s5113_s2 + $0x8] sm:$0xff] %vm955_vm1, %v2759_v1  ;;  %4222 = vrsqrt.f32 %v2759_v1  ;;  %vm2852_vm4 = vcmp.eq.f32.partialorder %v2759_v1, inf  ;;  %v2855_v57 = vand.u32 2147483648, %v2759_v1  ;;  %vm2854_vm5 = vcmp.eq.f32.partialorder %v2759_v1, 0.0 }
 0xe4c   : > { %v2603_v25 = vsel %vm955_vm1, %v2599_v23, 0.0 }
 0xe52   : > { %v4217_v24 = vpop.eup %4216 }
 0xe53   : > { %v2858_v10 = vmul.f32 %v4217_v24, %v5578_v27 }
 0xe54   : > { %v4219_v28 = vpop.eup %4218 }
 0xe55   : > { %v2844_v20 = vmul.f32 %v4219_v28, %v5586_v47  ;;  %v2860_v35 = vsel %vm2859_vm15, %v5578_v27, %v2858_v10 }
 0xe56   : > { %v4221_v38 = vpop.eup %4220  ;;  %v2863_v54 = vsel %vm2861_vm2, %v2862_v41, %v2860_v35 }
 0xe57   : > { %v2846_v48 = vsel %vm2845_vm14, %v5586_v47, %v2844_v20  ;;  %v2865_v43 = vmul.f32 %v4221_v38, %v5596_v58  ;;  %v2889_v36 = vmul.f32 %v2880_v51, %v2863_v54 }
 0xe58   : > { %v2849_v37 = vsel %vm2847_vm0, %v2848_v45, %v2846_v48  ;;  %v4223_v49 = vpop.eup %4222 }
 0xe59   : > { %v2887_v6 = vmul.f32 %v2876_v15, %v2849_v37  ;;  %v2851_v55 = vmul.f32 %v4223_v49, %v2759_v1  ;;  %v2867_v50 = vsel %vm2866_vm3, %v5596_v58, %v2865_v43 }
 0xe5a   : > { %v2870_v13 = vsel %vm2868_vm6, %v2869_v8, %v2867_v50 }
 0xe5b   : > { %2895 = vrot.lane.b32.xlu0 %v2887_v6, %s4580_s23  ;;  %v2853_v3 = vsel %vm2852_vm4, %v2759_v1, %v2851_v55  ;;  %v2890_v19 = vmul.f32 %v2882_v12, %v2870_v13 }
 0xe5c   : > { %v2856_v60 = vsel %vm2854_vm5, %v2855_v57, %v2853_v3 }
 0xe5d   : > { %v2888_v62 = vmul.f32 %v2878_v2, %v2856_v60 }
 0xe5f   : > { %2899 = vrot.lane.b32.xlu0 %v2889_v36, %s4580_s23  ;;  %2897 = vrot.lane.b32.xlu1 %v2888_v62, %s4580_s23 }
 0xe63   : > { %2901 = vrot.lane.b32.xlu1 %v2890_v19, %s4580_s23 }
 0xe7e   : > { %2601 = vadd.xlane.f32.xlu0 %v2600_v39 }
 0xe87   : > { %2604 = vadd.xlane.f32.xlu1 %v2603_v25 }
 0xecd   : > { %v2896_v29 = vpop.permute.xlu0 %2895 }
 0xece   : > { %v2907_v5 = vadd.f32 %v2896_v29, %v5586_v47 }
 0xed1   : > { %v2898_v40 = vpop.permute.xlu1 %2897  ;;  %v2900_v32 = vpop.permute.xlu0 %2899 }
 0xed2   : > { %v2908_v22 = vadd.f32 %v2898_v40, %v2759_v1  ;;  %v2909_v42 = vadd.f32 %v2900_v32, %v5578_v27  ;;  %v2917_v27 = vsub.s32 6, %v5190_v44 }
 0xed4   : > { %v2913_v56 = vpack.c.bf16 %v2908_v22, %v2907_v5  ;;  %v2918_v20 = vrot.slane %v5081_v0, %v2917_v27 }
 0xed5   : > { %v2902_v14 = vpop.permute.xlu1 %2901 }
 0xed6   : > { %v2910_v31 = vadd.f32 %v2902_v14, %v5596_v58  ;;  %3902 = vmatprep.mubr.msk.bf16.mxu0 %vm2925_vm7, %v2913_v56 }
 0xed8   : > { %v2914_v16 = vpack.c.bf16 %v2910_v31, %v2909_v42 }
 0xeda   : > { %3903 = vmatmul.mubr.msk.bf16.vlgmr.msra.gmra.mxu0 %vm2925_vm7, %v2914_v16 }
 0xf07   : > { %v2602_v33 = vpop.xlane.xlu0 %2601 }
 0xf08   : > { %v2606_v53 = vmul.f32 0.03125, %v2602_v33 }
 0xf0a   : > { %v2608_v59 = vsub.f32 %v2598_v18, %v2606_v53 }
 0xf0c   : > { %v2610_v26 = vmul.f32 %v2608_v59, %v2608_v59 }
 0xf0e   : > { %v2612_v24 = vsel %vm955_vm1, %v2610_v26, 0.0 }
 0xf0f   : > { %2613 = vadd.xlane.f32.xlu0 %v2612_v24 }
 0xf10   : > { %v2605_v47 = vpop.xlane.xlu1 %2604 }
 0xf11   : > { %v2607_v1 = vmul.f32 0.03125, %v2605_v47 }
 0xf13   : > { %v2609_v15 = vsub.f32 %v2599_v23, %v2607_v1 }
 0xf15   : > { %v2611_v10 = vmul.f32 %v2609_v15, %v2609_v15 }
 0xf17   : > { %v2615_v28 = vsel %vm955_vm1, %v2611_v10, 0.0 }
 0xf18   : > { %2616 = vadd.xlane.f32.xlu0 %v2615_v28 }
 0xf98   : > { %v2614_v58 = vpop.xlane.xlu0 %2613 }
 0xf99   : > { %v2618_v34 = vmul.f32 0.03125, %v2614_v58 }
 0xf9a   : > { %v3904_v38 = vpop.f32.mrf.mxu0 }
 0xf9b   : > { %v2975_v45 = vadd.f32 %v3904_v38, %v2918_v20  ;;  %v2620_v48 = vadd.f32 1e-05, %v2618_v34 }
 0xf9c   : > { %v2966_v35 = vpop.f32.mrf.mxu0 }
 0xf9d   : > { %v2967_v37 = vadd.f32 %v2966_v35, %v2918_v20  ;;  %v2983_v43 = vadd.f32 %v2975_v45, %v5535_v63  ;;  %4224 = vrsqrt.f32 %v2620_v48 }
 0xf9e   : > { %v3905_v41 = vpop.f32.mrf.mxu0 }
 0xf9f   : > { %v2981_v49 = vadd.f32 %v2967_v37, %v5524_v11  ;;  %v2978_v6 = vadd.f32 %v3905_v41, %v2918_v20  ;;  %v2987_v8 = vadd.f32 %v2983_v43, %v5103_v7 }
 0xfa0   : > { %v2969_v51 = vpop.f32.mrf.mxu0 }
 0xfa1   : > { %v2970_v54 = vadd.f32 %v2969_v51, %v2918_v20  ;;  %v2617_v55 = vpop.xlane.xlu0 %2616  ;;  %v2985_v57 = vadd.f32 %v2981_v49, %v5103_v7  ;;  %v2984_v50 = vadd.f32 %v2978_v6, %v5538_v21  ;;  %v2995_v12 = vsel %vm955_vm1, %v2987_v8, 0.0 }
 0xfa2   : > { %v2619_v2 = vmul.f32 0.03125, %v2617_v55 }
 0xfa3   : > { %v2982_v3 = vadd.f32 %v2970_v54, %v5527_v17  ;;  %v2989_v36 = vsel %vm955_vm1, %v2985_v57, 0.0  ;;  %v2988_v19 = vadd.f32 %v2984_v50, %v5103_v7 }
 0xfa4   : > { %v2621_v60 = vadd.f32 1e-05, %v2619_v2  ;;  %2990 = vadd.xlane.f32.xlu1 %v2989_v36 }
 0xfa5   : > { %v2986_v62 = vadd.f32 %v2982_v3, %v5103_v7  ;;  %v2998_v9 = vsel %vm955_vm1, %v2988_v19, 0.0 }
 0xfa6   : > { %4226 = vrsqrt.f32 %v2621_v60 }
 0xfa7   : > { %v2992_v13 = vsel %vm955_vm1, %v2986_v62, 0.0 }
 0xfa8   : > { %2996 = vadd.xlane.f32.xlu1 %v2995_v12  ;;  %2993 = vadd.xlane.f32.xlu0 %v2992_v13 }
 0xfaa   : > { %v4225_v18 = vpop.eup %4224 }
 0xfab   : > { %v2624_v39 = vmul.f32 %v4225_v18, %v2608_v59 }
 0xfac   : > { %2999 = vadd.xlane.f32.xlu0 %v2998_v9 }
 0xfad   : > { %v2626_v25 = vmul.f32 %v2624_v39, %v5514_v52 }
 0xfaf   : > { %v2628_v40 = vadd.f32 %v2626_v25, %v5520_v61 }
 0xfb3   : > { %v4227_v46 = vpop.eup %4226 }
 0xfb4   : > { %v2625_v23 = vmul.f32 %v4227_v46, %v2609_v15 }
 0xfb6   : > { %v2627_v29 = vmul.f32 %v2625_v23, %v5514_v52 }
 0xfb8   : > { %v2629_v5 = vadd.f32 %v2627_v29, %v5520_v61 }
 0xfba   : > { %v2762_v22 = vpack.c.bf16 %v2629_v5, %v2628_v40 }
 0xfbc   : > { %3897 = vmatmul.mubr.msk.bf16.vlgmr.msra.gmra.mxu1 %vm955_vm1, %v2762_v22 }
0x102d   : > { %v2991_v7 = vpop.xlane.xlu1 %2990 }
0x102e   : > { %v3001_v32 = vmul.f32 0.03125, %v2991_v7 }
0x1030   : > { %v5660_v56 = vsub.f32 %v2985_v57, %v3001_v32 }
0x1031   : > { %v2994_v14 = vpop.xlane.xlu0 %2993  ;;  %v2997_v42 = vpop.xlane.xlu1 %2996 }
0x1032   : > { %v3002_v31 = vmul.f32 0.03125, %v2994_v14  ;;  %v3003_v16 = vmul.f32 0.03125, %v2997_v42  ;;  %v3009_v33 = vmul.f32 %v5660_v56, %v5660_v56  ;;  %v3051_v42 = vsub.s32 5, %v5190_v44 }
0x1034   : > { %v5664_v53 = vsub.f32 %v2986_v62, %v3002_v31  ;;  %v5666_v52 = vsub.f32 %v2987_v8, %v3003_v16  ;;  %v3013_v61 = vsel %vm955_vm1, %v3009_v33, 0.0  ;;  %v3044_v31 = vrot.slane %v5081_v0, %v3043_v4 }
0x1035   : > { %v3000_v59 = vpop.xlane.xlu0 %2999  ;;  %3014 = vadd.xlane.f32.xlu1 %v3013_v61  ;;  %v3052_v33 = vrot.slane %v5081_v0, %v3051_v42 }
0x1036   : > { %v3004_v26 = vmul.f32 0.03125, %v3000_v59  ;;  %v3010_v24 = vmul.f32 %v5664_v53, %v5664_v53  ;;  %v3011_v47 = vmul.f32 %v5666_v52, %v5666_v52 }
0x1038   : > { %v5673_v1 = vsub.f32 %v2988_v19, %v3004_v26  ;;  %v3016_v15 = vsel %vm955_vm1, %v3010_v24, 0.0  ;;  %v3019_v10 = vsel %vm955_vm1, %v3011_v47, 0.0 }
0x1039   : > { %3017 = vadd.xlane.f32.xlu0 %v3016_v15  ;;  %3020 = vadd.xlane.f32.xlu1 %v3019_v10 }
0x103a   : > { %v3012_v28 = vmul.f32 %v5673_v1, %v5673_v1 }
0x103c   : > { %v3022_v27 = vsel %vm955_vm1, %v3012_v28, 0.0 }
0x103d   : > { %3023 = vadd.xlane.f32.xlu0 %v3022_v27 }
0x107c   : > { %v2800_v58 = vpop.f32.mrf.mxu1 }
0x107d   : > { %v2801_v20 = vadd.f32 %v5553_v30, %v2800_v58 }
0x107e   : > { %v3898_v34 = vpop.f32.mrf.mxu1 }
0x107f   : > { %v2811_v38 = vand.u32 2147483647, %v2801_v20  ;;  %vm2807_vm8 = vcmp.gt.f32.partialorder %v2801_v20, 0.0 }
0x1080   : > { %v2803_v45 = vpop.f32.mrf.mxu1  ;;  %v2809_v3 = vsel %vm2807_vm8, %v2801_v20, 0.0 }
0x1081   : > { %v2813_v48 = vsub.f32 0.0, %v2811_v38  ;;  %v2804_v35 = vadd.f32 %v5553_v30, %v2803_v45 }
0x1082   : > { %v3899_v37 = vpop.f32.mrf.mxu1 }
0x1083   : > { %v2815_v41 = vmul.f32 1.442695, %v2813_v48  ;;  %v2812_v43 = vand.u32 2147483647, %v2804_v35  ;;  %vm2808_vm9 = vcmp.gt.f32.partialorder %v2804_v35, 0.0 }
0x1084   : > { %v2810_v62 = vsel %vm2808_vm9, %v2804_v35, 0.0 }
0x1085   : > { %4228 = vpow2.f32 %v2815_v41  ;;  %v2814_v49 = vsub.f32 0.0, %v2812_v43 }
0x1087   : > { %v2817_v6 = vmul.f32 1.442695, %v2814_v49 }
0x1089   : > { %4230 = vpow2.f32 %v2817_v6 }
0x1092   : > { %v4229_v51 = vpop.eup %4228 }
0x1093   : > { %v2819_v54 = vadd.f32 1.0, %v4229_v51 }
0x1095   : > { %4232 = vlog2.f32 %v2819_v54 }
0x1096   : > { %v4231_v55 = vpop.eup %4230 }
0x1097   : > { %v2820_v57 = vadd.f32 1.0, %v4231_v55 }
0x1099   : > { %4234 = vlog2.f32 %v2820_v57 }
0x10a2   : > { %v4233_v2 = vpop.eup %4232 }
0x10a3   : > { %v2822_v50 = vmul.f32 0.6931472, %v4233_v2 }
0x10a5   : > { %v2825_v30 = vadd.f32 %v2822_v50, %v2809_v3 }
0x10a6   : > { %v4235_v36 = vpop.eup %4234 }
0x10a7   : > { %v2827_v8 = vadd.f32 1e-06, %v2825_v30  ;;  %v2824_v60 = vmul.f32 0.6931472, %v4235_v36 }
0x10a9   : > { %v2829_v12 = vsel %vm2632_vm12, %v2827_v8, %v2801_v20  ;;  %v2826_v13 = vadd.f32 %v2824_v60, %v2810_v62 }
0x10aa   : > { %3612 = vst.msk [vmem:[%s5113_s2 + $0x10] sm:$0xff] %vm955_vm1, %v2829_v12 }
0x10ab   : > { %v2828_v19 = vadd.f32 1e-06, %v2826_v13 }
0x10ad   : > { %v2830_v9 = vsel %vm2632_vm12, %v2828_v19, %v2804_v35 }
0x10ae   : > { %3613 = vst.msk [vmem:[%s5113_s2 + $0x18] sm:$0xff] %vm955_vm1, %v2830_v9 }
0x10be   : > { %v3015_v18 = vpop.xlane.xlu1 %3014 }
0x10bf   : > { %v3025_v39 = vmul.f32 0.03125, %v3015_v18 }
0x10c1   : > { %v3029_v46 = vadd.f32 1e-05, %v3025_v39 }
0x10c2   : > { %v3018_v23 = vpop.xlane.xlu0 %3017  ;;  %v3021_v25 = vpop.xlane.xlu1 %3020 }
0x10c3   : > { %4236 = vrsqrt.f32 %v3029_v46  ;;  %v3026_v29 = vmul.f32 0.03125, %v3018_v23  ;;  %v3027_v40 = vmul.f32 0.03125, %v3021_v25 }
0x10c5   : > { %v3030_v5 = vadd.f32 1e-05, %v3026_v29  ;;  %v3031_v22 = vadd.f32 1e-05, %v3027_v40 }
0x10c6   : > { %v3024_v7 = vpop.xlane.xlu0 %3023 }
0x10c7   : > { %4238 = vrsqrt.f32 %v3030_v5  ;;  %v3028_v32 = vmul.f32 0.03125, %v3024_v7 }
0x10c8   : > { %4240 = vrsqrt.f32 %v3031_v22 }
0x10c9   : > { %v3032_v14 = vadd.f32 1e-05, %v3028_v32 }
0x10cb   : > { %4242 = vrsqrt.f32 %v3032_v14 }
0x10d0   : > { %v4237_v16 = vpop.eup %4236 }
0x10d1   : > { %v3037_v61 = vmul.f32 %v4237_v16, %v5660_v56 }
0x10d3   : > { %v3045_v59 = vmul.f32 %v3044_v31, %v3037_v61 }
0x10d4   : > { %v4239_v26 = vpop.eup %4238 }
0x10d5   : > { %v4241_v24 = vpop.eup %4240  ;;  %v3053_v47 = vadd.f32 %v3052_v33, %v3045_v59  ;;  %v3038_v15 = vmul.f32 %v4239_v26, %v5664_v53 }
0x10d6   : > { %v3039_v10 = vmul.f32 %v4241_v24, %v5666_v52 }
0x10d7   : > { %v3046_v28 = vmul.f32 %v3044_v31, %v3038_v15 }
0x10d8   : > { %v4243_v27 = vpop.eup %4242  ;;  %v3047_v58 = vmul.f32 %v3044_v31, %v3039_v10 }
0x10d9   : > { %v3054_v20 = vadd.f32 %v3052_v33, %v3046_v28  ;;  %v3040_v44 = vmul.f32 %v4243_v27, %v5673_v1  ;;  %3060 = sbr.rel (%p3619_p11) target bundleno = 4322 (0x10e2), region = 104 }
0x10da   : > { %v3055_v34 = vadd.f32 %v3052_v33, %v3047_v58 }
0x10db   : > { %v3048_v38 = vmul.f32 %v3044_v31, %v3040_v44 }
0x10dd   : > { %v3056_v45 = vadd.f32 %v3052_v33, %v3048_v38 }
0x10de   : > { %3061 = vst.msk [vmem:[%s5116_s5] sm:$0xff] %vm955_vm1, %v3053_v47  ;;  %3062 = vst.msk [vmem:[%s5116_s5 + $0x8] sm:$0xff] %vm955_vm1, %v3054_v20 }
0x10df   : > { %3063 = vst.msk [vmem:[%s5116_s5 + $0x10] sm:$0xff] %vm955_vm1, %v3055_v34  ;;  %3064 = vst.msk [vmem:[%s5116_s5 + $0x18] sm:$0xff] %vm955_vm1, %v3056_v45 }
0x10e0   : > { %3065 = vst.msk [vmem:[%s5119_s6] sm:$0xff] %vm955_vm1, %v5524_v11  ;;  %3066 = vst.msk [vmem:[%s5119_s6 + $0x8] sm:$0xff] %vm955_vm1, %v5527_v17 }
0x10e1   : > { %3067 = vst.msk [vmem:[%s5119_s6 + $0x10] sm:$0xff] %vm955_vm1, %v5535_v63  ;;  %3068 = vst.msk [vmem:[%s5119_s6 + $0x18] sm:$0xff] %vm955_vm1, %v5538_v21 }
0x10e2 PF: > { %s5983_s22 = sld [smem:[#allocation46_spill]] }
0x10e8   : > { %p3620_p5 = scmp.eq.s32.totalorder %s5983_s22, 1 }
0x10ea   : > { %3072 = sbr.rel (%p3620_p5) target bundleno = 4337 (0x10f1), region = 108 }
0x10ef   : > { %3073 = vst.msk [vmem:[#allocation2] sm:$0xff] %vm955_vm1, %v3053_v47  ;;  %3074 = vst.msk [vmem:[#allocation2 + $0x8] sm:$0xff] %vm955_vm1, %v3054_v20 }
0x10f0   : > { %3075 = vst.msk [vmem:[#allocation2 + $0x10] sm:$0xff] %vm955_vm1, %v3055_v34  ;;  %3076 = vst.msk [vmem:[#allocation2 + $0x18] sm:$0xff] %vm955_vm1, %v3056_v45 }
0x10f1 PF: > { %s3078_s11 = scalar_lea.sflag [#allocation5], %s5025_s9  ;;  %s3083_s28 = scalar_lea.sflag [#allocation17], %s5003_s4 }
0x10f2   : > { %s5984_s1 = sld [smem:[#allocation47_spill]]  ;;  %s3114_s29 = sshll.u32 %s5113_s2, 4  ;;  %s3115_s29 = int_to_ptr.vmem [resolvable:$true] %s3114_s29 }
0x10f3   : > { %s5985_s24 = sld [smem:[#allocation46_spill]]  ;;  %s4581_s10 = smov 256  }
0x10f4   : > { %s5986_s25 = sld [smem:[#allocation57_spill]]  ;;  %s4582_s16 = smov 512  }
0x10f5   : > { %s5988_s14 = sld [smem:[#allocation72_spill]]  ;;  %s4583_s15 = smov 2  }
0x10f6   : > { %s4584_s18 = smov 128   ;;  %s4585_s2 = smov 8  }
0x10f7   : > { %s4586_s12 = smov 131072   ;;  %s4587_s8 = smov 0  }
0x10f8   : > { %s3623_s3 = sshll.u32 %s5984_s1, 1 }
0x10f9   : > { %s3640_s7 = smul.u32 12, %s5985_s24 }
0x10fa   : > { %p5987_p3 = scmp.ne.s32.totalorder %s5986_s25, 0 }
0x10fb   : > { %s3101_s26 = sadd.s32 %s3640_s7, %s3623_s3 }
0x10fc   : > { %s3625_s17 = sshll.u32 %s3101_s26, 7  ;;  %3939 = sst [smem:[#allocation24]] (%p5987_p3), %s4581_s10 }
0x10fd   : > { %s3103_s0 = scalar_lea.hbm %s5988_s14, %s3625_s17  ;;  %3940 = sst [smem:[#allocation24 + $0x1]] (%p5987_p3), %s4582_s16 }
0x10fe   : > { %3941 = sst [smem:[#allocation24 + $0x2]] (%p5987_p3), %s4583_s15 }
0x10ff   : > { %3942 = sst [smem:[#allocation24 + $0x3]] (%p5987_p3), %s4584_s18 }
0x1100   : > { %3943 = sst [smem:[#allocation24 + $0x4]] (%p5987_p3), %s4584_s18 }
0x1101   : > { %3944 = sst [smem:[#allocation24 + $0x5]] (%p5987_p3), %s4585_s2 }
0x1102   : > { %3945 = dma.general (%p5987_p3), %s3115_s29, 768, %s3103_s0, %s3078_s11, %s4586_s12, [#allocation24], %s4587_s8, 0  }
0x1103   : > { %s5989_s23 = sld [smem:[#allocation59_spill]]  ;;  %s3641_s22 = sshll.u32 %s5984_s1, 8 }
0x1104   : > { %s3153_s24 = sshll.u32 %s5116_s5, 4  ;;  %s5990_s26 = sld [smem:[#allocation73_spill]]  ;;  %s3154_s24 = int_to_ptr.vmem [resolvable:$true] %s3153_s24 }
0x1105   : > { %s4588_s10 = smov 256   ;;  %s4589_s11 = smov 512  }
0x1106   : > { %s4590_s25 = smov 2   ;;  %s4591_s29 = smov 128  }
0x1107   : > { %s4592_s5 = smov 8   ;;  %s4593_s1 = smov 131072  }
0x1108   : > { %s4594_s9 = smov 0  }
0x1109   : > { %p5991_p10 = scmp.ne.s32.totalorder %s5989_s23, 0 }
0x110a   : > { %s3142_s17 = scalar_lea.hbm %s5990_s26, %s3641_s22 }
0x110b   : > { %3946 = sst [smem:[#allocation26]] (%p5991_p10), %s4588_s10 }
0x110c   : > { %3947 = sst [smem:[#allocation26 + $0x1]] (%p5991_p10), %s4589_s11 }
0x110d   : > { %3948 = sst [smem:[#allocation26 + $0x2]] (%p5991_p10), %s4590_s25 }
0x110e   : > { %3949 = sst [smem:[#allocation26 + $0x3]] (%p5991_p10), %s4591_s29 }
0x110f   : > { %3950 = sst [smem:[#allocation26 + $0x4]] (%p5991_p10), %s4591_s29 }
0x1110   : > { %3951 = sst [smem:[#allocation26 + $0x5]] (%p5991_p10), %s4592_s5 }
0x1111   : > { %3952 = dma.general (%p5991_p10), %s3154_s24, 512, %s3142_s17, %s3083_s28, %s4593_s1, [#allocation26], %s4594_s9, 0  }
0x1112   : > { %s5992_s0 = sld [smem:[#allocation74_spill]]  ;;  %s3192_s15 = sshll.u32 %s5119_s6, 4  ;;  %s3193_s15 = int_to_ptr.vmem [resolvable:$true] %s3192_s15 }
0x1113   : > { %s4595_s18 = smov 256   ;;  %s4596_s2 = smov 512  }
0x1114   : > { %3953 = sst [smem:[#allocation28]] (%p5991_p10), %s4595_s18  ;;  %s4597_s12 = smov 2  }
0x1115   : > { %3954 = sst [smem:[#allocation28 + $0x1]] (%p5991_p10), %s4596_s2  ;;  %s4598_s8 = smov 128  }
0x1116   : > { %3955 = sst [smem:[#allocation28 + $0x2]] (%p5991_p10), %s4597_s12  ;;  %s4599_s24 = smov 8  }
0x1117   : > { %3956 = sst [smem:[#allocation28 + $0x3]] (%p5991_p10), %s4598_s8  ;;  %s4601_s6 = smov 0  }
0x1118   : > { %s3181_s16 = scalar_lea.hbm %s5992_s0, %s3641_s22  ;;  %3957 = sst [smem:[#allocation28 + $0x4]] (%p5991_p10), %s4598_s8 }
0x1119   : > { %3958 = sst [smem:[#allocation28 + $0x5]] (%p5991_p10), %s4599_s24  ;;  %s4600_s22 = smov 131072  }
0x111a   : > { %3959 = dma.general (%p5991_p10), %s3193_s15, 512, %s3181_s16, %s3083_s28, %s4600_s22, [#allocation28], %s4601_s6, 0  }
0x111b PF: > { %s5993_s3 = sld [smem:[#allocation42_spill]]  ;;  %p3979_p8 = scmp.ge.s32.totalorder %s4550_s21, 2 }
0x111c   : > { %s5994_s7 = sld [smem:[#allocation58_spill]] }
0x1121   : > { %s3220_s26 = sand.u32 1, %s5993_s3  }
0x1122   : > { %p5995_p9 = scmp.ne.s32.totalorder %s5994_s7, 0  ;;  %s3221_s17 = scalar_lea.sflag [#allocation5], %s3220_s26 }
0x1124   : > { %p3968_p4 = pnand %p3979_p8, %p5995_p9 }
0x1126   : > { %p3969_p13 = pneg %p3968_p4 }
0x1128   : > { %4489 = dma.done.wait (%p3969_p13), %s3221_s17, 768  }
0x1129   : > { %4491 = vsyncadd (%p3969_p13), %s3221_s17, 4294966528  ;;  %s5996_s10 = sadd.s32 4294967294, %s4550_s21   ;;  %s5997_s11 = sld [smem:[#allocation60_spill]] }
0x112a   : > { %s3229_s25 = sand.u32 1, %s5996_s10  }
0x112b   : > { %s3230_s4 = scalar_lea.sflag [#allocation17], %s3229_s25 }
0x112f   : > { %p5998_p1 = scmp.ne.s32.totalorder %s5997_s11, 0 }
0x1131   : > { %p3971_p6 = pnand %p3979_p8, %p5998_p1 }
0x1133   : > { %p3972_p7 = pneg %p3971_p6 }
0x1135   : > { %4493 = dma.done.wait (%p3972_p7), %s3230_s4, 1024  }
0x1136   : > { %4495 = vsyncadd (%p3972_p7), %s3230_s4, 4294966272  ;;  %s37_s21 = sadd.s32 1, %s4550_s21   ;;  %s6000_s25 = sld [smem:[#allocation41_spill]] }
0x1137   : > { %p5796_p12 = scmp.ge.s32.totalorder %s37_s21, 6   ;;  %s6001_s23 = sld [smem:[#allocation55_spill]] }
0x1138   : > { %s6002_s29 = sld [smem:[#allocation43_spill]]  ;;  %s6010_s26 = smov %s4506_s27 }
0x1139   : > { %s6003_s5 = sld [smem:[#allocation53_spill]]  ;;  %s6015_s17 = smov %s4542_s19 }
0x113a   : > { %s6004_s14 = sld [smem:[#allocation44_spill]]  ;;  %s6016_s18 = smov %s4546_s20 }
0x113b   : > { %s6005_s15 = sld [smem:[#allocation45_spill]] }
0x113c   : > { %s6006_s16 = sld [smem:[#allocation52_spill]] }
0x113d   : > { %s6007_s1 = sld [smem:[#allocation49_spill]]  ;;  %s6011_s27 = smov %s6001_s23 }
0x113e   : > { %s6008_s9 = sld [smem:[#allocation50_spill]]  ;;  %s6012_s28 = smov %s6002_s29 }
0x113f   : > { %s6013_s29 = smov %s4518_s30  ;;  %s6014_s30 = smov %s6003_s5 }
0x1140   :  { %36 = sbr.rel (!%p5796_p12) target bundleno = 30 (0x1e), region = 261 }
0x1143   : > { %s6017_s19 = smov %s6007_s1 }
0x1144   : > { %s6018_s20 = smov %s6008_s9 }
0x1145   :  { %3244 = vsyncpa [#allocation4], 1 }
0x1146   :  { %3246 = vsyncpa [#allocation4 + $0x1], 1 }
0x1147   :  { %3247 = vsyncpa [#allocation7], 1 }
0x1148   :  { %3249 = vsyncpa [#allocation7 + $0x1], 1 }
0x1149   :  { %3250 = vsyncpa [#allocation10], 1 }
0x114a   :  { %3251 = vsyncpa [#allocation5], 1 }
0x114b   :  { %3253 = vsyncpa [#allocation5 + $0x1], 1 }
0x114c   :  { %3254 = vsyncpa [#allocation17], 1 }
0x114d   :  { %3256 = vsyncpa [#allocation17 + $0x1], 1 }

</bundles_post_ra>
